<compile_context>
chip_gen: v7x
topology: tpu7x:2x2x1
jax: 0.10.0
libtpu: 0.0.40
codegen_flags: <defaults>
</compile_context>

<pallas_src>
import jax
import jax.numpy as jnp
from jax.experimental import pallas as pl
from jax.experimental.pallas import tpu as pltpu

# -------- small config (scaled down from the original experiment) --------
BATCH = 2
N_SAMPLES = 1024          # exp.n_samples     (orig 2**15)
MODEL_DIM = 32            # exp.model_dim     (orig 128)
N_FRAMES = 32             # exp.n_frames
N_EVENTS = 4              # n_events          (orig 16)
N_POS_FREQS = 16          # pos_encoded -> 1 + 2*16 = 33 channels
POS_CH = 1 + 2 * N_POS_FREQS
N_BANDS = 16              # MusicalScale().n_bands stand-in
RESOLUTION = 8            # SegmentGenerator.resolution (orig 32)
WINDOW = N_SAMPLES // N_FRAMES
IMPULSE_RES = 128         # ImpulseGenerator / to_pos latent size
EVENT_LATENT = MODEL_DIM
DILATIONS = (1, 3, 9, 27, 1)
N_DIL = len(DILATIONS)
TFW = N_BANDS * RESOLUTION          # 128
ENV_W = 2 * N_FRAMES                # 64
M_EV = BATCH * N_EVENTS             # 8
HEAD_CHUNK = 256                    # lane chunk for resonance-bank streaming
N_CHUNKS = N_SAMPLES // HEAD_CHUNK

_VMEM = pl.BlockSpec(memory_space=pltpu.MemorySpace.VMEM)


def _full_spec(shape):
    """Whole-array block resident in VMEM for every grid step (constant index)."""
    return pl.BlockSpec(shape, lambda *_: (0,) * len(shape))


# ============================ Pallas kernel 1: fused encoder ============================

def _example_norm(t):
    # Per-example (examples stacked along the sublane axis) zero-mean / unit-std.
    # TODO(synk): ExampleNorm source unavailable; this is a stand-in.
    outs = []
    for b in range(BATCH):
        tb = t[b * N_FRAMES:(b + 1) * N_FRAMES]
        mu = jnp.mean(tb, keepdims=True)
        var = jnp.mean((tb - mu) ** 2, keepdims=True)
        outs.append((tb - mu) * jax.lax.rsqrt(var + 1e-8))      # EUP rsqrt, no divide
    return jnp.concatenate(outs, axis=0)


def _encoder_kernel(frames_ref, pos_ref, fb_w_ref, fb_b_ref,
                    rw_feat_ref, rw_pos_ref, r_b_ref,
                    dil_w_ref, dil_b_ref, h_ref):
    """Whole batch in one invocation; everything stays VMEM resident."""
    F, D = N_FRAMES, MODEL_DIM
    T = BATCH * F

    # exp.fb.forward + temporal_pooling stand-in: framed learned projection + |.|
    # TODO(synk): original filterbank unavailable.
    feat = jnp.abs(jnp.dot(frames_ref[...], fb_w_ref[...],
                           preferred_element_type=jnp.float32) + fb_b_ref[...])
    feat = _example_norm(feat)

    # Summarizer.reduce: concat([feat, pos], ch) @ W == feat @ W_feat + pos @ W_pos
    h = (jnp.dot(feat, rw_feat_ref[...], preferred_element_type=jnp.float32)
         + jnp.dot(pos_ref[...], rw_pos_ref[...], preferred_element_type=jnp.float32)
         + r_b_ref[...])

    # DilatedStack: residual k=3 dilated convs with leaky_relu; taps built
    # in-register via pltpu.roll (XLU) + zero-masking at per-example frame
    # boundaries, then ONE K=3D MXU matmul per layer.
    # TODO(synk): exact DilatedStack definition unavailable.
    row = jax.lax.broadcasted_iota(jnp.int32, (T, D), 0)
    frame = jax.lax.rem(row, F)                          # frame index within example
    for li, d in enumerate(DILATIONS):
        wd = dil_w_ref[li]                               # (3D, D)
        bd = dil_b_ref[li]                               # (1, D)
        left = jnp.where(frame >= d,
                         pltpu.roll(h, shift=d, axis=0), 0.0)                # h[f-d]
        right = jnp.where(frame < F - d,
                          pltpu.roll(h, shift=(T - d) % T, axis=0), 0.0)     # h[f+d]
        taps = jnp.concatenate([left, h, right], axis=-1)                    # (T, 3D)
        y = jnp.dot(taps, wd, preferred_element_type=jnp.float32) + bd
        h = h + jax.nn.leaky_relu(y, 0.2)

    h_ref[...] = _example_norm(h)


_ENC_COST = pl.CostEstimate(
    flops=BATCH * (2 * N_FRAMES * WINDOW * MODEL_DIM
                   + 2 * N_FRAMES * (MODEL_DIM + POS_CH) * MODEL_DIM
                   + N_DIL * 2 * N_FRAMES * 3 * MODEL_DIM * MODEL_DIM),
    transcendentals=BATCH * 8,
    bytes_accessed=4 * (BATCH * N_FRAMES * WINDOW + BATCH * N_FRAMES * POS_CH
                        + WINDOW * MODEL_DIM + MODEL_DIM * MODEL_DIM
                        + POS_CH * MODEL_DIM + 2 * MODEL_DIM
                        + N_DIL * (3 * MODEL_DIM * MODEL_DIM + MODEL_DIM)
                        + BATCH * N_FRAMES * MODEL_DIM))


def fused_encoder(params, frames, pos_tiled):
    bf = frames.shape[0]
    return pl.pallas_call(
        _encoder_kernel,
        out_shape=jax.ShapeDtypeStruct((bf, MODEL_DIM), jnp.float32),
        in_specs=[_VMEM] * 9,
        out_specs=_VMEM,
        cost_estimate=_ENC_COST,
    )(frames, pos_tiled,
      params['fb_w'], params['fb_b'],
      params['reduce_w_feat'], params['reduce_w_pos'], params['reduce_b'],
      params['dilated_w'], params['dilated_b'])


# ============================ Pallas kernel 2: fused per-event heads ============================

def _heads_kernel(sel_ref, hA_w_ref, hA_b_ref, pos_w_ref, pos_b_ref,
                  hB_w_ref, hB_b_ref, G_ref, Gt_ref, bank_ref,
                  tt_ref, pe_ref, wave_ref, tfw_sc):
    j = pl.program_id(0)

    # Small per-event heads + grouped softmax: computed once, kept in VMEM scratch.
    @pl.when(j == 0)
    def _():
        sel = sel_ref[...]

        # [to_time | to_transfer] in one wide matmul -> lane-dense slab output
        a = jnp.dot(sel, hA_w_ref[...], preferred_element_type=jnp.float32) + hA_b_ref[...]
        tt_ref[...] = a
        orig_time = a[:, :IMPULSE_RES]
        orig_transfer = a[:, IMPULSE_RES:]

        # to_pos ConvUpsample('learned', 128->128) simplified to a learned projection.
        # TODO(synk): ConvUpsample source unavailable.
        pos_lat = (jnp.dot(orig_time, pos_w_ref[...], preferred_element_type=jnp.float32)
                   + pos_b_ref[...])

        # [tf_up | env] in one wide matmul on `transfer`
        bh = (jnp.dot(orig_transfer, hB_w_ref[...], preferred_element_type=jnp.float32)
              + hB_b_ref[...])
        tf_lat = bh[:, :TFW]
        env = jax.nn.sigmoid(bh[:, TFW:])
        pe_ref[...] = jnp.concatenate([pos_lat, env], axis=-1)

        # softmax over RESOLUTION within each band (contiguous lane groups of 8):
        # global row-max is group-invariant; group-sum broadcast via two small
        # matmuls against constant selection masks (no lane-splitting reshapes).
        mx = jnp.max(tf_lat, axis=-1, keepdims=True)
        p = jnp.exp(tf_lat - mx)
        denom = jnp.dot(jnp.dot(p, G_ref[...], preferred_element_type=jnp.float32),
                        Gt_ref[...], preferred_element_type=jnp.float32)
        tf_w = p * pl.reciprocal(denom, approx=True)
        tfw_sc[...] = tf_w.astype(jnp.bfloat16)

    # Per-chunk resonance-bank synthesis: bank DMA pipelined against this matmul.
    wave_ref[...] = jnp.dot(tfw_sc[...], bank_ref[...],
                            preferred_element_type=jnp.float32)


_HEADS_COST = pl.CostEstimate(
    flops=(2 * M_EV * MODEL_DIM * (IMPULSE_RES + EVENT_LATENT)
           + 2 * M_EV * IMPULSE_RES * IMPULSE_RES
           + 2 * M_EV * MODEL_DIM * (TFW + ENV_W)
           + 2 * 2 * M_EV * TFW * N_BANDS
           + 2 * M_EV * TFW * N_SAMPLES),
    transcendentals=M_EV * (TFW + ENV_W),
    bytes_accessed=(4 * (M_EV * MODEL_DIM
                         + MODEL_DIM * (IMPULSE_RES + EVENT_LATENT)
                         + IMPULSE_RES * IMPULSE_RES
                         + MODEL_DIM * (TFW + ENV_W)
                         + 2 * TFW * N_BANDS
                         + M_EV * (IMPULSE_RES + EVENT_LATENT
                                   + IMPULSE_RES + ENV_W + N_SAMPLES))
                    + 2 * TFW * N_SAMPLES))          # bf16 bank


def fused_heads(params, flat):
    m = flat.shape[0]
    return pl.pallas_call(
        _heads_kernel,
        out_shape=(jax.ShapeDtypeStruct((m, IMPULSE_RES + EVENT_LATENT), jnp.float32),
                   jax.ShapeDtypeStruct((m, IMPULSE_RES + ENV_W), jnp.float32),
                   jax.ShapeDtypeStruct((m, N_SAMPLES), jnp.float32)),
        grid=(N_CHUNKS,),
        in_specs=[
            _full_spec((m, MODEL_DIM)),
            _full_spec((MODEL_DIM, IMPULSE_RES + EVENT_LATENT)),
            _full_spec((1, IMPULSE_RES + EVENT_LATENT)),
            _full_spec((IMPULSE_RES, IMPULSE_RES)),
            _full_spec((1, IMPULSE_RES)),
            _full_spec((MODEL_DIM, TFW + ENV_W)),
            _full_spec((1, TFW + ENV_W)),
            _full_spec((TFW, N_BANDS)),
            _full_spec((N_BANDS, TFW)),
            pl.BlockSpec((TFW, HEAD_CHUNK), lambda j: (0, j)),   # streamed bf16 bank
        ],
        out_specs=(
            _full_spec((m, IMPULSE_RES + EVENT_LATENT)),
            _full_spec((m, IMPULSE_RES + ENV_W)),
            pl.BlockSpec((m, HEAD_CHUNK), lambda j: (0, j)),     # lane-dense wave chunks
        ),
        scratch_shapes=[pltpu.VMEM((m, TFW), jnp.bfloat16)],
        # "arbitrary": heads + softmax are computed once at j==0 into scratch and
        # reused by subsequent chunk iterations (chunk axis must stay serial).
        compiler_params=pltpu.CompilerParams(dimension_semantics=("arbitrary",)),
        cost_estimate=_HEADS_COST,
    )(flat, params['headA_w'], params['headA_b'],
      params['to_pos_w'], params['to_pos_b'],
      params['headB_w'], params['headB_b'],
      params['softmax_G'], params['softmax_Gt'], params['bank'])


# ============================ JAX glue ============================

def fft_convolve(env, tf):
    """torch fft_convolve: zero-pad to 2N, rfft(ortho), multiply, irfft, crop."""
    # TODO(synk): FFT has no Pallas primitive (XLA FFT); the pointwise complex
    # multiply is left to XLA so it fuses with the adjacent rfft/irfft/pad ops.
    n = env.shape[-1]
    pad = [(0, 0)] * (env.ndim - 1) + [(0, n)]
    es = jnp.fft.rfft(jnp.pad(env, pad), axis=-1, norm='ortho')
    ts = jnp.fft.rfft(jnp.pad(tf, pad), axis=-1, norm='ortho')
    final = jnp.fft.irfft(es * ts, n=2 * n, axis=-1, norm='ortho')
    return final[..., :n]


def pos_encoded_frames(n_frames, n_freqs):
    pos = jnp.linspace(-1.0, 1.0, n_frames)
    feats = [pos[:, None]]
    for i in range(n_freqs):
        feats.append(jnp.sin((2.0 ** i) * jnp.pi * pos)[:, None])
        feats.append(jnp.cos((2.0 ** i) * jnp.pi * pos)[:, None])
    return jnp.concatenate(feats, axis=-1)                     # (F, 33)


def make_resonance_bank():
    # TODO(synk): TransferFunction source unavailable; fixed damped-resonance bank
    # at geometrically spaced band frequencies, RESOLUTION decay rates per band.
    t = jnp.arange(N_SAMPLES, dtype=jnp.float32)
    band = jnp.arange(N_BANDS, dtype=jnp.float32)
    freqs = 0.01 * (0.45 / 0.01) ** (band / (N_BANDS - 1))     # cycles / sample
    decays = jnp.linspace(2.0, 30.0, RESOLUTION) / N_SAMPLES
    sin = jnp.sin(2.0 * jnp.pi * freqs[:, None] * t[None, :])  # (NB, N)
    dec = jnp.exp(-decays[:, None] * t[None, :])               # (RES, N)
    bank = sin[:, None, :] * dec[None, :, :]                   # (NB, RES, N)
    bank = (bank / N_BANDS).reshape(N_BANDS * RESOLUTION, N_SAMPLES)
    return bank.astype(jnp.bfloat16)                           # bf16: halves bank DMA


def make_group_masks():
    lane = jnp.arange(TFW)[:, None]
    band = jnp.arange(N_BANDS)[None, :] * RESOLUTION
    G = ((lane >= band) & (lane < band + RESOLUTION)).astype(jnp.float32)  # (128, 16)
    return G, jnp.transpose(G)                                             # + (16, 128)


def init_params(key):
    s = 0.05  # exp.weight_init
    ks = iter(jax.random.split(key, 32))
    nrm = lambda shape: jax.random.normal(next(ks), shape, dtype=jnp.float32) * s
    G, Gt = make_group_masks()
    reduce_w = nrm((MODEL_DIM + POS_CH, MODEL_DIM))
    to_time_w, to_transfer_w = nrm((MODEL_DIM, IMPULSE_RES)), nrm((MODEL_DIM, EVENT_LATENT))
    tf_up_w, env_w = nrm((MODEL_DIM, TFW)), nrm((EVENT_LATENT, ENV_W))
    return {
        # stand-in for exp.fb (filterbank) projection
        'fb_w': nrm((WINDOW, MODEL_DIM)), 'fb_b': jnp.zeros((1, MODEL_DIM), jnp.float32),
        # Summarizer.reduce (1x1 conv over D+33 channels), pre-split feat/pos halves
        'reduce_w_feat': reduce_w[:MODEL_DIM], 'reduce_w_pos': reduce_w[MODEL_DIM:],
        'reduce_b': jnp.zeros((1, MODEL_DIM), jnp.float32),
        # DilatedStack: kernel-size-3 dilated convs, weights stacked per layer
        'dilated_w': nrm((N_DIL, 3 * MODEL_DIM, MODEL_DIM)),
        'dilated_b': jnp.zeros((N_DIL, 1, MODEL_DIM), jnp.float32),
        # LinearOutputStack heads, pre-concatenated along N: [to_time | to_transfer]
        'headA_w': jnp.concatenate([to_time_w, to_transfer_w], axis=1),
        'headA_b': jnp.zeros((1, IMPULSE_RES + EVENT_LATENT), jnp.float32),
        # to_pos ConvUpsample stand-in
        'to_pos_w': nrm((IMPULSE_RES, IMPULSE_RES)),
        'to_pos_b': jnp.zeros((1, IMPULSE_RES), jnp.float32),
        # SegmentGenerator: [transfer ConvUpsample | env ConvUpsample] concatenated
        'headB_w': jnp.concatenate([tf_up_w, env_w], axis=1),
        'headB_b': jnp.zeros((1, TFW + ENV_W), jnp.float32),
        # grouped-softmax selection masks (constants)
        'softmax_G': G, 'softmax_Gt': Gt,
        'noise_factor': jnp.float32(100000.0),
        'bank': make_resonance_bank(),
    }


def model_forward(params, x, rng):
    B = x.shape[0]
    k_noise, k_gumbel = jax.random.split(rng, 2)

    # ----- Summarizer.encode path: ONE fused Pallas kernel over the whole batch -----
    frames = x.reshape(B * N_FRAMES, WINDOW).astype(jnp.float32)
    pos = jnp.tile(pos_encoded_frames(N_FRAMES, N_POS_FREQS), (B, 1))   # constant under jit
    h = fused_encoder(params, frames, pos).reshape(B, N_FRAMES, MODEL_DIM)

    # VectorwiseSparsity: keep top-n_events frames by vector norm, unit-normalize
    # (tiny data-dependent top_k/gather -> left to XLA)
    norms = jnp.linalg.norm(h, axis=-1)                        # (B, F)
    _, indices = jax.lax.top_k(norms, N_EVENTS)                # (B, E)
    sel = jnp.take_along_axis(h, indices[..., None], axis=1)   # (B, E, D)
    sel = sel / (jnp.linalg.norm(sel, axis=-1, keepdims=True) + 1e-8)
    encoded = sel
    flat = sel.reshape(B * N_EVENTS, MODEL_DIM)

    # ----- all per-event heads: ONE fused Pallas kernel (bank streamed in chunks) -----
    tt, pe, tf_wave = fused_heads(params, flat)
    orig_time = tt[:, :IMPULSE_RES]
    orig_transfer = tt[:, IMPULSE_RES:]
    pos_lat = pe[:, :IMPULSE_RES]
    env_raw = pe[:, IMPULSE_RES:]
    time = pos_lat
    transfer = orig_transfer                                   # VQ passthrough=True
    tf_loss = 0.0

    # ImpulseGenerator with exp_softmax == F.gumbel_softmax(exp(x), tau=1, hard=True):
    # PyTorch adds Gumbel noise directly to its `logits` argument, which here is
    # exp(pos_lat); hard=True keeps only the argmax position, and since the one-hot
    # convolution below is an exact shift, only that index is needed.
    logits = jnp.exp(pos_lat)
    u = jax.random.uniform(k_gumbel, logits.shape, minval=1e-6, maxval=1.0 - 1e-6)
    gumbel = -jnp.log(-jnp.log(u))
    idx = jnp.argmax(logits + gumbel, axis=-1)                 # (B*E,)
    shifts = (idx * (N_SAMPLES // IMPULSE_RES)).astype(jnp.int32)

    # ----- SegmentGenerator.forward(time, transfer) -----
    orig_env = env_raw[:, None, :]                             # (B*E, 1, 2F)
    env = jax.image.resize(orig_env, (B * N_EVENTS, 1, N_SAMPLES), method='linear')
    noise = jax.random.uniform(k_noise, (1, 1, N_SAMPLES),
                               minval=-1.0, maxval=1.0) * params['noise_factor']
    env = env * noise

    tf_wave3 = tf_wave[:, None, :]                             # (B*E, 1, N)
    final = fft_convolve(env, tf_wave3)                        # (B*E, 1, N)
    final = jnp.mean(final, axis=1, keepdims=True)
    x_ev = final.reshape(B * N_EVENTS, N_SAMPLES)

    # fft_convolve(x, one-hot impulse at position p) == zero-filled right shift
    # by p, times the rfft/irfft 'ortho' 1/sqrt(2N) factor (no FFTs needed).
    scale = (2.0 * N_SAMPLES) ** -0.5
    padded = jnp.pad(x_ev, ((0, 0), (N_SAMPLES, 0)))
    shifted = jax.vmap(
        lambda row, s: jax.lax.dynamic_slice(row, (N_SAMPLES - s,), (N_SAMPLES,))
    )(padded, shifts) * scale
    x_conv = shifted.reshape(B, N_EVENTS, N_SAMPLES)
    output = jnp.sum(x_conv, axis=1, keepdims=True)            # (B, 1, N)

    loss = 0.0 + tf_loss
    env_out = env_raw.reshape(B, N_EVENTS, ENV_W)
    return (output, indices, encoded, env_out, loss, tf_wave3,
            time, transfer, orig_time, orig_transfer)


if __name__ == "__main__":
    key = jax.random.PRNGKey(0)
    pkey, xkey, rkey = jax.random.split(key, 3)
    params = init_params(pkey)
    x = jax.random.normal(xkey, (BATCH, N_SAMPLES), dtype=jnp.float32)

    fwd = jax.jit(model_forward)
    out = fwd(params, x, rkey)
    out = jax.block_until_ready(out)

    output, indices, encoded = out[0], out[1], out[2]
    assert output.shape == (BATCH, 1, N_SAMPLES)
    assert indices.shape == (BATCH, N_EVENTS)
    assert encoded.shape == (BATCH, N_EVENTS, MODEL_DIM)
    assert out[3].shape == (BATCH, N_EVENTS, ENV_W)
    assert all(jnp.all(jnp.isfinite(o)) for o in (output, encoded, out[3]))
    print("KERNEL_OK")
</pallas_src>

<mosaic_0001>
module attributes {stable_mosaic.version = 11 : i64} {
  func.func @_encoder_kernel(%arg0: memref<64x32xf32, #tpu.memory_space<vmem>>, %arg1: memref<64x33xf32, #tpu.memory_space<vmem>>, %arg2: memref<32x32xf32, #tpu.memory_space<vmem>>, %arg3: memref<1x32xf32, #tpu.memory_space<vmem>>, %arg4: memref<32x32xf32, #tpu.memory_space<vmem>>, %arg5: memref<33x32xf32, #tpu.memory_space<vmem>>, %arg6: memref<1x32xf32, #tpu.memory_space<vmem>>, %arg7: memref<5x96x32xf32, #tpu.memory_space<vmem>>, %arg8: memref<5x1x32xf32, #tpu.memory_space<vmem>>, %arg9: memref<64x32xf32, #tpu.memory_space<vmem>>) attributes {dimension_semantics = [], scalar_prefetch = 0 : i64, scratch_operands = 0 : i64, tpu.core_type = #tpu.core_type<tc>} {
    %c0 = arith.constant 0 : index
    %c0_0 = arith.constant 0 : index
    %0 = vector.load %arg0[%c0, %c0_0] : memref<64x32xf32, #tpu.memory_space<vmem>>, vector<64x32xf32>
    %c0_1 = arith.constant 0 : index
    %c0_2 = arith.constant 0 : index
    %1 = vector.load %arg2[%c0_1, %c0_2] : memref<32x32xf32, #tpu.memory_space<vmem>>, vector<32x32xf32>
    %cst = arith.constant dense<0.000000e+00> : vector<64x32xf32>
    %2 = tpu.matmul %0, %1, %cst {dimension_numbers = #tpu.dot_dimension_numbers<[1], [0], [0], [1], [0, 0, 1, 1], [], []>} : vector<64x32xf32>, vector<32x32xf32>, vector<64x32xf32> -> vector<64x32xf32>
    %c0_3 = arith.constant 0 : index
    %c0_4 = arith.constant 0 : index
    %3 = vector.load %arg3[%c0_3, %c0_4] : memref<1x32xf32, #tpu.memory_space<vmem>>, vector<1x32xf32>
    %4 = vector.broadcast %3 : vector<1x32xf32> to vector<64x32xf32>
    %5 = arith.addf %2, %4 : vector<64x32xf32>
    %6 = math.absf %5 : vector<64x32xf32>
    %7 = vector.extract_strided_slice %6 {offsets = [0, 0], sizes = [32, 32], strides = [1, 1]} : vector<64x32xf32> to vector<32x32xf32>
    %8 = vector.shape_cast %7 : vector<32x32xf32> to vector<1x32x32xf32>
    %cst_5 = arith.constant dense<0.000000e+00> : vector<1xf32>
    %9 = vector.multi_reduction <add>, %8, %cst_5 [1, 2] : vector<1x32x32xf32> to vector<1xf32>
    %10 = vector.shape_cast %9 : vector<1xf32> to vector<1x1x1xf32>
    %11 = vector.extract %10[0, 0, 0] : f32 from vector<1x1x1xf32>
    %12 = vector.broadcast %11 : f32 to vector<1x1xf32>
    %cst_6 = arith.constant 1.024000e+03 : f32
    %13 = vector.broadcast %cst_6 : f32 to vector<1x1xf32>
    %14 = arith.divf %12, %13 : vector<1x1xf32>
    %15 = vector.broadcast %14 : vector<1x1xf32> to vector<32x32xf32>
    %16 = arith.subf %7, %15 : vector<32x32xf32>
    %17 = arith.mulf %16, %16 : vector<32x32xf32>
    %18 = vector.shape_cast %17 : vector<32x32xf32> to vector<1x32x32xf32>
    %cst_7 = arith.constant dense<0.000000e+00> : vector<1xf32>
    %19 = vector.multi_reduction <add>, %18, %cst_7 [1, 2] : vector<1x32x32xf32> to vector<1xf32>
    %20 = vector.shape_cast %19 : vector<1xf32> to vector<1x1x1xf32>
    %21 = vector.extract %20[0, 0, 0] : f32 from vector<1x1x1xf32>
    %22 = vector.broadcast %21 : f32 to vector<1x1xf32>
    %cst_8 = arith.constant 1.024000e+03 : f32
    %23 = vector.broadcast %cst_8 : f32 to vector<1x1xf32>
    %24 = arith.divf %22, %23 : vector<1x1xf32>
    %25 = vector.broadcast %14 : vector<1x1xf32> to vector<32x32xf32>
    %26 = arith.subf %7, %25 : vector<32x32xf32>
    %cst_9 = arith.constant 9.99999993E-9 : f32
    %27 = vector.broadcast %cst_9 : f32 to vector<1x1xf32>
    %28 = arith.addf %24, %27 : vector<1x1xf32>
    %29 = math.rsqrt %28 : vector<1x1xf32>
    %30 = vector.broadcast %29 : vector<1x1xf32> to vector<32x32xf32>
    %31 = arith.mulf %26, %30 : vector<32x32xf32>
    %32 = vector.extract_strided_slice %6 {offsets = [32, 0], sizes = [32, 32], strides = [1, 1]} : vector<64x32xf32> to vector<32x32xf32>
    %33 = vector.shape_cast %32 : vector<32x32xf32> to vector<1x32x32xf32>
    %cst_10 = arith.constant dense<0.000000e+00> : vector<1xf32>
    %34 = vector.multi_reduction <add>, %33, %cst_10 [1, 2] : vector<1x32x32xf32> to vector<1xf32>
    %35 = vector.shape_cast %34 : vector<1xf32> to vector<1x1x1xf32>
    %36 = vector.extract %35[0, 0, 0] : f32 from vector<1x1x1xf32>
    %37 = vector.broadcast %36 : f32 to vector<1x1xf32>
    %cst_11 = arith.constant 1.024000e+03 : f32
    %38 = vector.broadcast %cst_11 : f32 to vector<1x1xf32>
    %39 = arith.divf %37, %38 : vector<1x1xf32>
    %40 = vector.broadcast %39 : vector<1x1xf32> to vector<32x32xf32>
    %41 = arith.subf %32, %40 : vector<32x32xf32>
    %42 = arith.mulf %41, %41 : vector<32x32xf32>
    %43 = vector.shape_cast %42 : vector<32x32xf32> to vector<1x32x32xf32>
    %cst_12 = arith.constant dense<0.000000e+00> : vector<1xf32>
    %44 = vector.multi_reduction <add>, %43, %cst_12 [1, 2] : vector<1x32x32xf32> to vector<1xf32>
    %45 = vector.shape_cast %44 : vector<1xf32> to vector<1x1x1xf32>
    %46 = vector.extract %45[0, 0, 0] : f32 from vector<1x1x1xf32>
    %47 = vector.broadcast %46 : f32 to vector<1x1xf32>
    %cst_13 = arith.constant 1.024000e+03 : f32
    %48 = vector.broadcast %cst_13 : f32 to vector<1x1xf32>
    %49 = arith.divf %47, %48 : vector<1x1xf32>
    %50 = vector.broadcast %39 : vector<1x1xf32> to vector<32x32xf32>
    %51 = arith.subf %32, %50 : vector<32x32xf32>
    %cst_14 = arith.constant 9.99999993E-9 : f32
    %52 = vector.broadcast %cst_14 : f32 to vector<1x1xf32>
    %53 = arith.addf %49, %52 : vector<1x1xf32>
    %54 = math.rsqrt %53 : vector<1x1xf32>
    %55 = vector.broadcast %54 : vector<1x1xf32> to vector<32x32xf32>
    %56 = arith.mulf %51, %55 : vector<32x32xf32>
    %57 = tpu.concatenate %31, %56 in 0 : vector<32x32xf32>, vector<32x32xf32> -> vector<64x32xf32>
    %c0_15 = arith.constant 0 : index
    %c0_16 = arith.constant 0 : index
    %58 = vector.load %arg4[%c0_15, %c0_16] : memref<32x32xf32, #tpu.memory_space<vmem>>, vector<32x32xf32>
    %cst_17 = arith.constant dense<0.000000e+00> : vector<64x32xf32>
    %59 = tpu.matmul %57, %58, %cst_17 {dimension_numbers = #tpu.dot_dimension_numbers<[1], [0], [0], [1], [0, 0, 1, 1], [], []>} : vector<64x32xf32>, vector<32x32xf32>, vector<64x32xf32> -> vector<64x32xf32>
    %c0_18 = arith.constant 0 : index
    %c0_19 = arith.constant 0 : index
    %60 = vector.load %arg1[%c0_18, %c0_19] : memref<64x33xf32, #tpu.memory_space<vmem>>, vector<64x33xf32>
    %c0_20 = arith.constant 0 : index
    %c0_21 = arith.constant 0 : index
    %61 = vector.load %arg5[%c0_20, %c0_21] : memref<33x32xf32, #tpu.memory_space<vmem>>, vector<33x32xf32>
    %cst_22 = arith.constant dense<0.000000e+00> : vector<64x32xf32>
    %62 = tpu.matmul %60, %61, %cst_22 {dimension_numbers = #tpu.dot_dimension_numbers<[1], [0], [0], [1], [0, 0, 1, 1], [], []>} : vector<64x33xf32>, vector<33x32xf32>, vector<64x32xf32> -> vector<64x32xf32>
    %63 = arith.addf %59, %62 : vector<64x32xf32>
    %c0_23 = arith.constant 0 : index
    %c0_24 = arith.constant 0 : index
    %64 = vector.load %arg6[%c0_23, %c0_24] : memref<1x32xf32, #tpu.memory_space<vmem>>, vector<1x32xf32>
    %65 = vector.broadcast %64 : vector<1x32xf32> to vector<64x32xf32>
    %66 = arith.addf %63, %65 : vector<64x32xf32>
    %67 = tpu.iota {dimensions = array<i32: 0>} : vector<64x32xi32>
    %c32_i32 = arith.constant 32 : i32
    %68 = vector.broadcast %c32_i32 : i32 to vector<64x32xi32>
    %69 = arith.remsi %67, %68 : vector<64x32xi32>
    %c0_25 = arith.constant 0 : index
    %c0_26 = arith.constant 0 : index
    %c0_27 = arith.constant 0 : index
    %70 = vector.load %arg7[%c0_25, %c0_26, %c0_27] : memref<5x96x32xf32, #tpu.memory_space<vmem>>, vector<1x96x32xf32>
    %71 = vector.shape_cast %70 : vector<1x96x32xf32> to vector<96x32xf32>
    %c0_28 = arith.constant 0 : index
    %c0_29 = arith.constant 0 : index
    %c0_30 = arith.constant 0 : index
    %72 = vector.load %arg8[%c0_28, %c0_29, %c0_30] : memref<5x1x32xf32, #tpu.memory_space<vmem>>, vector<1x1x32xf32>
    %73 = vector.shape_cast %72 : vector<1x1x32xf32> to vector<1x32xf32>
    %c1_i32 = arith.constant 1 : i32
    %74 = vector.broadcast %c1_i32 : i32 to vector<64x32xi32>
    %75 = arith.cmpi sge, %69, %74 : vector<64x32xi32>
    %c1_i32_31 = arith.constant 1 : i32
    %76 = tpu.dynamic_rotate %66 by %c1_i32_31 dim 0 : vector<64x32xf32>, i32 -> vector<64x32xf32>
    %cst_32 = arith.constant 0.000000e+00 : f32
    %77 = vector.broadcast %cst_32 : f32 to vector<64x32xf32>
    %78 = arith.select %75, %76, %77 : vector<64x32xi1>, vector<64x32xf32>
    %c31_i32 = arith.constant 31 : i32
    %79 = vector.broadcast %c31_i32 : i32 to vector<64x32xi32>
    %80 = arith.cmpi slt, %69, %79 : vector<64x32xi32>
    %c63_i32 = arith.constant 63 : i32
    %81 = tpu.dynamic_rotate %66 by %c63_i32 dim 0 : vector<64x32xf32>, i32 -> vector<64x32xf32>
    %cst_33 = arith.constant 0.000000e+00 : f32
    %82 = vector.broadcast %cst_33 : f32 to vector<64x32xf32>
    %83 = arith.select %80, %81, %82 : vector<64x32xi1>, vector<64x32xf32>
    %84 = tpu.concatenate %78, %66, %83 in 1 : vector<64x32xf32>, vector<64x32xf32>, vector<64x32xf32> -> vector<64x96xf32>
    %cst_34 = arith.constant dense<0.000000e+00> : vector<64x32xf32>
    %85 = tpu.matmul %84, %71, %cst_34 {dimension_numbers = #tpu.dot_dimension_numbers<[1], [0], [0], [1], [0, 0, 1, 1], [], []>} : vector<64x96xf32>, vector<96x32xf32>, vector<64x32xf32> -> vector<64x32xf32>
    %86 = vector.broadcast %73 : vector<1x32xf32> to vector<64x32xf32>
    %87 = arith.addf %85, %86 : vector<64x32xf32>
    %cst_35 = arith.constant 2.000000e-01 : f32
    %cst_36 = arith.constant 0.000000e+00 : f32
    %88 = vector.broadcast %cst_36 : f32 to vector<64x32xf32>
    %89 = arith.cmpf oge, %87, %88 : vector<64x32xf32>
    %90 = vector.broadcast %cst_35 : f32 to vector<64x32xf32>
    %91 = arith.mulf %90, %87 : vector<64x32xf32>
    %92 = arith.select %89, %87, %91 : vector<64x32xi1>, vector<64x32xf32>
    %93 = arith.addf %66, %92 : vector<64x32xf32>
    %c1 = arith.constant 1 : index
    %c0_37 = arith.constant 0 : index
    %c0_38 = arith.constant 0 : index
    %94 = vector.load %arg7[%c1, %c0_37, %c0_38] : memref<5x96x32xf32, #tpu.memory_space<vmem>>, vector<1x96x32xf32>
    %95 = vector.shape_cast %94 : vector<1x96x32xf32> to vector<96x32xf32>
    %c1_39 = arith.constant 1 : index
    %c0_40 = arith.constant 0 : index
    %c0_41 = arith.constant 0 : index
    %96 = vector.load %arg8[%c1_39, %c0_40, %c0_41] : memref<5x1x32xf32, #tpu.memory_space<vmem>>, vector<1x1x32xf32>
    %97 = vector.shape_cast %96 : vector<1x1x32xf32> to vector<1x32xf32>
    %c3_i32 = arith.constant 3 : i32
    %98 = vector.broadcast %c3_i32 : i32 to vector<64x32xi32>
    %99 = arith.cmpi sge, %69, %98 : vector<64x32xi32>
    %c3_i32_42 = arith.constant 3 : i32
    %100 = tpu.dynamic_rotate %93 by %c3_i32_42 dim 0 : vector<64x32xf32>, i32 -> vector<64x32xf32>
    %cst_43 = arith.constant 0.000000e+00 : f32
    %101 = vector.broadcast %cst_43 : f32 to vector<64x32xf32>
    %102 = arith.select %99, %100, %101 : vector<64x32xi1>, vector<64x32xf32>
    %c29_i32 = arith.constant 29 : i32
    %103 = vector.broadcast %c29_i32 : i32 to vector<64x32xi32>
    %104 = arith.cmpi slt, %69, %103 : vector<64x32xi32>
    %c61_i32 = arith.constant 61 : i32
    %105 = tpu.dynamic_rotate %93 by %c61_i32 dim 0 : vector<64x32xf32>, i32 -> vector<64x32xf32>
    %cst_44 = arith.constant 0.000000e+00 : f32
    %106 = vector.broadcast %cst_44 : f32 to vector<64x32xf32>
    %107 = arith.select %104, %105, %106 : vector<64x32xi1>, vector<64x32xf32>
    %108 = tpu.concatenate %102, %93, %107 in 1 : vector<64x32xf32>, vector<64x32xf32>, vector<64x32xf32> -> vector<64x96xf32>
    %cst_45 = arith.constant dense<0.000000e+00> : vector<64x32xf32>
    %109 = tpu.matmul %108, %95, %cst_45 {dimension_numbers = #tpu.dot_dimension_numbers<[1], [0], [0], [1], [0, 0, 1, 1], [], []>} : vector<64x96xf32>, vector<96x32xf32>, vector<64x32xf32> -> vector<64x32xf32>
    %110 = vector.broadcast %97 : vector<1x32xf32> to vector<64x32xf32>
    %111 = arith.addf %109, %110 : vector<64x32xf32>
    %cst_46 = arith.constant 2.000000e-01 : f32
    %cst_47 = arith.constant 0.000000e+00 : f32
    %112 = vector.broadcast %cst_47 : f32 to vector<64x32xf32>
    %113 = arith.cmpf oge, %111, %112 : vector<64x32xf32>
    %114 = vector.broadcast %cst_46 : f32 to vector<64x32xf32>
    %115 = arith.mulf %114, %111 : vector<64x32xf32>
    %116 = arith.select %113, %111, %115 : vector<64x32xi1>, vector<64x32xf32>
    %117 = arith.addf %93, %116 : vector<64x32xf32>
    %c2 = arith.constant 2 : index
    %c0_48 = arith.constant 0 : index
    %c0_49 = arith.constant 0 : index
    %118 = vector.load %arg7[%c2, %c0_48, %c0_49] : memref<5x96x32xf32, #tpu.memory_space<vmem>>, vector<1x96x32xf32>
    %119 = vector.shape_cast %118 : vector<1x96x32xf32> to vector<96x32xf32>
    %c2_50 = arith.constant 2 : index
    %c0_51 = arith.constant 0 : index
    %c0_52 = arith.constant 0 : index
    %120 = vector.load %arg8[%c2_50, %c0_51, %c0_52] : memref<5x1x32xf32, #tpu.memory_space<vmem>>, vector<1x1x32xf32>
    %121 = vector.shape_cast %120 : vector<1x1x32xf32> to vector<1x32xf32>
    %c9_i32 = arith.constant 9 : i32
    %122 = vector.broadcast %c9_i32 : i32 to vector<64x32xi32>
    %123 = arith.cmpi sge, %69, %122 : vector<64x32xi32>
    %c9_i32_53 = arith.constant 9 : i32
    %124 = tpu.dynamic_rotate %117 by %c9_i32_53 dim 0 : vector<64x32xf32>, i32 -> vector<64x32xf32>
    %cst_54 = arith.constant 0.000000e+00 : f32
    %125 = vector.broadcast %cst_54 : f32 to vector<64x32xf32>
    %126 = arith.select %123, %124, %125 : vector<64x32xi1>, vector<64x32xf32>
    %c23_i32 = arith.constant 23 : i32
    %127 = vector.broadcast %c23_i32 : i32 to vector<64x32xi32>
    %128 = arith.cmpi slt, %69, %127 : vector<64x32xi32>
    %c55_i32 = arith.constant 55 : i32
    %129 = tpu.dynamic_rotate %117 by %c55_i32 dim 0 : vector<64x32xf32>, i32 -> vector<64x32xf32>
    %cst_55 = arith.constant 0.000000e+00 : f32
    %130 = vector.broadcast %cst_55 : f32 to vector<64x32xf32>
    %131 = arith.select %128, %129, %130 : vector<64x32xi1>, vector<64x32xf32>
    %132 = tpu.concatenate %126, %117, %131 in 1 : vector<64x32xf32>, vector<64x32xf32>, vector<64x32xf32> -> vector<64x96xf32>
    %cst_56 = arith.constant dense<0.000000e+00> : vector<64x32xf32>
    %133 = tpu.matmul %132, %119, %cst_56 {dimension_numbers = #tpu.dot_dimension_numbers<[1], [0], [0], [1], [0, 0, 1, 1], [], []>} : vector<64x96xf32>, vector<96x32xf32>, vector<64x32xf32> -> vector<64x32xf32>
    %134 = vector.broadcast %121 : vector<1x32xf32> to vector<64x32xf32>
    %135 = arith.addf %133, %134 : vector<64x32xf32>
    %cst_57 = arith.constant 2.000000e-01 : f32
    %cst_58 = arith.constant 0.000000e+00 : f32
    %136 = vector.broadcast %cst_58 : f32 to vector<64x32xf32>
    %137 = arith.cmpf oge, %135, %136 : vector<64x32xf32>
    %138 = vector.broadcast %cst_57 : f32 to vector<64x32xf32>
    %139 = arith.mulf %138, %135 : vector<64x32xf32>
    %140 = arith.select %137, %135, %139 : vector<64x32xi1>, vector<64x32xf32>
    %141 = arith.addf %117, %140 : vector<64x32xf32>
    %c3 = arith.constant 3 : index
    %c0_59 = arith.constant 0 : index
    %c0_60 = arith.constant 0 : index
    %142 = vector.load %arg7[%c3, %c0_59, %c0_60] : memref<5x96x32xf32, #tpu.memory_space<vmem>>, vector<1x96x32xf32>
    %143 = vector.shape_cast %142 : vector<1x96x32xf32> to vector<96x32xf32>
    %c3_61 = arith.constant 3 : index
    %c0_62 = arith.constant 0 : index
    %c0_63 = arith.constant 0 : index
    %144 = vector.load %arg8[%c3_61, %c0_62, %c0_63] : memref<5x1x32xf32, #tpu.memory_space<vmem>>, vector<1x1x32xf32>
    %145 = vector.shape_cast %144 : vector<1x1x32xf32> to vector<1x32xf32>
    %c27_i32 = arith.constant 27 : i32
    %146 = vector.broadcast %c27_i32 : i32 to vector<64x32xi32>
    %147 = arith.cmpi sge, %69, %146 : vector<64x32xi32>
    %c27_i32_64 = arith.constant 27 : i32
    %148 = tpu.dynamic_rotate %141 by %c27_i32_64 dim 0 : vector<64x32xf32>, i32 -> vector<64x32xf32>
    %cst_65 = arith.constant 0.000000e+00 : f32
    %149 = vector.broadcast %cst_65 : f32 to vector<64x32xf32>
    %150 = arith.select %147, %148, %149 : vector<64x32xi1>, vector<64x32xf32>
    %c5_i32 = arith.constant 5 : i32
    %151 = vector.broadcast %c5_i32 : i32 to vector<64x32xi32>
    %152 = arith.cmpi slt, %69, %151 : vector<64x32xi32>
    %c37_i32 = arith.constant 37 : i32
    %153 = tpu.dynamic_rotate %141 by %c37_i32 dim 0 : vector<64x32xf32>, i32 -> vector<64x32xf32>
    %cst_66 = arith.constant 0.000000e+00 : f32
    %154 = vector.broadcast %cst_66 : f32 to vector<64x32xf32>
    %155 = arith.select %152, %153, %154 : vector<64x32xi1>, vector<64x32xf32>
    %156 = tpu.concatenate %150, %141, %155 in 1 : vector<64x32xf32>, vector<64x32xf32>, vector<64x32xf32> -> vector<64x96xf32>
    %cst_67 = arith.constant dense<0.000000e+00> : vector<64x32xf32>
    %157 = tpu.matmul %156, %143, %cst_67 {dimension_numbers = #tpu.dot_dimension_numbers<[1], [0], [0], [1], [0, 0, 1, 1], [], []>} : vector<64x96xf32>, vector<96x32xf32>, vector<64x32xf32> -> vector<64x32xf32>
    %158 = vector.broadcast %145 : vector<1x32xf32> to vector<64x32xf32>
    %159 = arith.addf %157, %158 : vector<64x32xf32>
    %cst_68 = arith.constant 2.000000e-01 : f32
    %cst_69 = arith.constant 0.000000e+00 : f32
    %160 = vector.broadcast %cst_69 : f32 to vector<64x32xf32>
    %161 = arith.cmpf oge, %159, %160 : vector<64x32xf32>
    %162 = vector.broadcast %cst_68 : f32 to vector<64x32xf32>
    %163 = arith.mulf %162, %159 : vector<64x32xf32>
    %164 = arith.select %161, %159, %163 : vector<64x32xi1>, vector<64x32xf32>
    %165 = arith.addf %141, %164 : vector<64x32xf32>
    %c4 = arith.constant 4 : index
    %c0_70 = arith.constant 0 : index
    %c0_71 = arith.constant 0 : index
    %166 = vector.load %arg7[%c4, %c0_70, %c0_71] : memref<5x96x32xf32, #tpu.memory_space<vmem>>, vector<1x96x32xf32>
    %167 = vector.shape_cast %166 : vector<1x96x32xf32> to vector<96x32xf32>
    %c4_72 = arith.constant 4 : index
    %c0_73 = arith.constant 0 : index
    %c0_74 = arith.constant 0 : index
    %168 = vector.load %arg8[%c4_72, %c0_73, %c0_74] : memref<5x1x32xf32, #tpu.memory_space<vmem>>, vector<1x1x32xf32>
    %169 = vector.shape_cast %168 : vector<1x1x32xf32> to vector<1x32xf32>
    %c1_i32_75 = arith.constant 1 : i32
    %170 = vector.broadcast %c1_i32_75 : i32 to vector<64x32xi32>
    %171 = arith.cmpi sge, %69, %170 : vector<64x32xi32>
    %c1_i32_76 = arith.constant 1 : i32
    %172 = tpu.dynamic_rotate %165 by %c1_i32_76 dim 0 : vector<64x32xf32>, i32 -> vector<64x32xf32>
    %cst_77 = arith.constant 0.000000e+00 : f32
    %173 = vector.broadcast %cst_77 : f32 to vector<64x32xf32>
    %174 = arith.select %171, %172, %173 : vector<64x32xi1>, vector<64x32xf32>
    %c31_i32_78 = arith.constant 31 : i32
    %175 = vector.broadcast %c31_i32_78 : i32 to vector<64x32xi32>
    %176 = arith.cmpi slt, %69, %175 : vector<64x32xi32>
    %c63_i32_79 = arith.constant 63 : i32
    %177 = tpu.dynamic_rotate %165 by %c63_i32_79 dim 0 : vector<64x32xf32>, i32 -> vector<64x32xf32>
    %cst_80 = arith.constant 0.000000e+00 : f32
    %178 = vector.broadcast %cst_80 : f32 to vector<64x32xf32>
    %179 = arith.select %176, %177, %178 : vector<64x32xi1>, vector<64x32xf32>
    %180 = tpu.concatenate %174, %165, %179 in 1 : vector<64x32xf32>, vector<64x32xf32>, vector<64x32xf32> -> vector<64x96xf32>
    %cst_81 = arith.constant dense<0.000000e+00> : vector<64x32xf32>
    %181 = tpu.matmul %180, %167, %cst_81 {dimension_numbers = #tpu.dot_dimension_numbers<[1], [0], [0], [1], [0, 0, 1, 1], [], []>} : vector<64x96xf32>, vector<96x32xf32>, vector<64x32xf32> -> vector<64x32xf32>
    %182 = vector.broadcast %169 : vector<1x32xf32> to vector<64x32xf32>
    %183 = arith.addf %181, %182 : vector<64x32xf32>
    %cst_82 = arith.constant 2.000000e-01 : f32
    %cst_83 = arith.constant 0.000000e+00 : f32
    %184 = vector.broadcast %cst_83 : f32 to vector<64x32xf32>
    %185 = arith.cmpf oge, %183, %184 : vector<64x32xf32>
    %186 = vector.broadcast %cst_82 : f32 to vector<64x32xf32>
    %187 = arith.mulf %186, %183 : vector<64x32xf32>
    %188 = arith.select %185, %183, %187 : vector<64x32xi1>, vector<64x32xf32>
    %189 = arith.addf %165, %188 : vector<64x32xf32>
    %190 = vector.extract_strided_slice %189 {offsets = [0, 0], sizes = [32, 32], strides = [1, 1]} : vector<64x32xf32> to vector<32x32xf32>
    %191 = vector.shape_cast %190 : vector<32x32xf32> to vector<1x32x32xf32>
    %cst_84 = arith.constant dense<0.000000e+00> : vector<1xf32>
    %192 = vector.multi_reduction <add>, %191, %cst_84 [1, 2] : vector<1x32x32xf32> to vector<1xf32>
    %193 = vector.shape_cast %192 : vector<1xf32> to vector<1x1x1xf32>
    %194 = vector.extract %193[0, 0, 0] : f32 from vector<1x1x1xf32>
    %195 = vector.broadcast %194 : f32 to vector<1x1xf32>
    %cst_85 = arith.constant 1.024000e+03 : f32
    %196 = vector.broadcast %cst_85 : f32 to vector<1x1xf32>
    %197 = arith.divf %195, %196 : vector<1x1xf32>
    %198 = vector.broadcast %197 : vector<1x1xf32> to vector<32x32xf32>
    %199 = arith.subf %190, %198 : vector<32x32xf32>
    %200 = arith.mulf %199, %199 : vector<32x32xf32>
    %201 = vector.shape_cast %200 : vector<32x32xf32> to vector<1x32x32xf32>
    %cst_86 = arith.constant dense<0.000000e+00> : vector<1xf32>
    %202 = vector.multi_reduction <add>, %201, %cst_86 [1, 2] : vector<1x32x32xf32> to vector<1xf32>
    %203 = vector.shape_cast %202 : vector<1xf32> to vector<1x1x1xf32>
    %204 = vector.extract %203[0, 0, 0] : f32 from vector<1x1x1xf32>
    %205 = vector.broadcast %204 : f32 to vector<1x1xf32>
    %cst_87 = arith.constant 1.024000e+03 : f32
    %206 = vector.broadcast %cst_87 : f32 to vector<1x1xf32>
    %207 = arith.divf %205, %206 : vector<1x1xf32>
    %208 = vector.broadcast %197 : vector<1x1xf32> to vector<32x32xf32>
    %209 = arith.subf %190, %208 : vector<32x32xf32>
    %cst_88 = arith.constant 9.99999993E-9 : f32
    %210 = vector.broadcast %cst_88 : f32 to vector<1x1xf32>
    %211 = arith.addf %207, %210 : vector<1x1xf32>
    %212 = math.rsqrt %211 : vector<1x1xf32>
    %213 = vector.broadcast %212 : vector<1x1xf32> to vector<32x32xf32>
    %214 = arith.mulf %209, %213 : vector<32x32xf32>
    %215 = vector.extract_strided_slice %189 {offsets = [32, 0], sizes = [32, 32], strides = [1, 1]} : vector<64x32xf32> to vector<32x32xf32>
    %216 = vector.shape_cast %215 : vector<32x32xf32> to vector<1x32x32xf32>
    %cst_89 = arith.constant dense<0.000000e+00> : vector<1xf32>
    %217 = vector.multi_reduction <add>, %216, %cst_89 [1, 2] : vector<1x32x32xf32> to vector<1xf32>
    %218 = vector.shape_cast %217 : vector<1xf32> to vector<1x1x1xf32>
    %219 = vector.extract %218[0, 0, 0] : f32 from vector<1x1x1xf32>
    %220 = vector.broadcast %219 : f32 to vector<1x1xf32>
    %cst_90 = arith.constant 1.024000e+03 : f32
    %221 = vector.broadcast %cst_90 : f32 to vector<1x1xf32>
    %222 = arith.divf %220, %221 : vector<1x1xf32>
    %223 = vector.broadcast %222 : vector<1x1xf32> to vector<32x32xf32>
    %224 = arith.subf %215, %223 : vector<32x32xf32>
    %225 = arith.mulf %224, %224 : vector<32x32xf32>
    %226 = vector.shape_cast %225 : vector<32x32xf32> to vector<1x32x32xf32>
    %cst_91 = arith.constant dense<0.000000e+00> : vector<1xf32>
    %227 = vector.multi_reduction <add>, %226, %cst_91 [1, 2] : vector<1x32x32xf32> to vector<1xf32>
    %228 = vector.shape_cast %227 : vector<1xf32> to vector<1x1x1xf32>
    %229 = vector.extract %228[0, 0, 0] : f32 from vector<1x1x1xf32>
    %230 = vector.broadcast %229 : f32 to vector<1x1xf32>
    %cst_92 = arith.constant 1.024000e+03 : f32
    %231 = vector.broadcast %cst_92 : f32 to vector<1x1xf32>
    %232 = arith.divf %230, %231 : vector<1x1xf32>
    %233 = vector.broadcast %222 : vector<1x1xf32> to vector<32x32xf32>
    %234 = arith.subf %215, %233 : vector<32x32xf32>
    %cst_93 = arith.constant 9.99999993E-9 : f32
    %235 = vector.broadcast %cst_93 : f32 to vector<1x1xf32>
    %236 = arith.addf %232, %235 : vector<1x1xf32>
    %237 = math.rsqrt %236 : vector<1x1xf32>
    %238 = vector.broadcast %237 : vector<1x1xf32> to vector<32x32xf32>
    %239 = arith.mulf %234, %238 : vector<32x32xf32>
    %240 = tpu.concatenate %214, %239 in 0 : vector<32x32xf32>, vector<32x32xf32> -> vector<64x32xf32>
    %c0_94 = arith.constant 0 : index
    %c0_95 = arith.constant 0 : index
    %241 = vector.load %arg9[%c0_94, %c0_95] : memref<64x32xf32, #tpu.memory_space<vmem>>, vector<64x32xf32>
    tpu.vector_store %arg9[%c0_94, %c0_95], %240 {strides = array<i32>} : memref<64x32xf32, #tpu.memory_space<vmem>>, vector<64x32xf32>,
    return
  }
}

module attributes {stable_mosaic.version = 11 : i64} {
  func.func @_heads_kernel(%arg0: i32, %arg1: memref<8x32xf32, #tpu.memory_space<vmem>>, %arg2: memref<32x160xf32, #tpu.memory_space<vmem>>, %arg3: memref<1x160xf32, #tpu.memory_space<vmem>>, %arg4: memref<128x128xf32, #tpu.memory_space<vmem>>, %arg5: memref<1x128xf32, #tpu.memory_space<vmem>>, %arg6: memref<32x192xf32, #tpu.memory_space<vmem>>, %arg7: memref<1x192xf32, #tpu.memory_space<vmem>>, %arg8: memref<128x16xf32, #tpu.memory_space<vmem>>, %arg9: memref<16x128xf32, #tpu.memory_space<vmem>>, %arg10: memref<128x256xbf16, #tpu.memory_space<vmem>>, %arg11: memref<8x160xf32, #tpu.memory_space<vmem>>, %arg12: memref<8x192xf32, #tpu.memory_space<vmem>>, %arg13: memref<8x256xf32, #tpu.memory_space<vmem>>, %arg14: memref<8x128xbf16, #tpu.memory_space<vmem>>) attributes {dimension_semantics = [#tpu.dimension_semantics<arbitrary>], iteration_bounds = array<i64: 4>, scalar_prefetch = 0 : i64, scratch_operands = 1 : i64, tpu.core_type = #tpu.core_type<tc>, window_params = [{pipeline_mode = #tpu.pipeline_mode<synchronous>, transform_indices = @transform_0, window_bounds = array<i64: 8, 32>}, {pipeline_mode = #tpu.pipeline_mode<synchronous>, transform_indices = @transform_1, window_bounds = array<i64: 32, 160>}, {pipeline_mode = #tpu.pipeline_mode<synchronous>, transform_indices = @transform_2, window_bounds = array<i64: 1, 160>}, {pipeline_mode = #tpu.pipeline_mode<synchronous>, transform_indices = @transform_3, window_bounds = array<i64: 128, 128>}, {pipeline_mode = #tpu.pipeline_mode<synchronous>, transform_indices = @transform_4, window_bounds = array<i64: 1, 128>}, {pipeline_mode = #tpu.pipeline_mode<synchronous>, transform_indices = @transform_5, window_bounds = array<i64: 32, 192>}, {pipeline_mode = #tpu.pipeline_mode<synchronous>, transform_indices = @transform_6, window_bounds = array<i64: 1, 192>}, {pipeline_mode = #tpu.pipeline_mode<synchronous>, transform_indices = @transform_7, window_bounds = array<i64: 128, 16>}, {pipeline_mode = #tpu.pipeline_mode<synchronous>, transform_indices = @transform_8, window_bounds = array<i64: 16, 128>}, {transform_indices = @transform_9, window_bounds = array<i64: 128, 256>}, {pipeline_mode = #tpu.pipeline_mode<synchronous>, transform_indices = @transform_10, window_bounds = array<i64: 8, 160>}, {pipeline_mode = #tpu.pipeline_mode<synchronous>, transform_indices = @transform_11, window_bounds = array<i64: 8, 192>}, {transform_indices = @transform_12, window_bounds = array<i64: 8, 256>}]} {
    %c0_i32 = arith.constant 0 : i32
    %0 = arith.cmpi eq, %arg0, %c0_i32 : i32
    %1 = arith.extui %0 : i1 to i32
    %c0_i32_0 = arith.constant 0 : i32
    %2 = arith.cmpi ne, %1, %c0_i32_0 : i32
    scf.if %2 {
      %c0_6 = arith.constant 0 : index
      %c0_7 = arith.constant 0 : index
      %7 = vector.load %arg1[%c0_6, %c0_7] : memref<8x32xf32, #tpu.memory_space<vmem>>, vector<8x32xf32>
      %c0_8 = arith.constant 0 : index
      %c0_9 = arith.constant 0 : index
      %8 = vector.load %arg2[%c0_8, %c0_9] : memref<32x160xf32, #tpu.memory_space<vmem>>, vector<32x160xf32>
      %cst_10 = arith.constant dense<0.000000e+00> : vector<8x160xf32>
      %9 = tpu.matmul %7, %8, %cst_10 {dimension_numbers = #tpu.dot_dimension_numbers<[1], [0], [0], [1], [0, 0, 1, 1], [], []>} : vector<8x32xf32>, vector<32x160xf32>, vector<8x160xf32> -> vector<8x160xf32>
      %c0_11 = arith.constant 0 : index
      %c0_12 = arith.constant 0 : index
      %10 = vector.load %arg3[%c0_11, %c0_12] : memref<1x160xf32, #tpu.memory_space<vmem>>, vector<1x160xf32>
      %11 = vector.broadcast %10 : vector<1x160xf32> to vector<8x160xf32>
      %12 = arith.addf %9, %11 : vector<8x160xf32>
      %c0_13 = arith.constant 0 : index
      %c0_14 = arith.constant 0 : index
      %13 = vector.load %arg11[%c0_13, %c0_14] : memref<8x160xf32, #tpu.memory_space<vmem>>, vector<8x160xf32>
      tpu.vector_store %arg11[%c0_13, %c0_14], %12 {strides = array<i32>} : memref<8x160xf32, #tpu.memory_space<vmem>>, vector<8x160xf32>,
      %14 = vector.extract_strided_slice %12 {offsets = [0, 0], sizes = [8, 128], strides = [1, 1]} : vector<8x160xf32> to vector<8x128xf32>
      %15 = vector.extract_strided_slice %12 {offsets = [0, 128], sizes = [8, 32], strides = [1, 1]} : vector<8x160xf32> to vector<8x32xf32>
      %c0_15 = arith.constant 0 : index
      %c0_16 = arith.constant 0 : index
      %16 = vector.load %arg4[%c0_15, %c0_16] : memref<128x128xf32, #tpu.memory_space<vmem>>, vector<128x128xf32>
      %cst_17 = arith.constant dense<0.000000e+00> : vector<8x128xf32>
      %17 = tpu.matmul %14, %16, %cst_17 {dimension_numbers = #tpu.dot_dimension_numbers<[1], [0], [0], [1], [0, 0, 1, 1], [], []>} : vector<8x128xf32>, vector<128x128xf32>, vector<8x128xf32> -> vector<8x128xf32>
      %c0_18 = arith.constant 0 : index
      %c0_19 = arith.constant 0 : index
      %18 = vector.load %arg5[%c0_18, %c0_19] : memref<1x128xf32, #tpu.memory_space<vmem>>, vector<1x128xf32>
      %19 = vector.broadcast %18 : vector<1x128xf32> to vector<8x128xf32>
      %20 = arith.addf %17, %19 : vector<8x128xf32>
      %c0_20 = arith.constant 0 : index
      %c0_21 = arith.constant 0 : index
      %21 = vector.load %arg6[%c0_20, %c0_21] : memref<32x192xf32, #tpu.memory_space<vmem>>, vector<32x192xf32>
      %cst_22 = arith.constant dense<0.000000e+00> : vector<8x192xf32>
      %22 = tpu.matmul %15, %21, %cst_22 {dimension_numbers = #tpu.dot_dimension_numbers<[1], [0], [0], [1], [0, 0, 1, 1], [], []>} : vector<8x32xf32>, vector<32x192xf32>, vector<8x192xf32> -> vector<8x192xf32>
      %c0_23 = arith.constant 0 : index
      %c0_24 = arith.constant 0 : index
      %23 = vector.load %arg7[%c0_23, %c0_24] : memref<1x192xf32, #tpu.memory_space<vmem>>, vector<1x192xf32>
      %24 = vector.broadcast %23 : vector<1x192xf32> to vector<8x192xf32>
      %25 = arith.addf %22, %24 : vector<8x192xf32>
      %26 = vector.extract_strided_slice %25 {offsets = [0, 0], sizes = [8, 128], strides = [1, 1]} : vector<8x192xf32> to vector<8x128xf32>
      %27 = vector.extract_strided_slice %25 {offsets = [0, 128], sizes = [8, 64], strides = [1, 1]} : vector<8x192xf32> to vector<8x64xf32>
      %28 = arith.negf %27 : vector<8x64xf32>
      %29 = math.exp %28 : vector<8x64xf32>
      %cst_25 = arith.constant 1.000000e+00 : f32
      %30 = vector.broadcast %cst_25 : f32 to vector<8x64xf32>
      %31 = arith.addf %30, %29 : vector<8x64xf32>
      %32 = arith.divf %30, %31 : vector<8x64xf32>
      %33 = tpu.concatenate %20, %32 in 1 : vector<8x128xf32>, vector<8x64xf32> -> vector<8x192xf32>
      %c0_26 = arith.constant 0 : index
      %c0_27 = arith.constant 0 : index
      %34 = vector.load %arg12[%c0_26, %c0_27] : memref<8x192xf32, #tpu.memory_space<vmem>>, vector<8x192xf32>
      tpu.vector_store %arg12[%c0_26, %c0_27], %33 {strides = array<i32>} : memref<8x192xf32, #tpu.memory_space<vmem>>, vector<8x192xf32>,
      %cst_28 = arith.constant dense<0xFF800000> : vector<8xf32>
      %35 = vector.multi_reduction <maximumf>, %26, %cst_28 [1] : vector<8x128xf32> to vector<8xf32>
      %36 = vector.shape_cast %35 : vector<8xf32> to vector<8x1xf32>
      %37 = vector.broadcast %36 : vector<8x1xf32> to vector<8x128xf32>
      %38 = arith.subf %26, %37 : vector<8x128xf32>
      %39 = math.exp %38 : vector<8x128xf32>
      %c0_29 = arith.constant 0 : index
      %c0_30 = arith.constant 0 : index
      %40 = vector.load %arg8[%c0_29, %c0_30] : memref<128x16xf32, #tpu.memory_space<vmem>>, vector<128x16xf32>
      %cst_31 = arith.constant dense<0.000000e+00> : vector<8x16xf32>
      %41 = tpu.matmul %39, %40, %cst_31 {dimension_numbers = #tpu.dot_dimension_numbers<[1], [0], [0], [1], [0, 0, 1, 1], [], []>} : vector<8x128xf32>, vector<128x16xf32>, vector<8x16xf32> -> vector<8x16xf32>
      %c0_32 = arith.constant 0 : index
      %c0_33 = arith.constant 0 : index
      %42 = vector.load %arg9[%c0_32, %c0_33] : memref<16x128xf32, #tpu.memory_space<vmem>>, vector<16x128xf32>
      %cst_34 = arith.constant dense<0.000000e+00> : vector<8x128xf32>
      %43 = tpu.matmul %41, %42, %cst_34 {dimension_numbers = #tpu.dot_dimension_numbers<[1], [0], [0], [1], [0, 0, 1, 1], [], []>} : vector<8x16xf32>, vector<16x128xf32>, vector<8x128xf32> -> vector<8x128xf32>
      %44 = tpu.reciprocal %43 {approx = true} : vector<8x128xf32> -> vector<8x128xf32>
      %45 = arith.mulf %39, %44 : vector<8x128xf32>
      %46 = arith.truncf %45 : vector<8x128xf32> to vector<8x128xbf16>
      %c0_35 = arith.constant 0 : index
      %c0_36 = arith.constant 0 : index
      %47 = vector.load %arg14[%c0_35, %c0_36] : memref<8x128xbf16, #tpu.memory_space<vmem>>, vector<8x128xbf16>
      tpu.vector_store %arg14[%c0_35, %c0_36], %46 {strides = array<i32>} : memref<8x128xbf16, #tpu.memory_space<vmem>>, vector<8x128xbf16>,
    } else {
    }
    %c0 = arith.constant 0 : index
    %c0_1 = arith.constant 0 : index
    %3 = vector.load %arg14[%c0, %c0_1] : memref<8x128xbf16, #tpu.memory_space<vmem>>, vector<8x128xbf16>
    %c0_2 = arith.constant 0 : index
    %c0_3 = arith.constant 0 : index
    %4 = vector.load %arg10[%c0_2, %c0_3] : memref<128x256xbf16, #tpu.memory_space<vmem>>, vector<128x256xbf16>
    %cst = arith.constant dense<0.000000e+00> : vector<8x256xf32>
    %5 = tpu.matmul %3, %4, %cst {dimension_numbers = #tpu.dot_dimension_numbers<[1], [0], [0], [1], [0, 0, 1, 1], [], []>} : vector<8x128xbf16>, vector<128x256xbf16>, vector<8x256xf32> -> vector<8x256xf32>
    %c0_4 = arith.constant 0 : index
    %c0_5 = arith.constant 0 : index
    %6 = vector.load %arg13[%c0_4, %c0_5] : memref<8x256xf32, #tpu.memory_space<vmem>>, vector<8x256xf32>
    tpu.vector_store %arg13[%c0_4, %c0_5], %5 {strides = array<i32>} : memref<8x256xf32, #tpu.memory_space<vmem>>, vector<8x256xf32>,
    return
  }
  func.func @transform_0(%arg0: i32) -> (i32, i32) {
    %c0_i32 = arith.constant 0 : i32
    %c0_i32_0 = arith.constant 0 : i32
    %c0_i32_1 = arith.constant 0 : i32
    return %c0_i32, %c0_i32_0 : i32, i32
  }
  func.func @transform_1(%arg0: i32) -> (i32, i32) {
    %c0_i32 = arith.constant 0 : i32
    %c0_i32_0 = arith.constant 0 : i32
    %c0_i32_1 = arith.constant 0 : i32
    return %c0_i32, %c0_i32_0 : i32, i32
  }
  func.func @transform_2(%arg0: i32) -> (i32, i32) {
    %c0_i32 = arith.constant 0 : i32
    %c0_i32_0 = arith.constant 0 : i32
    %c0_i32_1 = arith.constant 0 : i32
    return %c0_i32, %c0_i32_0 : i32, i32
  }
  func.func @transform_3(%arg0: i32) -> (i32, i32) {
    %c0_i32 = arith.constant 0 : i32
    %c0_i32_0 = arith.constant 0 : i32
    %c0_i32_1 = arith.constant 0 : i32
    return %c0_i32, %c0_i32_0 : i32, i32
  }
  func.func @transform_4(%arg0: i32) -> (i32, i32) {
    %c0_i32 = arith.constant 0 : i32
    %c0_i32_0 = arith.constant 0 : i32
    %c0_i32_1 = arith.constant 0 : i32
    return %c0_i32, %c0_i32_0 : i32, i32
  }
  func.func @transform_5(%arg0: i32) -> (i32, i32) {
    %c0_i32 = arith.constant 0 : i32
    %c0_i32_0 = arith.constant 0 : i32
    %c0_i32_1 = arith.constant 0 : i32
    return %c0_i32, %c0_i32_0 : i32, i32
  }
  func.func @transform_6(%arg0: i32) -> (i32, i32) {
    %c0_i32 = arith.constant 0 : i32
    %c0_i32_0 = arith.constant 0 : i32
    %c0_i32_1 = arith.constant 0 : i32
    return %c0_i32, %c0_i32_0 : i32, i32
  }
  func.func @transform_7(%arg0: i32) -> (i32, i32) {
    %c0_i32 = arith.constant 0 : i32
    %c0_i32_0 = arith.constant 0 : i32
    %c0_i32_1 = arith.constant 0 : i32
    return %c0_i32, %c0_i32_0 : i32, i32
  }
  func.func @transform_8(%arg0: i32) -> (i32, i32) {
    %c0_i32 = arith.constant 0 : i32
    %c0_i32_0 = arith.constant 0 : i32
    %c0_i32_1 = arith.constant 0 : i32
    return %c0_i32, %c0_i32_0 : i32, i32
  }
  func.func @transform_9(%arg0: i32) -> (i32, i32) {
    %c0_i32 = arith.constant 0 : i32
    %c0_i32_0 = arith.constant 0 : i32
    return %c0_i32, %arg0 : i32, i32
  }
  func.func @transform_10(%arg0: i32) -> (i32, i32) {
    %c0_i32 = arith.constant 0 : i32
    %c0_i32_0 = arith.constant 0 : i32
    %c0_i32_1 = arith.constant 0 : i32
    return %c0_i32, %c0_i32_0 : i32, i32
  }
  func.func @transform_11(%arg0: i32) -> (i32, i32) {
    %c0_i32 = arith.constant 0 : i32
    %c0_i32_0 = arith.constant 0 : i32
    %c0_i32_1 = arith.constant 0 : i32
    return %c0_i32, %c0_i32_0 : i32, i32
  }
  func.func @transform_12(%arg0: i32) -> (i32, i32) {
    %c0_i32 = arith.constant 0 : i32
    %c0_i32_0 = arith.constant 0 : i32
    return %c0_i32, %arg0 : i32, i32
  }
}

</mosaic_0001>

<bundles_post_ra>
// kernel: model_forward.4
= control target key start
LH: loop header
LB: loop body
LE: loop exit
PB: predicated region body
PF: predicated region fallthrough
CT: control target
= control target key end

     0   :  { %vm51_vm0 = vcmask 261120   ;;  %vm332_vm1 = vcmask 1040384   ;;  %vm307_vm2 = vcmask 269312   ;;  %s3072_s23 = smov 32   ;;  %s3073_s30 = smov 64   ;;  %vm816_vm7 = vcmask 785408   ;;  %s4260_s2 = inlined_call_operand.vmem [shape: f32[32,32], index: 2, kind: input, shape index: {}]   ;;  %s4261_s0 = inlined_call_operand.vmem [shape: f32[64,32], index: 0, kind: input, shape index: {}]   ;;  %s4262_s3 = inlined_call_operand.vmem [shape: f32[1,32], index: 3, kind: input, shape index: {}]   ;;  %s4263_s5 = inlined_call_operand.vmem [shape: f32[33,32], index: 5, kind: input, shape index: {}]   ;;  %s4264_s1 = inlined_call_operand.vmem [shape: f32[64,33], index: 1, kind: input, shape index: {}]   ;;  %s4265_s4 = inlined_call_operand.vmem [shape: f32[32,32], index: 4, kind: input, shape index: {}]   ;;  %s4266_s6 = inlined_call_operand.vmem [shape: f32[1,32], index: 6, kind: input, shape index: {}]   ;;  %s4267_s7 = inlined_call_operand.vmem [shape: f32[5,96,32], index: 7, kind: input, shape index: {}]   ;;  %s4268_s8 = inlined_call_operand.vmem [shape: f32[5,1,32], index: 8, kind: input, shape index: {}]   ;;  %s4269_s9 = inlined_call_operand.vmem [shape: f32[64,32], index: 9, kind: output, shape index: {}]  }
   0x1   :  { %v40_v0 = vld [vmem:[%s4260_s2] sm:$0xff]  ;;  %v41_v1 = vld [vmem:[%s4260_s2 + $0x8] sm:$0xff]  ;;  %v42_v2 = vld [vmem:[%s4260_s2 + $0x10] sm:$0xff]  ;;  %vm801_vm8 = vcmask 523264  }
   0x2   :  { %v2883_v3 = vpack.c.bf16 %v41_v1, %v40_v0  ;;  %v43_v4 = vld [vmem:[%s4260_s2 + $0x18] sm:$0xff]  ;;  %v32_v5 = vld [vmem:[%s4261_s0] sm:$0xff]  ;;  %v33_v7 = vld [vmem:[%s4261_s0 + $0x8] sm:$0xff] }
   0x3   :  { %v2887_v6 = vpack.c.bf16 %v43_v4, %v42_v2  ;;  %2649 = vmatprep.mubr.msk.f32.mxu0 %vm51_vm0, %v32_v5  ;;  %v34_v8 = vld [vmem:[%s4261_s0 + $0x10] sm:$0xff]  ;;  %v35_v9 = vld [vmem:[%s4261_s0 + $0x18] sm:$0xff]  ;;  %v36_v10 = vld [vmem:[%s4261_s0 + $0x20] sm:$0xff] }
   0x4   :  { %2884 = vmatprep.subr.bf16.mxu0 %v2883_v3  ;;  %v37_v11 = vld [vmem:[%s4261_s0 + $0x28] sm:$0xff]  ;;  %v38_v12 = vld [vmem:[%s4261_s0 + $0x30] sm:$0xff]  ;;  %v39_v13 = vld [vmem:[%s4261_s0 + $0x38] sm:$0xff] }
   0x5   :  { %2886 = vmatpush3.bf16.msra.mxu0 %v2883_v3  ;;  %v2380_v14 = vld [vmem:[%s4262_s3] ss:$0 sm:$0xff] }
   0x6   :  { %2888 = vmatprep.subr.bf16.mxu0 %v2887_v6 }
   0x9   :  { %2890 = vmatpush3.bf16.msra.mxu0 %v2887_v6 }
   0xc   :  { %2650 = vmatmul.mubr.msk.f32.vlgmr.msra.gmra.mrb[0].mxu0 %vm51_vm0, %v33_v7 }
   0xd   :  { %2652 = vmatprep.mubr.msk.f32.mxu0 %vm51_vm0, %v34_v8 }
  0x10   :  { %2653 = vmatmul.mubr.msk.f32.gmra.mrb[2].mxu0 %vm51_vm0, %v35_v9 }
  0x11   :  { %2655 = vmatprep.mubr.msk.f32.mxu0 %vm51_vm0, %v36_v10 }
  0x14   :  { %2656 = vmatmul.mubr.msk.f32.gmra.mrb[4].mxu0 %vm51_vm0, %v37_v11 }
  0x15   :  { %2658 = vmatprep.mubr.msk.f32.mxu0 %vm51_vm0, %v38_v12 }
  0x18   :  { %2659 = vmatmul.mubr.msk.f32.gmra.mrb[6].mxu0 %vm51_vm0, %v39_v13  ;;  %v302_v13 = vld [vmem:[%s4263_s5] sm:$0xff] }
  0xdf   :  { %v2651_v15 = vpop.f32.mrb[0].mxu0 }
  0xe0   :  { %v148_v16 = vadd.f32 %v2651_v15, %v2380_v14  ;;  %v142_v17 = vpop.f32.mrb[1].mxu0  ;;  %v304_v15 = vld [vmem:[%s4263_s5 + $0x10] sm:$0xff] }
  0xe1   :  { %v143_v18 = vadd.f32 %v2380_v14, %v142_v17  ;;  %v305_v17 = vld [vmem:[%s4263_s5 + $0x18] sm:$0xff] }
  0xe2   :  { %v182_v19 = vand.u32 2147483647, %v148_v16 }
  0xe3   :  { %v181_v20 = vand.u32 2147483647, %v143_v18  ;;  %v2654_v21 = vpop.f32.mrb[2].mxu0  ;;  %v2895_v18 = vpack.c.bf16 %v305_v17, %v304_v15 }
  0xe4   :  { %v158_v22 = vadd.f32 %v2654_v21, %v2380_v14  ;;  %v152_v23 = vpop.f32.mrb[3].mxu0  ;;  %v190_v24 = vsel %vm51_vm0, %v182_v19, 0.0  ;;  %v295_v21 = vld [vmem:[%s4264_s1 + $0x8] sm:$0xff] }
  0xe5   :  { %v189_v25 = vsel %vm51_vm0, %v181_v20, 0.0  ;;  %v153_v26 = vadd.f32 %v2380_v14, %v152_v23  ;;  %v297_v23 = vld [vmem:[%s4264_s1 + $0x18] sm:$0xff] }
  0xe6   :  { %v184_v27 = vand.u32 2147483647, %v158_v22  ;;  %v191_v29 = vadd.f32 %v190_v24, %v189_v25  ;;  %v296_v22 = vld [vmem:[%s4264_s1 + $0x10] sm:$0xff]  ;;  %v298_v24 = vld [vmem:[%s4264_s1 + $0x20] sm:$0xff] }
  0xe7   :  { %v183_v28 = vand.u32 2147483647, %v153_v26  ;;  %v2657_v34 = vpop.f32.mrb[4].mxu0  ;;  %v290_v25 = vld [vmem:[%s4265_s4] sm:$0xff]  ;;  %v291_v26 = vld [vmem:[%s4265_s4 + $0x8] sm:$0xff] }
  0xe8   :  { %v194_v32 = vsel %vm51_vm0, %v184_v27, 0.0  ;;  %v162_v35 = vpop.f32.mrb[5].mxu0  ;;  %v3176_v36 = vadd.f32 %v2657_v34, %v2380_v14 }
  0xe9   :  { %v192_v30 = vsel %vm51_vm0, %v183_v28, 0.0  ;;  %v3178_v37 = vadd.f32 %v2380_v14, %v162_v35 }
  0xea   :  { %v193_v31 = vadd.f32 %v192_v30, %v191_v29  ;;  %v186_v38 = vand.u32 2147483647, %v3176_v36  ;;  %v300_v29 = vld [vmem:[%s4264_s1 + $0x30] sm:$0xff] }
  0xeb   :  { %v185_v39 = vand.u32 2147483647, %v3178_v37  ;;  %v2660_v40 = vpop.f32.mrb[6].mxu0  ;;  %v292_v30 = vld [vmem:[%s4265_s4 + $0x10] sm:$0xff] }
  0xec   :  { %v195_v33 = vadd.f32 %v194_v32, %v193_v31  ;;  %v3182_v41 = vadd.f32 %v2660_v40, %v2380_v14  ;;  %v172_v42 = vpop.f32.mrb[7].mxu0  ;;  %v241_v43 = vsel %vm51_vm0, %v186_v38, 0.0  ;;  %v293_v31 = vld [vmem:[%s4265_s4 + $0x18] sm:$0xff] }
  0xed   :  { %v240_v44 = vsel %vm51_vm0, %v185_v39, 0.0  ;;  %v3190_v45 = vadd.f32 %v2380_v14, %v172_v42  ;;  %v303_v14 = vld [vmem:[%s4263_s5 + $0x8] sm:$0xff]  ;;  %v2903_v32 = vpack.c.bf16 %v293_v31, %v292_v30 }
  0xee   :  { %196 = vadd.xlane.f32.xlu0 %v195_v33  ;;  %v188_v46 = vand.u32 2147483647, %v3182_v41  ;;  %v242_v48 = vadd.f32 %v241_v43, %v240_v44  ;;  %v2891_v16 = vpack.c.bf16 %v303_v14, %v302_v13  ;;  %v301_v33 = vld [vmem:[%s4264_s1 + $0x38] sm:$0xff] }
  0xef   :  { %v187_v47 = vand.u32 2147483647, %v3190_v45 }
  0xf0   :  { %v245_v51 = vsel %vm51_vm0, %v188_v46, 0.0  ;;  %2892 = vmatprep.subr.bf16.mxu1 %v2891_v16 }
  0xf1   :  { %v243_v49 = vsel %vm51_vm0, %v187_v47, 0.0  ;;  %2894 = vmatpush3.bf16.msra.mxu1 %v2891_v16 }
  0xf2   :  { %v244_v50 = vadd.f32 %v243_v49, %v242_v48  ;;  %2896 = vmatprep.subr.bf16.mxu1 %v2895_v18 }
  0xf4   :  { %v246_v52 = vadd.f32 %v245_v51, %v244_v50 }
  0xf5   :  { %2898 = vmatpush3.bf16.msra.mxu1 %v2895_v18 }
  0xf6   :  { %247 = vadd.xlane.f32.xlu1 %v246_v52 }
 0x17b   :  { %v197_v53 = vpop.xlane.xlu0 %196 }
 0x17c   :  { %v198_v54 = vrot.slane %v197_v53, 4 }
 0x17e   :  { %v199_v55 = vadd.f32 %v198_v54, %v197_v53 }
 0x180   :  { %v200_v56 = vrot.slane %v199_v55, 2 }
 0x182   :  { %v201_v57 = vadd.f32 %v200_v56, %v199_v55 }
 0x183   :  { %v248_v34 = vpop.xlane.xlu1 %247 }
 0x184   :  { %v202_v58 = vrot.slane %v201_v57, 1  ;;  %v249_v35 = vrot.slane %v248_v34, 4 }
 0x186   :  { %v203_v59 = vadd.f32 %v202_v58, %v201_v57  ;;  %v250_v40 = vadd.f32 %v249_v35, %v248_v34  ;;  %v653_v34 = vld [vmem:[%s4267_s7 + $0x18] sm:$0xff] }
 0x188   :  { %3035 = vpush %v203_v59  ;;  %v251_v42 = vrot.slane %v250_v40, 2 }
 0x18a   :  { %v252_v49 = vadd.f32 %v251_v42, %v250_v40 }
 0x18c   :  { %v253_v52 = vrot.slane %v252_v49, 1 }
 0x18e   :  { %v254_v55 = vadd.f32 %v253_v52, %v252_v49  ;;  %v654_v52 = vld [vmem:[%s4267_s7 + $0x20] sm:$0xff] }
 0x1b9   :  { %s3036_s0 = spop %3035 }
 0x1ba   :  { %v205_v60 = vstv %s3036_s0 }
 0x1bb   :  { %v207_v61 = vmul.f32 0.0009765625, %v205_v60 }
 0x1bd   :  { %v3200_v62 = vsub.f32 %v181_v20, %v207_v61  ;;  %v3202_v63 = vsub.f32 %v182_v19, %v207_v61  ;;  %v3204_v0 = vsub.f32 %v183_v28, %v207_v61  ;;  %v3206_v1 = vsub.f32 %v184_v27, %v207_v61  ;;  %v306_v19 = vld [vmem:[%s4263_s5 + $0x20] sm:$0x1]  ;;  %v299_v28 = vld [vmem:[%s4264_s1 + $0x28] sm:$0xff] }
 0x1be   :  { %2669 = vmatprep.subr.msk.mxu1 %vm332_vm1, %v306_v19  ;;  %v294_v20 = vld [vmem:[%s4264_s1] sm:$0xff]  ;;  %v2899_v27 = vpack.c.bf16 %v291_v26, %v290_v25 }
 0x1bf   :  { %v212_v2 = vmul.f32 %v3200_v62, %v3200_v62  ;;  %v213_v3 = vmul.f32 %v3202_v63, %v3202_v63  ;;  %v214_v4 = vmul.f32 %v3204_v0, %v3204_v0  ;;  %v215_v5 = vmul.f32 %v3206_v1, %v3206_v1  ;;  %2670 = vmatpush3.msk.msra.mxu1 %vm332_vm1, %v306_v19 }
 0x1c0   :  { %2671 = vmatprep.mubr.msk.f32.mxu1 %vm307_vm2, %v294_v20  ;;  %2900 = vmatprep.subr.bf16.mxu1 %v2899_v27  ;;  %v585_v20 = vlaneseq }
 0x1c1   :  { %v216_v6 = vsel %vm51_vm0, %v212_v2, 0.0  ;;  %v217_v7 = vsel %vm51_vm0, %v213_v3, 0.0  ;;  %v219_v9 = vsel %vm51_vm0, %v214_v4, 0.0  ;;  %v221_v11 = vsel %vm51_vm0, %v215_v5, 0.0  ;;  %2672 = vmatmul.mubr.msk.f32.vlgmr.msra.gmra.mrb[0].mxu1 %vm307_vm2, %v295_v21 }
 0x1c2   :  { %v218_v8 = vadd.f32 %v217_v7, %v216_v6  ;;  %2674 = vmatprep.mubr.msk.f32.mxu1 %vm307_vm2, %v296_v22  ;;  %2902 = vmatpush3.bf16.msra.mxu1 %v2899_v27  ;;  %v3320_v21 = vshrl.u32 %v585_v20, 7  ;;  %v650_v27 = vld [vmem:[%s4267_s7] sm:$0xff] }
 0x1c3   :  { %2904 = vmatprep.subr.bf16.mxu1 %v2903_v32 }
 0x1c4   :  { %v220_v10 = vadd.f32 %v219_v9, %v218_v8  ;;  %vm712_vm3 = vcmp.lt.s32.totalorder %v3320_v21, 7  ;;  %vm679_vm4 = vcmp.lt.s32.totalorder %v3320_v21, 1  ;;  %vm1042_vm13 = vcmp.lt.s32.totalorder %v3320_v21, 5 }
 0x1c5   :  { %2675 = vmatmul.mubr.msk.f32.gmra.mrb[2].mxu1 %vm307_vm2, %v297_v23 }
 0x1c6   :  { %v222_v12 = vadd.f32 %v221_v11, %v220_v10  ;;  %2677 = vmatprep.mubr.msk.f32.mxu1 %vm307_vm2, %v298_v24  ;;  %2906 = vmatpush3.bf16.msra.mxu1 %v2903_v32 }
 0x1c8   :  { %223 = vadd.xlane.f32.xlu0 %v222_v12 }
 0x1c9   :  { %2678 = vmatmul.mubr.msk.f32.gmra.mrb[4].mxu1 %vm307_vm2, %v299_v28  ;;  %v651_v28 = vld [vmem:[%s4267_s7 + $0x8] sm:$0xff] }
 0x1ca   :  { %2680 = vmatprep.mubr.msk.f32.mxu1 %vm307_vm2, %v300_v29  ;;  %v2907_v32 = vpack.c.bf16 %v651_v28, %v650_v27  ;;  %v593_v28 = vadd.s32 56, %v3320_v21 }
 0x1cc   :  { %2908 = vmatprep.subr.bf16.mxu0 %v2907_v32 }
 0x1cd   :  { %2681 = vmatmul.mubr.msk.f32.gmra.mrb[6].mxu1 %vm307_vm2, %v301_v33  ;;  %v652_v33 = vld [vmem:[%s4267_s7 + $0x10] sm:$0xff]  ;;  %2910 = vmatpush3.bf16.msra.mxu0 %v2907_v32 }
 0x255   :  { %v224_v43 = vpop.xlane.xlu0 %223 }
 0x256   :  { %v225_v44 = vrot.slane %v224_v43, 4 }
 0x258   :  { %v226_v48 = vadd.f32 %v225_v44, %v224_v43 }
 0x25a   :  { %v227_v50 = vrot.slane %v226_v48, 2 }
 0x25c   :  { %v228_v51 = vadd.f32 %v227_v50, %v226_v48 }
 0x25e   :  { %v229_v53 = vrot.slane %v228_v51, 1 }
 0x260   :  { %v230_v54 = vadd.f32 %v229_v53, %v228_v51  ;;  %v2911_v51 = vpack.c.bf16 %v653_v34, %v652_v33  ;;  %v655_v53 = vld [vmem:[%s4267_s7 + $0x28] sm:$0xff] }
 0x262   :  { %3037 = vpush %v230_v54  ;;  %2912 = vmatprep.subr.bf16.mxu0 %v2911_v51 }
 0x263   :  { %3039 = vpush %v254_v55  ;;  %2914 = vmatpush3.bf16.msra.mxu0 %v2911_v51  ;;  %v3474_v51 = vand.u32 31, %v593_v28 }
 0x265   :  { %vm703_vm9 = vcmp.lt.s32.totalorder %v3474_v51, 31 }
 0x293   :  { %s3038_s1 = spop %3037 }
 0x294   :  { %v232_v56 = vstv %s3038_s1  ;;  %s3040_s4 = spop %3039 }
 0x295   :  { %v233_v57 = vmul.f32 0.0009765625, %v232_v56  ;;  %v256_v58 = vstv %s3040_s4 }
 0x296   :  { %v257_v59 = vmul.f32 0.0009765625, %v256_v58 }
 0x297   :  { %v234_v60 = vadd.f32 1e-08, %v233_v57  ;;  %v2915_v57 = vpack.c.bf16 %v655_v53, %v654_v52 }
 0x298   :  { %v3281_v61 = vsub.f32 %v185_v39, %v257_v59  ;;  %v3285_v2 = vsub.f32 %v186_v38, %v257_v59  ;;  %v3289_v3 = vsub.f32 %v187_v47, %v257_v59  ;;  %v3293_v4 = vsub.f32 %v188_v46, %v257_v59  ;;  %v656_v59 = vld [vmem:[%s4267_s7 + $0x30] sm:$0xff] }
 0x299   :  { %3064 = vrsqrt.f32 %v234_v60  ;;  %2916 = vmatprep.subr.bf16.mxu0 %v2915_v57  ;;  %v657_v60 = vld [vmem:[%s4267_s7 + $0x38] sm:$0xff] }
 0x29a   :  { %v262_v5 = vmul.f32 %v3281_v61, %v3281_v61  ;;  %v263_v37 = vmul.f32 %v3285_v2, %v3285_v2  ;;  %v264_v36 = vmul.f32 %v3289_v3, %v3289_v3  ;;  %v265_v38 = vmul.f32 %v3293_v4, %v3293_v4  ;;  %2918 = vmatpush3.bf16.msra.mxu0 %v2915_v57 }
 0x29c   :  { %v266_v39 = vsel %vm51_vm0, %v262_v5, 0.0  ;;  %v267_v45 = vsel %vm51_vm0, %v263_v37, 0.0  ;;  %v269_v46 = vsel %vm51_vm0, %v264_v36, 0.0  ;;  %v271_v6 = vsel %vm51_vm0, %v265_v38, 0.0  ;;  %v660_v5 = vld [vmem:[%s4267_s7 + $0x50] sm:$0xff]  ;;  %v661_v37 = vld [vmem:[%s4267_s7 + $0x58] sm:$0xff] }
 0x29d   :  { %v268_v41 = vadd.f32 %v267_v45, %v266_v39  ;;  %v2927_v36 = vpack.c.bf16 %v661_v37, %v660_v5 }
 0x29f   :  { %v270_v47 = vadd.f32 %v269_v46, %v268_v41 }
 0x2a1   :  { %v272_v7 = vadd.f32 %v271_v6, %v270_v47 }
 0x2a3   :  { %v3065_v8 = vpop.eup %3064  ;;  %273 = vadd.xlane.f32.xlu1 %v272_v7  ;;  %v589_v7 = vadd.s32 24, %v3320_v21 }
 0x2a4   :  { %v236_v9 = vmul.f32 %v3065_v8, %v3200_v62  ;;  %v237_v10 = vmul.f32 %v3065_v8, %v3202_v63  ;;  %v238_v11 = vmul.f32 %v3065_v8, %v3204_v0  ;;  %v239_v12 = vmul.f32 %v3065_v8, %v3206_v1  ;;  %v3318_v1 = vld [vmem:[%s4266_s6] ss:$0 sm:$0xff] }
 0x2a6   :  { %2691 = vmatprep.mubr.msk.f32.mxu1 %vm51_vm0, %v236_v9 }
 0x2a7   :  { %2692 = vmatmul.mubr.msk.f32.vlgmr.msra.gmra.mrb[0].mxu1 %vm51_vm0, %v237_v10  ;;  %v3415_v10 = vand.u32 31, %v589_v7 }
 0x2a8   :  { %2694 = vmatprep.mubr.msk.f32.mxu1 %vm51_vm0, %v238_v11 }
 0x2a9   :  { %vm699_vm5 = vcmp.lt.s32.totalorder %v3415_v10, 31 }
 0x2ab   :  { %2695 = vmatmul.mubr.msk.f32.gmra.mrb[2].mxu1 %vm51_vm0, %v239_v12 }
 0x330   :  { %v274_v13 = vpop.xlane.xlu1 %273 }
 0x331   :  { %v275_v14 = vrot.slane %v274_v13, 4 }
 0x333   :  { %v276_v15 = vadd.f32 %v275_v14, %v274_v13 }
 0x335   :  { %v277_v16 = vrot.slane %v276_v15, 2 }
 0x337   :  { %v278_v17 = vadd.f32 %v277_v16, %v276_v15  ;;  %v3427_v15 = vand.u32 31, %v3320_v21 }
 0x339   :  { %v279_v62 = vrot.slane %v278_v17, 1  ;;  %vm663_vm6 = vcmp.ge.s32.totalorder %v3427_v15, 1 }
 0x33b   :  { %v280_v18 = vadd.f32 %v279_v62, %v278_v17 }
 0x33d   :  { %3041 = vpush %v280_v18 }
 0x36e   :  { %s3042_s21 = spop %3041 }
 0x36f   :  { %v282_v63 = vstv %s3042_s21 }
 0x370   :  { %v283_v19 = vmul.f32 0.0009765625, %v282_v63 }
 0x372   :  { %v284_v0 = vadd.f32 1e-08, %v283_v19 }
 0x374   :  { %3066 = vrsqrt.f32 %v284_v0 }
 0x37a   :  { %v2693_v22 = vpop.f32.mrb[0].mxu1 }
 0x37b   :  { %v3323_v23 = vadd.f32 %v2693_v22, %v3318_v1  ;;  %v531_v24 = vpop.f32.mrb[1].mxu1 }
 0x37c   :  { %v3326_v25 = vadd.f32 %v3318_v1, %v531_v24 }
 0x37d   :  { %739 = vrot.lane.b32.xlu1 %v3323_v23, %s3072_s23  ;;  %v705_v26 = vrot.slane %v3323_v23, 1  ;;  %v672_v19 = vrot.slane %v3323_v23, 7 }
 0x37e   :  { %v3067_v29 = vpop.eup %3066  ;;  %737 = vrot.lane.b32.xlu0 %v3326_v25, %s3072_s23  ;;  %v2696_v30 = vpop.f32.mrb[2].mxu1  ;;  %v704_v31 = vrot.slane %v3326_v25, 1  ;;  %v671_v24 = vrot.slane %v3326_v25, 7 }
 0x37f   :  { %v3348_v35 = vadd.f32 %v2696_v30, %v3318_v1  ;;  %v541_v40 = vpop.f32.mrb[3].mxu1  ;;  %v286_v42 = vmul.f32 %v3067_v29, %v3281_v61  ;;  %v287_v43 = vmul.f32 %v3067_v29, %v3285_v2  ;;  %v288_v49 = vmul.f32 %v3067_v29, %v3289_v3  ;;  %v658_v2 = vld [vmem:[%s4267_s7 + $0x40] sm:$0xff]  ;;  %v659_v3 = vld [vmem:[%s4267_s7 + $0x48] sm:$0xff] }
 0x380   :  { %v3353_v44 = vadd.f32 %v3318_v1, %v541_v40  ;;  %v719_v48 = vsel %vm712_vm3, %v704_v31, %v705_v26  ;;  %v289_v55 = vmul.f32 %v3067_v29, %v3293_v4  ;;  %v2919_v61 = vpack.c.bf16 %v657_v60, %v656_v59 }
 0x381   :  { %2697 = vmatprep.mubr.msk.f32.mxu1 %vm51_vm0, %v286_v42  ;;  %769 = vrot.lane.b32.xlu1 %v719_v48, %s3073_s30  ;;  %v707_v50 = vrot.slane %v3348_v35, 1  ;;  %v2923_v4 = vpack.c.bf16 %v659_v3, %v658_v2  ;;  %v674_v41 = vrot.slane %v3348_v35, 7  ;;  %v686_v34 = vsel %vm679_vm4, %v671_v24, %v672_v19 }
 0x382   :  { %2698 = vmatmul.mubr.msk.f32.gmra.mrb[4].mxu1 %vm51_vm0, %v287_v43  ;;  %741 = vrot.lane.b32.xlu0 %v3353_v44, %s3072_s23  ;;  %v706_v54 = vrot.slane %v3353_v44, 1  ;;  %v673_v45 = vrot.slane %v3353_v44, 7 }
 0x383   :  { %2700 = vmatprep.mubr.msk.f32.mxu1 %vm51_vm0, %v288_v49  ;;  %2920 = vmatprep.subr.bf16.mxu0 %v2919_v61 }
 0x384   :  { %v717_v56 = vsel %vm712_vm3, %v706_v54, %v707_v50  ;;  %v718_v58 = vsel %vm712_vm3, %v705_v26, %v706_v54  ;;  %2922 = vmatpush3.bf16.msra.mxu0 %v2919_v61  ;;  %v684_v47 = vsel %vm679_vm4, %v673_v45, %v674_v41  ;;  %v685_v49 = vsel %vm679_vm4, %v672_v19, %v673_v45 }
 0x385   :  { %743 = vrot.lane.b32.xlu1 %v3348_v35, %s3072_s23  ;;  %2924 = vmatprep.subr.bf16.mxu0 %v2923_v4 }
 0x386   :  { %2701 = vmatmul.mubr.msk.f32.gmra.mrb[6].mxu1 %vm51_vm0, %v289_v55  ;;  %773 = vrot.lane.b32.xlu0 %v717_v56, %s3073_s30 }
 0x388   :  { %2926 = vmatpush3.bf16.msra.mxu0 %v2923_v4 }
 0x389   :  { %771 = vrot.lane.b32.xlu1 %v718_v58, %s3073_s30  ;;  %2928 = vmatprep.subr.bf16.mxu0 %v2927_v36  ;;  %v590_v58 = vadd.s32 32, %v3320_v21 }
 0x38b   :  { %v3497_v60 = vand.u32 31, %v590_v58  ;;  %v2424_v58 = vld [vmem:[%s4267_s7 + $0xa0] sm:$0xff] }
 0x38c   :  { %2930 = vmatpush3.bf16.msra.mxu0 %v2927_v36 }
 0x38d   :  { %vm667_vm10 = vcmp.ge.s32.totalorder %v3497_v60, 1 }
 0x3ef   :  { %v740_v38 = vpop.permute.xlu1 %739 }
 0x3f0   :  { %v738_v8 = vpop.permute.xlu0 %737  ;;  %v794_v48 = vsel %vm51_vm0, %v686_v34, %v740_v38 }
 0x3f3   :  { %v770_v39 = vpop.permute.xlu1 %769 }
 0x3f4   :  { %v742_v62 = vpop.permute.xlu0 %741 }
 0x3f5   :  { %v795_v52 = vsel %vm51_vm0, %v685_v49, %v742_v62  ;;  %v2419_v49 = vld [vmem:[%s4267_s7 + $0x78] sm:$0xff] }
 0x3f7   :  { %v744_v46 = vpop.permute.xlu1 %743 }
 0x3f8   :  { %v3412_v6 = vsel %vm51_vm0, %v684_v47, %v744_v46  ;;  %v774_v40 = vpop.permute.xlu0 %773 }
 0x3f9   :  { %v804_v54 = vsel %vm801_vm8, %v795_v52, %v774_v40  ;;  %v2420_v52 = vld [vmem:[%s4267_s7 + $0x80] sm:$0xff] }
 0x3fb   :  { %v772_v30 = vpop.permute.xlu1 %771 }
 0x3fc   :  { %v803_v53 = vsel %vm801_vm8, %v794_v48, %v772_v30 }
 0x455   :  { %v2699_v9 = vpop.f32.mrb[4].mxu1 }
 0x456   :  { %v3418_v11 = vadd.f32 %v2699_v9, %v3318_v1  ;;  %v551_v12 = vpop.f32.mrb[5].mxu1 }
 0x457   :  { %v3421_v13 = vadd.f32 %v3318_v1, %v551_v12 }
 0x458   :  { %747 = vrot.lane.b32.xlu1 %v3418_v11, %s3072_s23  ;;  %v709_v14 = vrot.slane %v3418_v11, 1  ;;  %v676_v3 = vrot.slane %v3418_v11, 7 }
 0x459   :  { %745 = vrot.lane.b32.xlu0 %v3421_v13, %s3072_s23  ;;  %v2702_v16 = vpop.f32.mrb[6].mxu1  ;;  %v708_v17 = vrot.slane %v3421_v13, 1  ;;  %v675_v59 = vrot.slane %v3421_v13, 7 }
 0x45a   :  { %v3434_v18 = vadd.f32 %v2702_v16, %v3318_v1  ;;  %v561_v63 = vpop.f32.mrb[7].mxu1 }
 0x45b   :  { %v3438_v0 = vadd.f32 %v3318_v1, %v561_v63  ;;  %v716_v20 = vsel %vm712_vm3, %v707_v50, %v708_v17  ;;  %v715_v22 = vsel %vm712_vm3, %v708_v17, %v709_v14  ;;  %v682_v45 = vsel %vm679_vm4, %v675_v59, %v676_v3 }
 0x45c   :  { %v678_v26 = vrot.slane %v3434_v18, 7  ;;  %v724_v27 = vsel %vm699_vm5, %v716_v20, 0.0  ;;  %v711_v43 = vrot.slane %v3434_v18, 1  ;;  %v3534_v20 = vld [vmem:[%s4268_s8] ss:$0 sm:$0xff] }
 0x45d   :  { %775 = vrot.lane.b32.xlu1 %v724_v27, %s3073_s30  ;;  %777 = vrot.lane.b32.xlu0 %v715_v22, %s3073_s30  ;;  %v710_v1 = vrot.slane %v3438_v0, 1 }
 0x45e   :  { %v687_v29 = vsel %vm679_vm4, %v678_v26, %v671_v24  ;;  %v720_v56 = vsel %vm712_vm3, %v711_v43, %v704_v31  ;;  %v683_v31 = vsel %vm679_vm4, %v674_v41, %v675_v59  ;;  %v677_v41 = vrot.slane %v3438_v0, 7  ;;  %v2425_v59 = vld [vmem:[%s4267_s7 + $0xa8] sm:$0xff] }
 0x45f   :  { %v714_v32 = vsel %vm712_vm3, %v709_v14, %v710_v1  ;;  %v688_v33 = vsel %vm663_vm6, %v687_v29, 0.0  ;;  %v713_v55 = vsel %vm712_vm3, %v710_v1, %v711_v43  ;;  %v728_v57 = vsel %vm703_vm9, %v720_v56, 0.0  ;;  %v2418_v43 = vld [vmem:[%s4267_s7 + $0x70] sm:$0xff]  ;;  %v2423_v56 = vld [vmem:[%s4267_s7 + $0x98] sm:$0xff] }
 0x460   :  { %v793_v42 = vsel %vm51_vm0, %v688_v33, %v738_v8  ;;  %v692_v4 = vsel %vm667_vm10, %v683_v31, 0.0  ;;  %v680_v17 = vsel %vm679_vm4, %v677_v41, %v678_v26  ;;  %v2427_v31 = vld [vmem:[%s4267_s7 + $0xb8] sm:$0xff] }
 0x461   :  { %749 = vrot.lane.b32.xlu0 %v3438_v0, %s3072_s23  ;;  %779 = vrot.lane.b32.xlu1 %v714_v32, %s3073_s30  ;;  %v802_v50 = vsel %vm801_vm8, %v793_v42, %v770_v39  ;;  %v2417_v42 = vld [vmem:[%s4267_s7 + $0x68] sm:$0xff] }
 0x462   :  { %2727 = vmatprep.mubr.msk.f32.mxu0 %vm816_vm7, %v802_v50  ;;  %v2935_v50 = vpack.c.bf16 %v2419_v49, %v2418_v43 }
 0x463   :  { %2728 = vmatmul.mubr.msk.f32.vlgmr.msra.gmra.mrb[8].mxu0 %vm816_vm7, %v803_v53  ;;  %v2421_v53 = vld [vmem:[%s4267_s7 + $0x88] sm:$0xff] }
 0x464   :  { %2730 = vmatprep.mubr.msk.f32.mxu0 %vm816_vm7, %v804_v54  ;;  %v2939_v54 = vpack.c.bf16 %v2421_v53, %v2420_v52 }
 0x465   :  { %751 = vrot.lane.b32.xlu1 %v3434_v18, %s3072_s23  ;;  %781 = vrot.lane.b32.xlu0 %v713_v55, %s3073_s30  ;;  %v2422_v55 = vld [vmem:[%s4267_s7 + $0x90] sm:$0xff] }
 0x469   :  { %783 = vrot.lane.b32.xlu1 %v728_v57, %s3073_s30  ;;  %v2943_v57 = vpack.c.bf16 %v2423_v56, %v2422_v55 }
 0x4ca   :  { %v748_v61 = vpop.permute.xlu1 %747 }
 0x4cb   :  { %v746_v2 = vpop.permute.xlu0 %745  ;;  %v798_v46 = vsel %vm51_vm0, %v682_v45, %v748_v61  ;;  %v2947_v61 = vpack.c.bf16 %v2425_v59, %v2424_v58 }
 0x4cc   :  { %v797_v5 = vsel %vm51_vm0, %v692_v4, %v746_v2  ;;  %v2426_v2 = vld [vmem:[%s4267_s7 + $0xb0] sm:$0xff] }
 0x4cf   :  { %v776_v37 = vpop.permute.xlu1 %775  ;;  %v778_v36 = vpop.permute.xlu0 %777 }
 0x4d0   :  { %v805_v38 = vsel %vm801_vm8, %v3412_v6, %v776_v37  ;;  %v806_v39 = vsel %vm801_vm8, %v797_v5, %v778_v36  ;;  %v681_v6 = vsel %vm679_vm4, %v676_v3, %v677_v41  ;;  %v2951_v3 = vpack.c.bf16 %v2427_v31, %v2426_v2 }
 0x4d1   :  { %2731 = vmatmul.mubr.msk.f32.gmra.mrb[10].mxu0 %vm816_vm7, %v805_v38 }
 0x4d2   :  { %2733 = vmatprep.mubr.msk.f32.mxu0 %vm816_vm7, %v806_v39 }
 0x4d3   :  { %v750_v47 = vpop.permute.xlu0 %749  ;;  %v780_v7 = vpop.permute.xlu1 %779 }
 0x4d4   :  { %v807_v8 = vsel %vm801_vm8, %v798_v46, %v780_v7  ;;  %v799_v9 = vsel %vm51_vm0, %v681_v6, %v750_v47 }
 0x4d5   :  { %2734 = vmatmul.mubr.msk.f32.gmra.mrb[12].mxu0 %vm816_vm7, %v807_v8 }
 0x4d7   :  { %v752_v12 = vpop.permute.xlu1 %751  ;;  %v782_v14 = vpop.permute.xlu0 %781 }
 0x4d8   :  { %v808_v16 = vsel %vm801_vm8, %v799_v9, %v782_v14  ;;  %v800_v62 = vsel %vm51_vm0, %v680_v17, %v752_v12 }
 0x4d9   :  { %2736 = vmatprep.mubr.msk.f32.mxu0 %vm816_vm7, %v808_v16 }
 0x4db   :  { %v784_v63 = vpop.permute.xlu1 %783 }
 0x4dc   :  { %v809_v19 = vsel %vm801_vm8, %v800_v62, %v784_v63 }
 0x4dd   :  { %2737 = vmatmul.mubr.msk.f32.gmra.mrb[14].mxu0 %vm816_vm7, %v809_v19 }
 0x536   :  { %v2729_v22 = vpop.f32.mrb[8].mxu0 }
 0x537   :  { %v913_v24 = vadd.f32 %v2729_v22, %v3534_v20  ;;  %v907_v27 = vpop.f32.mrb[9].mxu0 }
 0x538   :  { %v908_v1 = vadd.f32 %v3534_v20, %v907_v27 }
 0x539   :  { %vm947_vm11 = vcmp.ge.f32.partialorder %v913_v24, 0.0  ;;  %v955_v26 = vmul.f32 0.2, %v913_v24 }
 0x53a   :  { %vm946_vm12 = vcmp.ge.f32.partialorder %v908_v1, 0.0  ;;  %v954_v28 = vmul.f32 0.2, %v908_v1 }
 0x53b   :  { %v963_v29 = vsel %vm947_vm11, %v913_v24, %v955_v26 }
 0x53c   :  { %v3539_v30 = vadd.f32 %v963_v29, %v3323_v23  ;;  %v962_v32 = vsel %vm946_vm12, %v908_v1, %v954_v28  ;;  %vm1029_vm12 = vcmp.lt.s32.totalorder %v3415_v10, 29 }
 0x53d   :  { %v3542_v33 = vadd.f32 %v962_v32, %v3326_v25  ;;  %v2416_v25 = vld [vmem:[%s4267_s7 + $0x60] sm:$0xff] }
 0x53e   :  { %1069 = vrot.lane.b32.xlu1 %v3539_v30, %s3072_s23  ;;  %v1035_v34 = vrot.slane %v3539_v30, 3  ;;  %v2931_v48 = vpack.c.bf16 %v2417_v42, %v2416_v25  ;;  %v1002_v31 = vrot.slane %v3539_v30, 5 }
 0x53f   :  { %1067 = vrot.lane.b32.xlu0 %v3542_v33, %s3072_s23  ;;  %v1034_v40 = vrot.slane %v3542_v33, 3 }
 0x540   :  { %2932 = vmatprep.subr.bf16.mxu1 %v2931_v48 }
 0x541   :  { %v1049_v23 = vsel %vm1042_vm13, %v1034_v40, %v1035_v34  ;;  %2934 = vmatpush3.bf16.msra.mxu1 %v2931_v48  ;;  %v1001_v48 = vrot.slane %v3542_v33, 5 }
 0x542   :  { %2936 = vmatprep.subr.bf16.mxu1 %v2935_v50 }
 0x543   :  { %1099 = vrot.lane.b32.xlu0 %v1049_v23, %s3073_s30 }
 0x545   :  { %2938 = vmatpush3.bf16.msra.mxu1 %v2935_v50 }
 0x546   :  { %2940 = vmatprep.subr.bf16.mxu1 %v2939_v54 }
 0x549   :  { %2942 = vmatpush3.bf16.msra.mxu1 %v2939_v54 }
 0x54a   :  { %2944 = vmatprep.subr.bf16.mxu1 %v2943_v57 }
 0x54d   :  { %2946 = vmatpush3.bf16.msra.mxu1 %v2943_v57 }
 0x54e   :  { %2948 = vmatprep.subr.bf16.mxu1 %v2947_v61 }
 0x551   :  { %2950 = vmatpush3.bf16.msra.mxu1 %v2947_v61 }
 0x552   :  { %2952 = vmatprep.subr.bf16.mxu1 %v2951_v3 }
 0x555   :  { %2954 = vmatpush3.bf16.msra.mxu1 %v2951_v3 }
 0x5a4   :  { %v2732_v4 = vpop.f32.mrb[10].mxu0 }
 0x5a5   :  { %v923_v5 = vadd.f32 %v2732_v4, %v3534_v20  ;;  %v917_v37 = vpop.f32.mrb[11].mxu0 }
 0x5a6   :  { %v918_v36 = vadd.f32 %v3534_v20, %v917_v37 }
 0x5a7   :  { %vm949_vm14 = vcmp.ge.f32.partialorder %v923_v5, 0.0  ;;  %v957_v38 = vmul.f32 0.2, %v923_v5 }
 0x5a8   :  { %vm948_vm15 = vcmp.ge.f32.partialorder %v918_v36, 0.0  ;;  %v956_v39 = vmul.f32 0.2, %v918_v36  ;;  %v2735_v45 = vpop.f32.mrb[12].mxu0 }
 0x5a9   :  { %v965_v41 = vsel %vm949_vm14, %v923_v5, %v957_v38  ;;  %v933_v46 = vadd.f32 %v2735_v45, %v3534_v20  ;;  %v927_v47 = vpop.f32.mrb[13].mxu0 }
 0x5aa   :  { %v3598_v7 = vadd.f32 %v965_v41, %v3348_v35  ;;  %v964_v8 = vsel %vm948_vm15, %v918_v36, %v956_v39  ;;  %v928_v6 = vadd.f32 %v3534_v20, %v927_v47  ;;  %vm993_vm15 = vcmp.ge.s32.totalorder %v3427_v15, 3 }
 0x5ab   :  { %v3602_v9 = vadd.f32 %v964_v8, %v3353_v44  ;;  %vm951_vm1 = vcmp.ge.f32.partialorder %v933_v46, 0.0  ;;  %v959_v12 = vmul.f32 0.2, %v933_v46 }
 0x5ac   :  { %vm950_vm2 = vcmp.ge.f32.partialorder %v928_v6, 0.0  ;;  %v958_v14 = vmul.f32 0.2, %v928_v6  ;;  %1073 = vrot.lane.b32.xlu1 %v3598_v7, %s3072_s23  ;;  %v1037_v16 = vrot.slane %v3598_v7, 3  ;;  %v1004_v8 = vrot.slane %v3598_v7, 5 }
 0x5ad   :  { %v967_v17 = vsel %vm951_vm1, %v933_v46, %v959_v12  ;;  %1071 = vrot.lane.b32.xlu0 %v3602_v9, %s3072_s23  ;;  %v1036_v35 = vrot.slane %v3602_v9, 3  ;;  %vm1009_vm1 = vcmp.lt.s32.totalorder %v3320_v21, 3  ;;  %v1003_v3 = vrot.slane %v3602_v9, 5 }
 0x5ae   :  { %v966_v62 = vsel %vm950_vm2, %v928_v6, %v958_v14  ;;  %v3620_v22 = vadd.f32 %v967_v17, %v3418_v11  ;;  %vm1033_vm2 = vcmp.lt.s32.totalorder %v3474_v51, 29  ;;  %v1016_v37 = vsel %vm1009_vm1, %v1001_v48, %v1002_v31 }
 0x5af   :  { %v3611_v63 = vadd.f32 %v966_v62, %v3421_v13  ;;  %v1048_v44 = vsel %vm1042_vm13, %v1035_v34, %v1036_v35  ;;  %v1047_v19 = vsel %vm1042_vm13, %v1036_v35, %v1037_v16 }
 0x5b0   :  { %1101 = vrot.lane.b32.xlu1 %v1048_v44, %s3073_s30  ;;  %v2738_v24 = vpop.f32.mrb[14].mxu0  ;;  %v1039_v32 = vrot.slane %v3620_v22, 3  ;;  %v1070_v2 = vpop.permute.xlu1 %1069  ;;  %v1006_v17 = vrot.slane %v3620_v22, 5 }
 0x5b1   :  { %v943_v27 = vadd.f32 %v2738_v24, %v3534_v20  ;;  %1103 = vrot.lane.b32.xlu0 %v1047_v19, %s3073_s30  ;;  %v937_v13 = vpop.f32.mrb[15].mxu0  ;;  %v1038_v1 = vrot.slane %v3611_v63, 3  ;;  %v1068_v23 = vpop.permute.xlu0 %1067  ;;  %v1124_v36 = vsel %vm51_vm0, %v1016_v37, %v1070_v2  ;;  %v1005_v46 = vrot.slane %v3611_v63, 5  ;;  %v2447_v37 = vld [vmem:[%s4267_s7 + $0x108] sm:$0xff] }
 0x5b2   :  { %v938_v26 = vadd.f32 %v3534_v20, %v937_v13 }
 0x5b3   :  { %vm953_vm11 = vcmp.ge.f32.partialorder %v943_v27, 0.0  ;;  %v961_v28 = vmul.f32 0.2, %v943_v27  ;;  %v1046_v11 = vsel %vm1042_vm13, %v1037_v16, %v1038_v1  ;;  %v1045_v50 = vsel %vm1042_vm13, %v1038_v1, %v1039_v32 }
 0x5b4   :  { %vm952_vm14 = vcmp.ge.f32.partialorder %v938_v26, 0.0  ;;  %v960_v29 = vmul.f32 0.2, %v938_v26  ;;  %1077 = vrot.lane.b32.xlu1 %v3620_v22, %s3072_s23  ;;  %v1054_v43 = vsel %vm1029_vm12, %v1046_v11, 0.0  ;;  %v1013_v12 = vsel %vm1009_vm1, %v1004_v8, %v1005_v46 }
 0x5b5   :  { %v969_v34 = vsel %vm953_vm11, %v943_v27, %v961_v28  ;;  %1075 = vrot.lane.b32.xlu0 %v3611_v63, %s3072_s23  ;;  %v1100_v55 = vpop.permute.xlu0 %1099  ;;  %vm997_vm11 = vcmp.ge.s32.totalorder %v3497_v60, 3  ;;  %v1014_v16 = vsel %vm1009_vm1, %v1003_v3, %v1004_v8  ;;  %v1012_v1 = vsel %vm1009_vm1, %v1005_v46, %v1006_v17  ;;  %v2448_v8 = vld [vmem:[%s4267_s7 + $0x110] sm:$0xff] }
 0x5b6   :  { %v3636_v20 = vadd.f32 %v969_v34, %v3434_v18  ;;  %v968_v25 = vsel %vm952_vm14, %v938_v26, %v960_v29  ;;  %v1022_v62 = vsel %vm997_vm11, %v1013_v12, 0.0 }
 0x5b7   :  { %v3639_v42 = vadd.f32 %v968_v25, %v3438_v0 }
 0x5b8   :  { %v1008_v49 = vrot.slane %v3636_v20, 5  ;;  %1105 = vrot.lane.b32.xlu1 %v1054_v43, %s3073_s30  ;;  %v1041_v56 = vrot.slane %v3636_v20, 3 }
 0x5b9   :  { %1107 = vrot.lane.b32.xlu0 %v1045_v50, %s3073_s30  ;;  %v1040_v18 = vrot.slane %v3639_v42, 3  ;;  %v1007_v29 = vrot.slane %v3639_v42, 5 }
 0x5ba   :  { %v1017_v0 = vsel %vm1009_vm1, %v1008_v49, %v1001_v48  ;;  %v1050_v59 = vsel %vm1042_vm13, %v1041_v56, %v1034_v40  ;;  %v1015_v40 = vsel %vm1009_vm1, %v1002_v31, %v1003_v3  ;;  %v2444_v31 = vld [vmem:[%s4267_s7 + $0xf0] sm:$0xff]  ;;  %v2445_v3 = vld [vmem:[%s4267_s7 + $0xf8] sm:$0xff] }
 0x5bb   :  { %v1018_v52 = vsel %vm993_vm15, %v1017_v0, 0.0  ;;  %v1044_v53 = vsel %vm1042_vm13, %v1039_v32, %v1040_v18  ;;  %v1043_v58 = vsel %vm1042_vm13, %v1040_v18, %v1041_v56  ;;  %v1058_v61 = vsel %vm1033_vm2, %v1050_v59, 0.0  ;;  %v2442_v59 = vld [vmem:[%s4267_s7 + $0xe0] sm:$0xff] }
 0x5bc   :  { %v1123_v54 = vsel %vm51_vm0, %v1018_v52, %v1068_v23  ;;  %1109 = vrot.lane.b32.xlu1 %v1044_v53, %s3073_s30  ;;  %v1011_v34 = vsel %vm1009_vm1, %v1006_v17, %v1007_v29  ;;  %v1010_v50 = vsel %vm1009_vm1, %v1007_v29, %v1008_v49  ;;  %v3074_v53 = vmov 0.0   ;;  %v2439_v49 = vld [vmem:[%s4267_s7 + $0xc8] sm:$0xff] }
 0x5bd   :  { %v1131_v57 = vsel %vm801_vm8, %v1123_v54, %v1100_v55  ;;  %1079 = vrot.lane.b32.xlu0 %v3639_v42, %s3072_s23  ;;  %v2438_v54 = vld [vmem:[%s4267_s7 + $0xc0] sm:$0xff]  ;;  %v2440_v55 = vld [vmem:[%s4267_s7 + $0xd0] sm:$0xff] }
 0x5be   :  { %2763 = vmatprep.mubr.msk.f32.mxu1 %vm816_vm7, %v1131_v57  ;;  %v2955_v56 = vpack.c.bf16 %v2439_v49, %v2438_v54  ;;  %v2441_v57 = vld [vmem:[%s4267_s7 + $0xd8] sm:$0xff] }
 0x5c0   :  { %1081 = vrot.lane.b32.xlu1 %v3636_v20, %s3072_s23  ;;  %2956 = vmatprep.subr.bf16.mxu0 %v2955_v56 }
 0x5c1   :  { %1111 = vrot.lane.b32.xlu0 %v1043_v58, %s3073_s30  ;;  %v2959_v58 = vpack.c.bf16 %v2441_v57, %v2440_v55  ;;  %2958 = vmatpush3.bf16.msra.mxu0 %v2955_v56 }
 0x5c3   :  { %2960 = vmatprep.subr.bf16.mxu0 %v2959_v58 }
 0x5c4   :  { %1113 = vrot.lane.b32.xlu1 %v1058_v61, %s3073_s30  ;;  %v2443_v61 = vld [vmem:[%s4267_s7 + $0xe8] sm:$0xff] }
 0x5c5   :  { %v2963_v2 = vpack.c.bf16 %v2443_v61, %v2442_v59  ;;  %2962 = vmatpush3.bf16.msra.mxu0 %v2959_v58 }
 0x5c7   :  { %2964 = vmatprep.subr.bf16.mxu0 %v2963_v2 }
 0x5c8   :  { %1431 = vrot.lane.b32.xlu1 %v3074_v53, %s3073_s30 }
 0x5c9   :  { %2966 = vmatpush3.bf16.msra.mxu0 %v2963_v2 }
 0x61e   :  { %v1074_v4 = vpop.permute.xlu1 %1073 }
 0x61f   :  { %v1072_v5 = vpop.permute.xlu0 %1071  ;;  %v1126_v35 = vsel %vm51_vm0, %v1014_v16, %v1074_v4  ;;  %v2446_v4 = vld [vmem:[%s4267_s7 + $0x100] sm:$0xff] }
 0x620   :  { %v1125_v39 = vsel %vm51_vm0, %v1015_v40, %v1072_v5  ;;  %v2967_v5 = vpack.c.bf16 %v2445_v3, %v2444_v31  ;;  %v2971_v40 = vpack.c.bf16 %v2447_v37, %v2446_v4 }
 0x622   :  { %v1102_v38 = vpop.permute.xlu1 %1101  ;;  %2968 = vmatprep.subr.bf16.mxu0 %v2967_v5 }
 0x623   :  { %v1132_v45 = vsel %vm801_vm8, %v1124_v36, %v1102_v38  ;;  %v1104_v41 = vpop.permute.xlu0 %1103  ;;  %v3753_v36 = vld [vmem:[%s4268_s8 + $0x1] ss:$0 sm:$0xff]  ;;  %2970 = vmatpush3.bf16.msra.mxu0 %v2967_v5 }
 0x624   :  { %v1133_v47 = vsel %vm801_vm8, %v1125_v39, %v1104_v41  ;;  %2764 = vmatmul.mubr.msk.f32.vlgmr.msra.gmra.mrb[8].mxu1 %vm816_vm7, %v1132_v45  ;;  %2972 = vmatprep.subr.bf16.mxu0 %v2971_v40 }
 0x625   :  { %2766 = vmatprep.mubr.msk.f32.mxu1 %vm816_vm7, %v1133_v47 }
 0x626   :  { %v1078_v6 = vpop.permute.xlu1 %1077 }
 0x627   :  { %v1076_v14 = vpop.permute.xlu0 %1075  ;;  %v1128_v26 = vsel %vm51_vm0, %v1012_v1, %v1078_v6  ;;  %2974 = vmatpush3.bf16.msra.mxu0 %v2971_v40  ;;  %v2449_v6 = vld [vmem:[%s4267_s7 + $0x118] sm:$0xff] }
 0x628   :  { %v1127_v19 = vsel %vm51_vm0, %v1022_v62, %v1076_v14  ;;  %v2975_v14 = vpack.c.bf16 %v2449_v6, %v2448_v8  ;;  %v587_v8 = vadd.s32 8, %v3320_v21 }
 0x62a   :  { %v1106_v44 = vpop.permute.xlu1 %1105  ;;  %2976 = vmatprep.subr.bf16.mxu0 %v2975_v14 }
 0x62b   :  { %v1134_v24 = vsel %vm801_vm8, %v1126_v35, %v1106_v44  ;;  %v1108_v27 = vpop.permute.xlu0 %1107  ;;  %2978 = vmatpush3.bf16.msra.mxu0 %v2975_v14  ;;  %v605_v14 = vand.u32 31, %v587_v8 }
 0x62c   :  { %v1135_v13 = vsel %vm801_vm8, %v1127_v19, %v1108_v27  ;;  %2767 = vmatmul.mubr.msk.f32.gmra.mrb[10].mxu1 %vm816_vm7, %v1134_v24 }
 0x62d   :  { %2769 = vmatprep.mubr.msk.f32.mxu1 %vm816_vm7, %v1135_v13 }
 0x62e   :  { %v1110_v28 = vpop.permute.xlu1 %1109 }
 0x62f   :  { %v1136_v11 = vsel %vm801_vm8, %v1128_v26, %v1110_v28  ;;  %v1080_v32 = vpop.permute.xlu0 %1079 }
 0x630   :  { %2770 = vmatmul.mubr.msk.f32.gmra.mrb[12].mxu1 %vm816_vm7, %v1136_v11  ;;  %v1129_v25 = vsel %vm51_vm0, %v1011_v34, %v1080_v32 }
 0x632   :  { %v1082_v23 = vpop.permute.xlu1 %1081 }
 0x633   :  { %v1112_v43 = vpop.permute.xlu0 %1111  ;;  %v1130_v18 = vsel %vm51_vm0, %v1010_v50, %v1082_v23 }
 0x634   :  { %v1137_v48 = vsel %vm801_vm8, %v1129_v25, %v1112_v43 }
 0x635   :  { %2772 = vmatprep.mubr.msk.f32.mxu1 %vm816_vm7, %v1137_v48  ;;  %v588_v48 = vadd.s32 16, %v3320_v21 }
 0x636   :  { %v1114_v0 = vpop.permute.xlu1 %1113 }
 0x637   :  { %v1138_v52 = vsel %vm801_vm8, %v1130_v18, %v1114_v0  ;;  %v612_v56 = vand.u32 31, %v588_v48 }
 0x638   :  { %2773 = vmatmul.mubr.msk.f32.gmra.mrb[14].mxu1 %vm816_vm7, %v1138_v52 }
 0x6f7   :  { %v2765_v38 = vpop.f32.mrb[8].mxu1 }
 0x6f8   :  { %v1241_v39 = vadd.f32 %v2765_v38, %v3753_v36  ;;  %v1235_v45 = vpop.f32.mrb[9].mxu1  ;;  %v592_v38 = vadd.s32 48, %v3320_v21 }
 0x6f9   :  { %v1236_v41 = vadd.f32 %v3753_v36, %v1235_v45 }
 0x6fa   :  { %vm1275_vm12 = vcmp.ge.f32.partialorder %v1241_v39, 0.0  ;;  %v1283_v46 = vmul.f32 0.2, %v1241_v39 }
 0x6fb   :  { %vm1274_vm14 = vcmp.ge.f32.partialorder %v1236_v41, 0.0  ;;  %v1282_v47 = vmul.f32 0.2, %v1236_v41 }
 0x6fc   :  { %v1291_v12 = vsel %vm1275_vm12, %v1241_v39, %v1283_v46 }
 0x6fd   :  { %v3764_v16 = vadd.f32 %v1291_v12, %v3539_v30  ;;  %v1290_v17 = vsel %vm1274_vm14, %v1236_v41, %v1282_v47  ;;  %v1432_v47 = vpop.permute.xlu1 %1431 }
 0x6fe   :  { %v3767_v35 = vadd.f32 %v1290_v17, %v3542_v33 }
 0x6ff   :  { %v2768_v62 = vpop.f32.mrb[10].mxu1  ;;  %1395 = vrot.lane.b32.xlu1 %v3764_v16, %s3072_s23  ;;  %v1362_v43 = vrot.slane %v3764_v16, 1 }
 0x700   :  { %v1251_v44 = vadd.f32 %v2768_v62, %v3753_v36  ;;  %v1245_v19 = vpop.f32.mrb[11].mxu1  ;;  %1393 = vrot.lane.b32.xlu0 %v3767_v35, %s3072_s23  ;;  %v1361_v45 = vrot.slane %v3767_v35, 1  ;;  %v1329_v62 = vrot.slane %v3767_v35, 7 }
 0x701   :  { %v1246_v24 = vadd.f32 %v3753_v36, %v1245_v19 }
 0x702   :  { %vm1277_vm15 = vcmp.ge.f32.partialorder %v1251_v44, 0.0  ;;  %v1285_v30 = vmul.f32 0.2, %v1251_v44 }
 0x703   :  { %vm1276_vm2 = vcmp.ge.f32.partialorder %v1246_v24, 0.0  ;;  %v1284_v27 = vmul.f32 0.2, %v1246_v24  ;;  %v2771_v33 = vpop.f32.mrb[12].mxu1 }
 0x704   :  { %v1293_v13 = vsel %vm1277_vm15, %v1251_v44, %v1285_v30  ;;  %v1261_v1 = vadd.f32 %v2771_v33, %v3753_v36  ;;  %v1255_v26 = vpop.f32.mrb[13].mxu1 }
 0x705   :  { %v3777_v28 = vadd.f32 %v1293_v13, %v3598_v7  ;;  %v1292_v29 = vsel %vm1276_vm2, %v1246_v24, %v1284_v27  ;;  %v1256_v11 = vadd.f32 %v3753_v36, %v1255_v26  ;;  %vm1355_vm2 = vcmp.lt.s32.totalorder %v612_v56, 23 }
 0x706   :  { %v3781_v32 = vadd.f32 %v1292_v29, %v3602_v9  ;;  %v1287_v34 = vmul.f32 0.2, %v1261_v1  ;;  %vm1279_vm11 = vcmp.ge.f32.partialorder %v1261_v1, 0.0  ;;  %v591_v29 = vadd.s32 40, %v3320_v21 }
 0x707   :  { %vm1278_vm12 = vcmp.ge.f32.partialorder %v1256_v11, 0.0  ;;  %v1286_v23 = vmul.f32 0.2, %v1256_v11  ;;  %1399 = vrot.lane.b32.xlu1 %v3777_v28, %s3072_s23  ;;  %v1364_v25 = vrot.slane %v3777_v28, 1 }
 0x708   :  { %1397 = vrot.lane.b32.xlu0 %v3781_v32, %s3072_s23  ;;  %v1363_v7 = vrot.slane %v3781_v32, 1  ;;  %v1295_v50 = vsel %vm1279_vm11, %v1261_v1, %v1287_v34 }
 0x709   :  { %v1294_v9 = vsel %vm1278_vm12, %v1256_v11, %v1286_v23  ;;  %vm1322_vm12 = vcmp.ge.s32.totalorder %v605_v14, 9  ;;  %v1331_v11 = vrot.slane %v3781_v32, 7  ;;  %v1330_v23 = vrot.slane %v3764_v16, 7  ;;  %v2462_v14 = vld [vmem:[%s4267_s7 + $0x130] sm:$0xff] }
 0x70a   :  { %v3792_v18 = vadd.f32 %v1294_v9, %v3611_v63  ;;  %v1373_v0 = vsel %vm712_vm3, %v1363_v7, %v1364_v25  ;;  %v1374_v52 = vsel %vm712_vm3, %v1362_v43, %v1363_v7  ;;  %v3803_v63 = vadd.f32 %v1295_v50, %v3620_v22 }
 0x70b   :  { %1427 = vrot.lane.b32.xlu1 %v1373_v0, %s3073_s30  ;;  %v2774_v54 = vpop.f32.mrb[14].mxu1  ;;  %v633_v7 = vand.u32 31, %v591_v29  ;;  %v1342_v48 = vsel %vm679_vm4, %v1330_v23, %v1331_v11  ;;  %v1343_v50 = vsel %vm679_vm4, %v1329_v62, %v1330_v23  ;;  %v1332_v0 = vrot.slane %v3777_v28, 7 }
 0x70c   :  { %v1271_v49 = vadd.f32 %v2774_v54, %v3753_v36  ;;  %1425 = vrot.lane.b32.xlu0 %v1374_v52, %s3073_s30  ;;  %v1265_v55 = vpop.f32.mrb[15].mxu1  ;;  %v1365_v57 = vrot.slane %v3792_v18, 1  ;;  %v1366_v40 = vrot.slane %v3803_v63, 1  ;;  %v1333_v43 = vrot.slane %v3792_v18, 7 }
 0x70d   :  { %v1266_v58 = vadd.f32 %v3753_v36, %v1265_v55 }
 0x70e   :  { %vm1281_vm14 = vcmp.ge.f32.partialorder %v1271_v49, 0.0  ;;  %v1289_v59 = vmul.f32 0.2, %v1271_v49  ;;  %v1372_v31 = vsel %vm712_vm3, %v1364_v25, %v1365_v57  ;;  %v1340_v55 = vsel %vm679_vm4, %v1332_v0, %v1333_v43 }
 0x70f   :  { %vm1280_vm15 = vcmp.ge.f32.partialorder %v1266_v58, 0.0  ;;  %v1288_v61 = vmul.f32 0.2, %v1266_v58  ;;  %1403 = vrot.lane.b32.xlu1 %v3803_v63, %s3072_s23  ;;  %v1379_v5 = vsel %vm1355_vm2, %v1372_v31, 0.0 }
 0x710   :  { %v1297_v2 = vsel %vm1281_vm14, %v1271_v49, %v1289_v59  ;;  %1401 = vrot.lane.b32.xlu0 %v3792_v18, %s3072_s23  ;;  %vm1326_vm14 = vcmp.ge.s32.totalorder %v633_v7, 9 }
 0x711   :  { %v3813_v22 = vadd.f32 %v1297_v2, %v3636_v20  ;;  %v1296_v3 = vsel %vm1280_vm15, %v1266_v58, %v1288_v61  ;;  %v1350_v59 = vsel %vm1326_vm14, %v1340_v55, 0.0  ;;  %v2471_v55 = vld [vmem:[%s4267_s7 + $0x178] sm:$0xff] }
 0x712   :  { %v3816_v4 = vadd.f32 %v1296_v3, %v3639_v42  ;;  %v640_v42 = vand.u32 31, %v592_v38 }
 0x713   :  { %v1368_v37 = vrot.slane %v3813_v22, 1  ;;  %v1336_v17 = vrot.slane %v3813_v22, 7 }
 0x714   :  { %1429 = vrot.lane.b32.xlu0 %v1379_v5, %s3073_s30  ;;  %v1367_v36 = vrot.slane %v3816_v4, 1  ;;  %vm1359_vm11 = vcmp.lt.s32.totalorder %v640_v42, 23 }
 0x715   :  { %v1376_v41 = vsel %vm712_vm3, %v1368_v37, %v1361_v45  ;;  %v1344_v24 = vsel %vm679_vm4, %v1336_v17, %v1329_v62  ;;  %v2463_v62 = vld [vmem:[%s4267_s7 + $0x138] sm:$0xff] }
 0x716   :  { %v1369_v39 = vsel %vm712_vm3, %v1367_v36, %v1368_v37  ;;  %v1370_v20 = vsel %vm712_vm3, %v1366_v40, %v1367_v36  ;;  %v1383_v46 = vsel %vm1359_vm11, %v1376_v41, 0.0  ;;  %v1346_v27 = vsel %vm1322_vm12, %v1344_v24, 0.0  ;;  %v2465_v24 = vld [vmem:[%s4267_s7 + $0x148] sm:$0xff] }
 0x717   :  { %1435 = vrot.lane.b32.xlu1 %v1369_v39, %s3073_s30  ;;  %v1334_v37 = vrot.slane %v3803_v63, 7  ;;  %v1335_v40 = vrot.slane %v3816_v4, 7 }
 0x718   :  { %1433 = vrot.lane.b32.xlu0 %v1370_v20, %s3073_s30 }
 0x719   :  { %v1339_v39 = vsel %vm679_vm4, %v1333_v43, %v1334_v37  ;;  %v1338_v42 = vsel %vm679_vm4, %v1334_v37, %v1335_v40  ;;  %v2468_v43 = vld [vmem:[%s4267_s7 + $0x160] sm:$0xff] }
 0x71b   :  { %1407 = vrot.lane.b32.xlu1 %v3813_v22, %s3072_s23 }
 0x71c   :  { %1405 = vrot.lane.b32.xlu0 %v3816_v4, %s3072_s23 }
 0x71f   :  { %1439 = vrot.lane.b32.xlu1 %v3074_v53, %s3073_s30 }
 0x720   :  { %1437 = vrot.lane.b32.xlu0 %v1383_v46, %s3073_s30 }
 0x723   :  { %3055 = vrot.lane.b32.xlu1 %v3074_v53, %s3073_s30 }
 0x771   :  { %v1396_v6 = vpop.permute.xlu1 %1395 }
 0x772   :  { %v1394_v12 = vpop.permute.xlu0 %1393  ;;  %v1450_v1 = vsel %vm51_vm0, %v1346_v27, %v1396_v6  ;;  %v2460_v6 = vld [vmem:[%s4267_s7 + $0x120] sm:$0xff] }
 0x773   :  { %v1449_v33 = vsel %vm51_vm0, 0.0, %v1394_v12  ;;  %v2461_v12 = vld [vmem:[%s4267_s7 + $0x128] sm:$0xff] }
 0x774   :  { %v2979_v17 = vpack.c.bf16 %v2461_v12, %v2460_v6 }
 0x776   :  { %2980 = vmatprep.subr.bf16.mxu1 %v2979_v17 }
 0x777   :  { %2982 = vmatpush3.bf16.msra.mxu1 %v2979_v17 }
 0x779   :  { %v1400_v44 = vpop.permute.xlu1 %1399 }
 0x77a   :  { %v1398_v19 = vpop.permute.xlu0 %1397  ;;  %v1452_v9 = vsel %vm51_vm0, %v1342_v48, %v1400_v44  ;;  %v2983_v44 = vpack.c.bf16 %v2463_v62, %v2462_v14  ;;  %v2469_v48 = vld [vmem:[%s4267_s7 + $0x168] sm:$0xff] }
 0x77b   :  { %v1451_v54 = vsel %vm51_vm0, %v1343_v50, %v1398_v19  ;;  %v1460_v57 = vsel %vm801_vm8, %v1452_v9, %v1432_v47  ;;  %v2464_v19 = vld [vmem:[%s4267_s7 + $0x140] sm:$0xff]  ;;  %v2995_v0 = vpack.c.bf16 %v2469_v48, %v2468_v43 }
 0x77c   :  { %2984 = vmatprep.subr.bf16.mxu1 %v2983_v44  ;;  %v2987_v27 = vpack.c.bf16 %v2465_v24, %v2464_v19 }
 0x77d   :  { %v1428_v30 = vpop.permute.xlu1 %1427  ;;  %2986 = vmatpush3.bf16.msra.mxu1 %v2983_v44 }
 0x77e   :  { %v1426_v13 = vpop.permute.xlu0 %1425  ;;  %v1458_v34 = vsel %vm801_vm8, %v1450_v1, %v1428_v30  ;;  %v2466_v30 = vld [vmem:[%s4267_s7 + $0x150] sm:$0xff]  ;;  %2988 = vmatprep.subr.bf16.mxu1 %v2987_v27 }
 0x77f   :  { %v1457_v26 = vsel %vm801_vm8, %v1449_v33, %v1426_v13  ;;  %v2467_v33 = vld [vmem:[%s4267_s7 + $0x158] sm:$0xff]  ;;  %v2451_v13 = vld [vmem:[%s4268_s8 + $0x2] ss:$0 sm:$0xff] }
 0x780   :  { %2799 = vmatprep.mubr.msk.f32.mxu0 %vm816_vm7, %v1457_v26  ;;  %v2991_v1 = vpack.c.bf16 %v2467_v33, %v2466_v30 }
 0x781   :  { %2800 = vmatmul.mubr.msk.f32.vlgmr.msra.gmra.mrb[16].mxu0 %vm816_vm7, %v1458_v34  ;;  %v1404_v52 = vpop.permute.xlu1 %1403  ;;  %2990 = vmatpush3.bf16.msra.mxu1 %v2987_v27 }
 0x782   :  { %v1402_v25 = vpop.permute.xlu0 %1401  ;;  %v1454_v31 = vsel %vm51_vm0, %v1350_v59, %v1404_v52  ;;  %2992 = vmatprep.subr.bf16.mxu1 %v2991_v1 }
 0x783   :  { %v1453_v61 = vsel %vm51_vm0, 0.0, %v1402_v25 }
 0x785   :  { %2994 = vmatpush3.bf16.msra.mxu1 %v2991_v1 }
 0x786   :  { %v1430_v49 = vpop.permute.xlu0 %1429  ;;  %2996 = vmatprep.subr.bf16.mxu1 %v2995_v0 }
 0x787   :  { %v1459_v56 = vsel %vm801_vm8, %v1451_v54, %v1430_v49  ;;  %v2470_v49 = vld [vmem:[%s4267_s7 + $0x170] sm:$0xff] }
 0x788   :  { %2802 = vmatprep.mubr.msk.f32.mxu0 %vm816_vm7, %v1459_v56 }
 0x789   :  { %2803 = vmatmul.mubr.msk.f32.gmra.mrb[18].mxu0 %vm816_vm7, %v1460_v57  ;;  %v1436_v58 = vpop.permute.xlu1 %1435  ;;  %2998 = vmatpush3.bf16.msra.mxu1 %v2995_v0 }
 0x78a   :  { %v1434_v2 = vpop.permute.xlu0 %1433  ;;  %v1462_v5 = vsel %vm801_vm8, %v1454_v31, %v1436_v58 }
 0x78b   :  { %v1461_v3 = vsel %vm801_vm8, %v1453_v61, %v1434_v2 }
 0x78c   :  { %2805 = vmatprep.mubr.msk.f32.mxu0 %vm816_vm7, %v1461_v3 }
 0x78d   :  { %2806 = vmatmul.mubr.msk.f32.gmra.mrb[20].mxu0 %vm816_vm7, %v1462_v5  ;;  %v1408_v36 = vpop.permute.xlu1 %1407 }
 0x78e   :  { %v1406_v38 = vpop.permute.xlu0 %1405  ;;  %v1456_v46 = vsel %vm51_vm0, %v1338_v42, %v1408_v36 }
 0x78f   :  { %v1455_v45 = vsel %vm51_vm0, %v1339_v39, %v1406_v38 }
 0x791   :  { %v1440_v20 = vpop.permute.xlu1 %1439 }
 0x792   :  { %v1438_v41 = vpop.permute.xlu0 %1437  ;;  %v1464_v8 = vsel %vm801_vm8, %v1456_v46, %v1440_v20 }
 0x793   :  { %v1463_v47 = vsel %vm801_vm8, %v1455_v45, %v1438_v41 }
 0x794   :  { %2808 = vmatprep.mubr.msk.f32.mxu0 %vm816_vm7, %v1463_v47 }
 0x795   :  { %2809 = vmatmul.mubr.msk.f32.gmra.mrb[22].mxu0 %vm816_vm7, %v1464_v8 }
 0x854   :  { %v2801_v26 = vpop.f32.mrb[16].mxu0 }
 0x855   :  { %v1567_v29 = vadd.f32 %v2801_v26, %v2451_v13  ;;  %v1561_v11 = vpop.f32.mrb[17].mxu0 }
 0x856   :  { %v1562_v34 = vadd.f32 %v2451_v13, %v1561_v11 }
 0x857   :  { %vm1601_vm15 = vcmp.ge.f32.partialorder %v1567_v29, 0.0  ;;  %v1609_v23 = vmul.f32 0.2, %v1567_v29 }
 0x858   :  { %vm1600_vm2 = vcmp.ge.f32.partialorder %v1562_v34, 0.0  ;;  %v1608_v25 = vmul.f32 0.2, %v1562_v34 }
 0x859   :  { %v1617_v7 = vsel %vm1601_vm15, %v1567_v29, %v1609_v23  ;;  %vm1679_vm15 = vcmp.lt.s32.totalorder %v3427_v15, 5 }
 0x85a   :  { %v1616_v9 = vsel %vm1600_vm2, %v1562_v34, %v1608_v25  ;;  %v3921_v50 = vadd.f32 %v1617_v7, %v3764_v16 }
 0x85b   :  { %v3924_v52 = vadd.f32 %v1616_v9, %v3767_v35  ;;  %v2999_v35 = vpack.c.bf16 %v2471_v55, %v2470_v49 }
 0x85c   :  { %v2804_v54 = vpop.f32.mrb[18].mxu0  ;;  %1721 = vrot.lane.b32.xlu1 %v3921_v50, %s3072_s23 }
 0x85d   :  { %v1577_v56 = vadd.f32 %v2804_v54, %v2451_v13  ;;  %v1571_v16 = vpop.f32.mrb[19].mxu0  ;;  %1719 = vrot.lane.b32.xlu0 %v3924_v52, %s3072_s23  ;;  %3000 = vmatprep.subr.bf16.mxu1 %v2999_v35  ;;  %v1687_v62 = vrot.slane %v3924_v52, 3  ;;  %v1655_v34 = vrot.slane %v3924_v52, 5 }
 0x85e   :  { %v1572_v57 = vadd.f32 %v2451_v13, %v1571_v16  ;;  %3002 = vmatpush3.bf16.msra.mxu1 %v2999_v35 }
 0x85f   :  { %vm1603_vm11 = vcmp.ge.f32.partialorder %v1577_v56, 0.0  ;;  %v1611_v58 = vmul.f32 0.2, %v1577_v56 }
 0x860   :  { %vm1602_vm12 = vcmp.ge.f32.partialorder %v1572_v57, 0.0  ;;  %v1610_v59 = vmul.f32 0.2, %v1572_v57  ;;  %v2807_v61 = vpop.f32.mrb[20].mxu0 }
 0x861   :  { %v1619_v2 = vsel %vm1603_vm11, %v1577_v56, %v1611_v58  ;;  %v1581_v31 = vpop.f32.mrb[21].mxu0  ;;  %v1587_v20 = vadd.f32 %v2807_v61, %v2451_v13 }
 0x862   :  { %v3937_v3 = vadd.f32 %v1619_v2, %v3777_v28  ;;  %v1582_v5 = vadd.f32 %v2451_v13, %v1581_v31  ;;  %v1618_v37 = vsel %vm1602_vm12, %v1572_v57, %v1610_v59  ;;  %vm1683_vm12 = vcmp.lt.s32.totalorder %v3497_v60, 5 }
 0x863   :  { %v3940_v36 = vadd.f32 %v1618_v37, %v3781_v32  ;;  %v1613_v8 = vmul.f32 0.2, %v1587_v20  ;;  %vm1605_vm11 = vcmp.ge.f32.partialorder %v1587_v20, 0.0 }
 0x864   :  { %vm1604_vm14 = vcmp.ge.f32.partialorder %v1582_v5, 0.0  ;;  %v1612_v40 = vmul.f32 0.2, %v1582_v5  ;;  %1725 = vrot.lane.b32.xlu1 %v3937_v3, %s3072_s23  ;;  %v1690_v45 = vrot.slane %v3937_v3, 3 }
 0x865   :  { %1723 = vrot.lane.b32.xlu0 %v3940_v36, %s3072_s23  ;;  %v1621_v19 = vsel %vm1605_vm11, %v1587_v20, %v1613_v8 }
 0x866   :  { %v1620_v38 = vsel %vm1604_vm14, %v1582_v5, %v1612_v40  ;;  %v3968_v27 = vadd.f32 %v1621_v19, %v3803_v63  ;;  %v3056_v63 = vpop.permute.xlu1 %3055  ;;  %v1658_v5 = vrot.slane %v3937_v3, 5 }
 0x867   :  { %v3947_v39 = vadd.f32 %v1620_v38, %v3792_v18  ;;  %v3057_v11 = vunpack.i.l.bf16 %v3056_v63  ;;  %v3058_v23 = vunpack.i.h.bf16 %v3056_v63  ;;  %v2488_v63 = vld [vmem:[%s4267_s7 + $0x1b0] sm:$0xff] }
 0x868   :  { %v2810_v28 = vpop.f32.mrb[22].mxu0 }
 0x869   :  { %v1597_v42 = vadd.f32 %v2810_v28, %v2451_v13  ;;  %1727 = vrot.lane.b32.xlu1 %v3947_v39, %s3072_s23  ;;  %v1591_v32 = vpop.f32.mrb[23].mxu0  ;;  %v1691_v41 = vrot.slane %v3947_v39, 3  ;;  %v1659_v2 = vrot.slane %v3947_v39, 5 }
 0x86a   :  { %v1592_v47 = vadd.f32 %v2451_v13, %v1591_v32 }
 0x86b   :  { %vm1607_vm2 = vcmp.ge.f32.partialorder %v1597_v42, 0.0  ;;  %v1615_v46 = vmul.f32 0.2, %v1597_v42  ;;  %v1698_v18 = vsel %vm1042_vm13, %v1690_v45, %v1691_v41  ;;  %v1666_v20 = vsel %vm1009_vm1, %v1658_v5, %v1659_v2 }
 0x86c   :  { %v1703_v6 = vsel %vm1679_vm15, %v1698_v18, 0.0  ;;  %v1614_v17 = vmul.f32 0.2, %v1592_v47  ;;  %vm1606_vm14 = vcmp.ge.f32.partialorder %v1592_v47, 0.0  ;;  %vm1654_vm15 = vcmp.ge.s32.totalorder %v3474_v51, 27 }
 0x86d   :  { %v1623_v12 = vsel %vm1607_vm2, %v1597_v42, %v1615_v46  ;;  %1751 = vrot.lane.b32.xlu0 %v1703_v6, %s3073_s30  ;;  %v1678_v45 = vsel %vm1654_vm15, %v1666_v20, 0.0  ;;  %v2482_v6 = vld [vmem:[%s4267_s7 + $0x180] sm:$0xff] }
 0x86e   :  { %v3958_v14 = vadd.f32 %v1623_v12, %v3813_v22  ;;  %v1622_v22 = vsel %vm1606_vm14, %v1592_v47, %v1614_v17  ;;  %v2483_v12 = vld [vmem:[%s4267_s7 + $0x188] sm:$0xff]  ;;  %v2484_v17 = vld [vmem:[%s4267_s7 + $0x190] sm:$0xff] }
 0x86f   :  { %v3974_v33 = vadd.f32 %v1622_v22, %v3816_v4 }
 0x870   :  { %v1694_v44 = vrot.slane %v3958_v14, 3  ;;  %v1662_v26 = vrot.slane %v3958_v14, 5 }
 0x871   :  { %1757 = vrot.lane.b32.xlu0 %v3074_v53, %s3073_s30 }
 0x872   :  { %v1702_v24 = vsel %vm1042_vm13, %v1694_v44, %v1687_v62  ;;  %vm1650_vm13 = vcmp.ge.s32.totalorder %v3415_v10, 27  ;;  %v3003_v62 = vpack.c.bf16 %v2483_v12, %v2482_v6  ;;  %v2485_v44 = vld [vmem:[%s4267_s7 + $0x198] sm:$0xff] }
 0x873   :  { %v1707_v30 = vsel %vm1683_vm12, %v1702_v24, 0.0  ;;  %v3007_v19 = vpack.c.bf16 %v2485_v44, %v2484_v17  ;;  %v2486_v24 = vld [vmem:[%s4267_s7 + $0x1a0] sm:$0xff] }
 0x874   :  { %1759 = vrot.lane.b32.xlu1 %v1707_v30, %s3073_s30  ;;  %v2487_v30 = vld [vmem:[%s4267_s7 + $0x1a8] sm:$0xff]  ;;  %3004 = vmatprep.subr.bf16.mxu0 %v3003_v62 }
 0x875   :  { %1729 = vrot.lane.b32.xlu0 %v3968_v27, %s3072_s23  ;;  %3006 = vmatpush3.bf16.msra.mxu0 %v3003_v62  ;;  %v3011_v22 = vpack.c.bf16 %v2487_v30, %v2486_v24 }
 0x876   :  { %3008 = vmatprep.subr.bf16.mxu0 %v3007_v19 }
 0x878   :  { %1731 = vrot.lane.b32.xlu1 %v3974_v33, %s3072_s23 }
 0x879   :  { %1761 = vrot.lane.b32.xlu0 %v3074_v53, %s3073_s30  ;;  %3010 = vmatpush3.bf16.msra.mxu0 %v3007_v19 }
 0x87a   :  { %3012 = vmatprep.subr.bf16.mxu0 %v3011_v22 }
 0x87c   :  { %3060 = vrot.lane.b32.xlu1 %v3074_v53, %s3073_s30  ;;  %v1670_v53 = vsel %vm1009_vm1, %v1662_v26, %v1655_v34  ;;  %v2490_v26 = vld [vmem:[%s4267_s7 + $0x1c0] sm:$0xff]  ;;  %v2492_v34 = vld [vmem:[%s4267_s7 + $0x1d0] sm:$0xff] }
 0x87d   :  { %1733 = vrot.lane.b32.xlu0 %v3958_v14, %s3072_s23  ;;  %v1674_v54 = vsel %vm1650_vm13, %v1670_v53, 0.0  ;;  %3014 = vmatpush3.bf16.msra.mxu0 %v3011_v22 }
 0x8ce   :  { %v1722_v1 = vpop.permute.xlu1 %1721 }
 0x8cf   :  { %v1720_v13 = vpop.permute.xlu0 %1719  ;;  %v1776_v25 = vsel %vm51_vm0, 0.0, %v1722_v1 }
 0x8d0   :  { %v1775_v7 = vsel %vm51_vm0, 0.0, %v1720_v13  ;;  %v1784_v0 = vsel %vm801_vm8, %v1776_v25, %v3057_v11  ;;  %v2489_v13 = vld [vmem:[%s4267_s7 + $0x1b8] sm:$0xff]  ;;  %v2473_v11 = vld [vmem:[%s4268_s8 + $0x3] ss:$0 sm:$0xff] }
 0x8d1   :  { %v3015_v1 = vpack.c.bf16 %v2489_v13, %v2488_v63 }
 0x8d3   :  { %3016 = vmatprep.subr.bf16.mxu0 %v3015_v1 }
 0x8d4   :  { %3018 = vmatpush3.bf16.msra.mxu0 %v3015_v1 }
 0x8d6   :  { %v1726_v4 = vpop.permute.xlu1 %1725 }
 0x8d7   :  { %v1724_v29 = vpop.permute.xlu0 %1723  ;;  %v1778_v56 = vsel %vm51_vm0, %v1674_v54, %v1726_v4 }
 0x8d8   :  { %v1777_v43 = vsel %vm51_vm0, 0.0, %v1724_v29  ;;  %v2491_v29 = vld [vmem:[%s4267_s7 + $0x1c8] sm:$0xff] }
 0x8d9   :  { %v1785_v49 = vsel %vm801_vm8, %v1777_v43, %v3058_v23  ;;  %v3019_v4 = vpack.c.bf16 %v2491_v29, %v2490_v26  ;;  %v2493_v23 = vld [vmem:[%s4267_s7 + $0x1d8] sm:$0xff] }
 0x8db   :  { %v1728_v55 = vpop.permute.xlu1 %1727  ;;  %3020 = vmatprep.subr.bf16.mxu0 %v3019_v4 }
 0x8dc   :  { %v1779_v57 = vsel %vm51_vm0, 0.0, %v1728_v55  ;;  %3022 = vmatpush3.bf16.msra.mxu0 %v3019_v4 }
 0x8df   :  { %v1752_v48 = vpop.permute.xlu0 %1751 }
 0x8e0   :  { %v1783_v9 = vsel %vm801_vm8, %v1775_v7, %v1752_v48  ;;  %v3023_v7 = vpack.c.bf16 %v2493_v23, %v2492_v34 }
 0x8e1   :  { %2835 = vmatprep.mubr.msk.f32.mxu1 %vm816_vm7, %v1783_v9 }
 0x8e2   :  { %2836 = vmatmul.mubr.msk.f32.vlgmr.msra.gmra.mrb[16].mxu1 %vm816_vm7, %v1784_v0  ;;  %3024 = vmatprep.subr.bf16.mxu0 %v3023_v7 }
 0x8e3   :  { %v1758_v16 = vpop.permute.xlu0 %1757  ;;  %2838 = vmatprep.mubr.msk.f32.mxu1 %vm816_vm7, %v1785_v49  ;;  %3026 = vmatpush3.bf16.msra.mxu0 %v3023_v7 }
 0x8e4   :  { %v1786_v35 = vsel %vm801_vm8, %v1778_v56, %v1758_v16 }
 0x8e6   :  { %v1760_v58 = vpop.permute.xlu1 %1759  ;;  %2839 = vmatmul.mubr.msk.f32.gmra.mrb[18].mxu1 %vm816_vm7, %v1786_v35 }
 0x8e7   :  { %v1787_v59 = vsel %vm801_vm8, %v1779_v57, %v1760_v58  ;;  %v1730_v61 = vpop.permute.xlu0 %1729 }
 0x8e8   :  { %2841 = vmatprep.mubr.msk.f32.mxu1 %vm816_vm7, %v1787_v59  ;;  %v1780_v37 = vsel %vm51_vm0, 0.0, %v1730_v61 }
 0x8ea   :  { %v1732_v31 = vpop.permute.xlu1 %1731 }
 0x8eb   :  { %v1762_v40 = vpop.permute.xlu0 %1761  ;;  %v1781_v46 = vsel %vm51_vm0, 0.0, %v1732_v31 }
 0x8ec   :  { %v1788_v38 = vsel %vm801_vm8, %v1780_v37, %v1762_v40 }
 0x8ed   :  { %2842 = vmatmul.mubr.msk.f32.gmra.mrb[20].mxu1 %vm816_vm7, %v1788_v38 }
 0x8ee   :  { %v3061_v28 = vpop.permute.xlu1 %3060 }
 0x8ef   :  { %v3063_v42 = vunpack.i.h.bf16 %v3061_v28  ;;  %v3062_v32 = vunpack.i.l.bf16 %v3061_v28  ;;  %v1734_v41 = vpop.permute.xlu0 %1733 }
 0x8f0   :  { %v1782_v47 = vsel %vm51_vm0, %v1678_v45, %v1734_v41 }
 0x8f1   :  { %v1789_v18 = vsel %vm801_vm8, %v1781_v46, %v3062_v32  ;;  %v1790_v8 = vsel %vm801_vm8, %v1782_v47, %v3063_v42 }
 0x8f2   :  { %2844 = vmatprep.mubr.msk.f32.mxu1 %vm816_vm7, %v1789_v18 }
 0x8f3   :  { %2845 = vmatmul.mubr.msk.f32.gmra.mrb[22].mxu1 %vm816_vm7, %v1790_v8 }
 0x9b5   :  { %v2837_v25 = vpop.f32.mrb[16].mxu1 }
 0x9b6   :  { %v1893_v53 = vadd.f32 %v2837_v25, %v2473_v11  ;;  %v1887_v43 = vpop.f32.mrb[17].mxu1 }
 0x9b7   :  { %v1888_v48 = vadd.f32 %v2473_v11, %v1887_v43 }
 0x9b8   :  { %vm1927_vm1 = vcmp.ge.f32.partialorder %v1893_v53, 0.0  ;;  %v1935_v9 = vmul.f32 0.2, %v1893_v53 }
 0x9b9   :  { %vm1926_vm2 = vcmp.ge.f32.partialorder %v1888_v48, 0.0  ;;  %v1934_v0 = vmul.f32 0.2, %v1888_v48  ;;  %v2840_v54 = vpop.f32.mrb[18].mxu1 }
 0x9ba   :  { %v1943_v49 = vsel %vm1927_vm1, %v1893_v53, %v1935_v9  ;;  %v1903_v55 = vadd.f32 %v2840_v54, %v2473_v11  ;;  %v1897_v56 = vpop.f32.mrb[19].mxu1 }
 0x9bb   :  { %v4058_v16 = vadd.f32 %v1943_v49, %v3921_v50  ;;  %v1942_v35 = vsel %vm1926_vm2, %v1888_v48, %v1934_v0  ;;  %v1898_v57 = vadd.f32 %v2473_v11, %v1897_v56 }
 0x9bc   :  { %v4061_v58 = vadd.f32 %v1942_v35, %v3924_v52  ;;  %vm1929_vm11 = vcmp.ge.f32.partialorder %v1903_v55, 0.0  ;;  %v1937_v59 = vmul.f32 0.2, %v1903_v55 }
 0x9bd   :  { %vm1928_vm12 = vcmp.ge.f32.partialorder %v1898_v57, 0.0  ;;  %v1936_v61 = vmul.f32 0.2, %v1898_v57  ;;  %2031 = vrot.lane.b32.xlu1 %v4058_v16, %s3072_s23  ;;  %v1998_v2 = vrot.slane %v4058_v16, 1  ;;  %v1974_v48 = vrot.slane %v4058_v16, 7 }
 0x9be   :  { %v1945_v31 = vsel %vm1929_vm11, %v1903_v55, %v1937_v59  ;;  %2029 = vrot.lane.b32.xlu0 %v4061_v58, %s3072_s23  ;;  %v1997_v50 = vrot.slane %v4061_v58, 1  ;;  %v1973_v25 = vrot.slane %v4061_v58, 7 }
 0x9bf   :  { %v4070_v5 = vadd.f32 %v1945_v31, %v3937_v3  ;;  %v1944_v52 = vsel %vm1928_vm12, %v1898_v57, %v1936_v61 }
 0x9c0   :  { %v4073_v37 = vadd.f32 %v1944_v52, %v3940_v36  ;;  %v2843_v40 = vpop.f32.mrb[20].mxu1  ;;  %v2011_v38 = vsel %vm712_vm3, %v1997_v50, %v1998_v2  ;;  %v1987_v55 = vsel %vm679_vm4, %v1973_v25, %v1974_v48 }
 0x9c1   :  { %v1913_v20 = vadd.f32 %v2843_v40, %v2473_v11  ;;  %v1907_v28 = vpop.f32.mrb[21].mxu1  ;;  %2035 = vrot.lane.b32.xlu1 %v4070_v5, %s3072_s23  ;;  %v2000_v41 = vrot.slane %v4070_v5, 1  ;;  %v1976_v61 = vrot.slane %v4070_v5, 7 }
 0x9c2   :  { %v1908_v42 = vadd.f32 %v2473_v11, %v1907_v28  ;;  %2061 = vrot.lane.b32.xlu0 %v2011_v38, %s3073_s30  ;;  %v1999_v32 = vrot.slane %v4073_v37, 1  ;;  %v1975_v35 = vrot.slane %v4073_v37, 7 }
 0x9c3   :  { %vm1931_vm14 = vcmp.ge.f32.partialorder %v1913_v20, 0.0  ;;  %v1939_v3 = vmul.f32 0.2, %v1913_v20 }
 0x9c4   :  { %vm1930_vm13 = vcmp.ge.f32.partialorder %v1908_v42, 0.0  ;;  %v1938_v45 = vmul.f32 0.2, %v1908_v42  ;;  %v2010_v36 = vsel %vm712_vm3, %v1998_v2, %v1999_v32  ;;  %v2009_v44 = vsel %vm712_vm3, %v1999_v32, %v2000_v41 }
 0x9c5   :  { %2063 = vrot.lane.b32.xlu1 %v2010_v36, %s3073_s30  ;;  %v1947_v46 = vsel %vm1931_vm14, %v1913_v20, %v1939_v3  ;;  %v1986_v2 = vsel %vm679_vm4, %v1974_v48, %v1975_v35  ;;  %v1985_v38 = vsel %vm679_vm4, %v1975_v35, %v1976_v61 }
 0x9c6   :  { %v1946_v47 = vsel %vm1930_vm13, %v1908_v42, %v1938_v45  ;;  %2033 = vrot.lane.b32.xlu0 %v4073_v37, %s3072_s23  ;;  %v2846_v18 = vpop.f32.mrb[22].mxu1  ;;  %v4091_v62 = vadd.f32 %v1947_v46, %v3968_v27 }
 0x9c7   :  { %v4088_v8 = vadd.f32 %v1946_v47, %v3947_v39  ;;  %v1923_v6 = vadd.f32 %v2846_v18, %v2473_v11  ;;  %v1917_v12 = vpop.f32.mrb[23].mxu1 }
 0x9c8   :  { %v1918_v17 = vadd.f32 %v2473_v11, %v1917_v12  ;;  %v2002_v27 = vrot.slane %v4091_v62, 1  ;;  %v1978_v18 = vrot.slane %v4091_v62, 7 }
 0x9c9   :  { %v2001_v19 = vrot.slane %v4088_v8, 1  ;;  %v1941_v24 = vmul.f32 0.2, %v1923_v6  ;;  %vm1933_vm1 = vcmp.ge.f32.partialorder %v1923_v6, 0.0  ;;  %v1977_v52 = vrot.slane %v4088_v8, 7 }
 0x9ca   :  { %vm1932_vm15 = vcmp.ge.f32.partialorder %v1918_v17, 0.0  ;;  %v1940_v30 = vmul.f32 0.2, %v1918_v17  ;;  %2065 = vrot.lane.b32.xlu0 %v2009_v44, %s3073_s30 }
 0x9cb   :  { %v2008_v39 = vsel %vm712_vm3, %v2000_v41, %v2001_v19  ;;  %v1949_v13 = vsel %vm1933_vm1, %v1923_v6, %v1941_v24  ;;  %v2007_v10 = vsel %vm712_vm3, %v2001_v19, %v2002_v27  ;;  %v1984_v32 = vsel %vm679_vm4, %v1976_v61, %v1977_v52 }
 0x9cc   :  { %v2016_v22 = vsel %vm699_vm5, %v2008_v39, 0.0  ;;  %v1948_v63 = vsel %vm1932_vm15, %v1918_v17, %v1940_v30  ;;  %v4109_v26 = vadd.f32 %v1949_v13, %v3958_v14  ;;  %v1993_v45 = vsel %vm667_vm10, %v1984_v32, 0.0 }
 0x9cd   :  { %2067 = vrot.lane.b32.xlu1 %v2016_v22, %s3073_s30  ;;  %v4106_v1 = vadd.f32 %v1948_v63, %v3974_v33  ;;  %v1983_v44 = vsel %vm679_vm4, %v1977_v52, %v1978_v18 }
 0x9ce   :  { %2037 = vrot.lane.b32.xlu0 %v4088_v8, %s3072_s23  ;;  %v2004_v4 = vrot.slane %v4109_v26, 1  ;;  %v1980_v23 = vrot.slane %v4109_v26, 7 }
 0x9cf   :  { %v2003_v29 = vrot.slane %v4106_v1, 1  ;;  %v1979_v12 = vrot.slane %v4106_v1, 7 }
 0x9d0   :  { %v2012_v11 = vsel %vm712_vm3, %v2004_v4, %v1997_v50  ;;  %v1988_v43 = vsel %vm679_vm4, %v1980_v23, %v1973_v25 }
 0x9d1   :  { %2039 = vrot.lane.b32.xlu1 %v4091_v62, %s3072_s23  ;;  %v2006_v14 = vsel %vm712_vm3, %v2002_v27, %v2003_v29  ;;  %v2005_v33 = vsel %vm712_vm3, %v2003_v29, %v2004_v4  ;;  %v2020_v34 = vsel %vm703_vm9, %v2012_v11, 0.0  ;;  %v1989_v9 = vsel %vm663_vm6, %v1988_v43, 0.0  ;;  %v2495_v4 = vld [vmem:[%s4268_s8 + $0x4] ss:$0 sm:$0xff] }
 0x9d2   :  { %2069 = vrot.lane.b32.xlu0 %v2007_v10, %s3073_s30  ;;  %v1982_v19 = vsel %vm679_vm4, %v1978_v18, %v1979_v12  ;;  %v1981_v27 = vsel %vm679_vm4, %v1979_v12, %v1980_v23 }
 0x9d5   :  { %2043 = vrot.lane.b32.xlu1 %v4109_v26, %s3072_s23 }
 0x9d6   :  { %2041 = vrot.lane.b32.xlu0 %v4106_v1, %s3072_s23 }
 0x9d9   :  { %2071 = vrot.lane.b32.xlu1 %v2006_v14, %s3073_s30 }
 0x9da   :  { %2073 = vrot.lane.b32.xlu0 %v2005_v33, %s3073_s30 }
 0x9dd   :  { %2075 = vrot.lane.b32.xlu1 %v2020_v34, %s3073_s30 }
 0xa2f   :  { %v2032_v7 = vpop.permute.xlu1 %2031 }
 0xa30   :  { %v2030_v53 = vpop.permute.xlu0 %2029  ;;  %v2086_v56 = vsel %vm51_vm0, %v1987_v55, %v2032_v7 }
 0xa31   :  { %v2085_v51 = vsel %vm51_vm0, %v1989_v9, %v2030_v53 }
 0xa33   :  { %v2036_v0 = vpop.permute.xlu1 %2035 }
 0xa34   :  { %v2062_v54 = vpop.permute.xlu0 %2061  ;;  %v2088_v20 = vsel %vm51_vm0, %v1985_v38, %v2036_v0 }
 0xa35   :  { %v2093_v49 = vsel %vm801_vm8, %v2085_v51, %v2062_v54 }
 0xa36   :  { %2871 = vmatprep.mubr.msk.f32.mxu0 %vm816_vm7, %v2093_v49 }
 0xa37   :  { %v2064_v57 = vpop.permute.xlu1 %2063 }
 0xa38   :  { %v2094_v59 = vsel %vm801_vm8, %v2086_v56, %v2064_v57  ;;  %v2034_v15 = vpop.permute.xlu0 %2033 }
 0xa39   :  { %2872 = vmatmul.mubr.msk.f32.vlgmr.msra.gmra.mrb[24].mxu0 %vm816_vm7, %v2094_v59  ;;  %v2087_v31 = vsel %vm51_vm0, %v1986_v2, %v2034_v15 }
 0xa3c   :  { %v2066_v50 = vpop.permute.xlu0 %2065 }
 0xa3d   :  { %v2095_v40 = vsel %vm801_vm8, %v2087_v31, %v2066_v50 }
 0xa3e   :  { %2874 = vmatprep.mubr.msk.f32.mxu0 %vm816_vm7, %v2095_v40 }
 0xa3f   :  { %v2068_v28 = vpop.permute.xlu1 %2067 }
 0xa40   :  { %v2096_v42 = vsel %vm801_vm8, %v2088_v20, %v2068_v28  ;;  %v2038_v3 = vpop.permute.xlu0 %2037 }
 0xa41   :  { %2875 = vmatmul.mubr.msk.f32.gmra.mrb[26].mxu0 %vm816_vm7, %v2096_v42  ;;  %v2089_v41 = vsel %vm51_vm0, %v1993_v45, %v2038_v3 }
 0xa43   :  { %v2040_v36 = vpop.permute.xlu1 %2039 }
 0xa44   :  { %v2070_v46 = vpop.permute.xlu0 %2069  ;;  %v2090_v60 = vsel %vm51_vm0, %v1983_v44, %v2040_v36 }
 0xa45   :  { %v2097_v47 = vsel %vm801_vm8, %v2089_v41, %v2070_v46 }
 0xa46   :  { %2877 = vmatprep.mubr.msk.f32.mxu0 %vm816_vm7, %v2097_v47 }
 0xa47   :  { %v2044_v6 = vpop.permute.xlu1 %2043 }
 0xa48   :  { %v2042_v17 = vpop.permute.xlu0 %2041  ;;  %v2092_v13 = vsel %vm51_vm0, %v1981_v27, %v2044_v6 }
 0xa49   :  { %v2091_v30 = vsel %vm51_vm0, %v1982_v19, %v2042_v17 }
 0xa4b   :  { %v2072_v24 = vpop.permute.xlu1 %2071 }
 0xa4c   :  { %v2098_v39 = vsel %vm801_vm8, %v2090_v60, %v2072_v24  ;;  %v2074_v22 = vpop.permute.xlu0 %2073 }
 0xa4d   :  { %v2099_v63 = vsel %vm801_vm8, %v2091_v30, %v2074_v22  ;;  %2878 = vmatmul.mubr.msk.f32.gmra.mrb[28].mxu0 %vm816_vm7, %v2098_v39 }
 0xa4e   :  { %2880 = vmatprep.mubr.msk.f32.mxu0 %vm816_vm7, %v2099_v63 }
 0xa4f   :  { %v2076_v10 = vpop.permute.xlu1 %2075 }
 0xa50   :  { %v2100_v29 = vsel %vm801_vm8, %v2092_v13, %v2076_v10 }
 0xa51   :  { %2881 = vmatmul.mubr.msk.f32.gmra.mrb[30].mxu0 %vm816_vm7, %v2100_v29 }
 0xb0c   :  { %v2873_v14 = vpop.f32.mrb[24].mxu0 }
 0xb0d   :  { %v2203_v33 = vadd.f32 %v2873_v14, %v2495_v4  ;;  %v2197_v11 = vpop.f32.mrb[25].mxu0 }
 0xb0e   :  { %v2198_v34 = vadd.f32 %v2495_v4, %v2197_v11 }
 0xb0f   :  { %vm2237_vm3 = vcmp.ge.f32.partialorder %v2203_v33, 0.0  ;;  %v2245_v21 = vmul.f32 0.2, %v2203_v33 }
 0xb10   :  { %vm2236_vm4 = vcmp.ge.f32.partialorder %v2198_v34, 0.0  ;;  %v2244_v23 = vmul.f32 0.2, %v2198_v34 }
 0xb11   :  { %v2253_v25 = vsel %vm2237_vm3, %v2203_v33, %v2245_v21 }
 0xb12   :  { %v2252_v7 = vsel %vm2236_vm4, %v2198_v34, %v2244_v23  ;;  %v4189_v43 = vadd.f32 %v2253_v25, %v4058_v16 }
 0xb13   :  { %v4192_v48 = vadd.f32 %v2252_v7, %v4061_v58 }
 0xb14   :  { %v2876_v53 = vpop.f32.mrb[26].mxu0  ;;  %v2269_v35 = vsel %vm51_vm0, %v4189_v43, 0.0 }
 0xb15   :  { %v2213_v9 = vadd.f32 %v2876_v53, %v2495_v4  ;;  %v2207_v0 = vpop.f32.mrb[27].mxu0  ;;  %v2268_v56 = vsel %vm51_vm0, %v4192_v48, 0.0 }
 0xb16   :  { %v2208_v51 = vadd.f32 %v2495_v4, %v2207_v0  ;;  %v2270_v59 = vadd.f32 %v2269_v35, %v2268_v56 }
 0xb17   :  { %vm2239_vm5 = vcmp.ge.f32.partialorder %v2213_v9, 0.0  ;;  %v2247_v54 = vmul.f32 0.2, %v2213_v9 }
 0xb18   :  { %vm2238_vm6 = vcmp.ge.f32.partialorder %v2208_v51, 0.0  ;;  %v2246_v49 = vmul.f32 0.2, %v2208_v51 }
 0xb19   :  { %v2255_v55 = vsel %vm2239_vm5, %v2213_v9, %v2247_v54 }
 0xb1a   :  { %v2254_v57 = vsel %vm2238_vm6, %v2208_v51, %v2246_v49  ;;  %v2263_v58 = vadd.f32 %v2255_v55, %v4070_v5 }
 0xb1b   :  { %v2262_v16 = vadd.f32 %v2254_v57, %v4073_v37 }
 0xb1c   :  { %v2273_v2 = vsel %vm51_vm0, %v2263_v58, 0.0 }
 0xb1d   :  { %v2271_v15 = vsel %vm51_vm0, %v2262_v16, 0.0 }
 0xb1e   :  { %v2272_v61 = vadd.f32 %v2271_v15, %v2270_v59 }
 0xb20   :  { %v2879_v31 = vpop.f32.mrb[28].mxu0  ;;  %v2274_v50 = vadd.f32 %v2273_v2, %v2272_v61 }
 0xb21   :  { %v2223_v52 = vadd.f32 %v2879_v31, %v2495_v4  ;;  %v2217_v40 = vpop.f32.mrb[29].mxu0 }
 0xb22   :  { %v2218_v38 = vadd.f32 %v2495_v4, %v2217_v40  ;;  %2275 = vadd.xlane.f32.xlu0 %v2274_v50 }
 0xb23   :  { %vm2241_vm7 = vcmp.ge.f32.partialorder %v2223_v52, 0.0  ;;  %v2249_v20 = vmul.f32 0.2, %v2223_v52 }
 0xb24   :  { %vm2240_vm8 = vcmp.ge.f32.partialorder %v2218_v38, 0.0  ;;  %v2248_v28 = vmul.f32 0.2, %v2218_v38  ;;  %v2882_v42 = vpop.f32.mrb[30].mxu0 }
 0xb25   :  { %v2257_v37 = vsel %vm2241_vm7, %v2223_v52, %v2249_v20  ;;  %v2233_v32 = vadd.f32 %v2882_v42, %v2495_v4  ;;  %v2227_v5 = vpop.f32.mrb[31].mxu0 }
 0xb26   :  { %v4203_v3 = vadd.f32 %v2257_v37, %v4091_v62  ;;  %v2256_v45 = vsel %vm2240_vm8, %v2218_v38, %v2248_v28  ;;  %v2228_v36 = vadd.f32 %v2495_v4, %v2227_v5 }
 0xb27   :  { %v4206_v41 = vadd.f32 %v2256_v45, %v4088_v8  ;;  %vm2243_vm9 = vcmp.ge.f32.partialorder %v2233_v32, 0.0  ;;  %v2251_v46 = vmul.f32 0.2, %v2233_v32 }
 0xb28   :  { %vm2242_vm10 = vcmp.ge.f32.partialorder %v2228_v36, 0.0  ;;  %v2250_v47 = vmul.f32 0.2, %v2228_v36  ;;  %v2319_v12 = vsel %vm51_vm0, %v4203_v3, 0.0 }
 0xb29   :  { %v2259_v18 = vsel %vm2243_vm9, %v2233_v32, %v2251_v46  ;;  %v2318_v6 = vsel %vm51_vm0, %v4206_v41, 0.0 }
 0xb2a   :  { %v2258_v17 = vsel %vm2242_vm10, %v2228_v36, %v2250_v47  ;;  %v2267_v44 = vadd.f32 %v2259_v18, %v4109_v26  ;;  %v2320_v60 = vadd.f32 %v2319_v12, %v2318_v6 }
 0xb2b   :  { %v2266_v62 = vadd.f32 %v2258_v17, %v4106_v1 }
 0xb2c   :  { %v2323_v24 = vsel %vm51_vm0, %v2267_v44, 0.0 }
 0xb2d   :  { %v2321_v8 = vsel %vm51_vm0, %v2266_v62, 0.0 }
 0xb2e   :  { %v2322_v19 = vadd.f32 %v2321_v8, %v2320_v60 }
 0xb30   :  { %v2324_v30 = vadd.f32 %v2323_v24, %v2322_v19 }
 0xb32   :  { %2325 = vadd.xlane.f32.xlu0 %v2324_v30 }
 0xbaf   :  { %v2276_v39 = vpop.xlane.xlu0 %2275 }
 0xbb0   :  { %v2277_v22 = vrot.slane %v2276_v39, 4 }
 0xbb2   :  { %v2278_v63 = vadd.f32 %v2277_v22, %v2276_v39 }
 0xbb4   :  { %v2279_v27 = vrot.slane %v2278_v63, 2 }
 0xbb6   :  { %v2280_v13 = vadd.f32 %v2279_v27, %v2278_v63 }
 0xbb8   :  { %v2281_v10 = vrot.slane %v2280_v13, 1 }
 0xbba   :  { %v2282_v29 = vadd.f32 %v2281_v10, %v2280_v13 }
 0xbbc   :  { %3043 = vpush %v2282_v29 }
 0xbed   :  { %s3044_s8 = spop %3043 }
 0xbee   :  { %v2284_v1 = vstv %s3044_s8 }
 0xbef   :  { %v2285_v4 = vmul.f32 0.0009765625, %v2284_v1 }
 0xbf1   :  { %v2286_v26 = vsub.f32 %v4192_v48, %v2285_v4  ;;  %v2287_v14 = vsub.f32 %v4189_v43, %v2285_v4  ;;  %v2288_v33 = vsub.f32 %v2262_v16, %v2285_v4  ;;  %v2289_v11 = vsub.f32 %v2263_v58, %v2285_v4  ;;  %v2326_v48 = vpop.xlane.xlu0 %2325 }
 0xbf2   :  { %v2327_v43 = vrot.slane %v2326_v48, 4 }
 0xbf3   :  { %v2290_v34 = vmul.f32 %v2286_v26, %v2286_v26  ;;  %v2291_v21 = vmul.f32 %v2287_v14, %v2287_v14  ;;  %v2292_v23 = vmul.f32 %v2288_v33, %v2288_v33  ;;  %v2293_v25 = vmul.f32 %v2289_v11, %v2289_v11 }
 0xbf4   :  { %v2328_v55 = vadd.f32 %v2327_v43, %v2326_v48 }
 0xbf5   :  { %v2294_v7 = vsel %vm51_vm0, %v2290_v34, 0.0  ;;  %v2295_v53 = vsel %vm51_vm0, %v2291_v21, 0.0  ;;  %v2297_v0 = vsel %vm51_vm0, %v2292_v23, 0.0  ;;  %v2299_v54 = vsel %vm51_vm0, %v2293_v25, 0.0 }
 0xbf6   :  { %v2296_v9 = vadd.f32 %v2295_v53, %v2294_v7  ;;  %v2329_v56 = vrot.slane %v2328_v55, 2 }
 0xbf8   :  { %v2298_v51 = vadd.f32 %v2297_v0, %v2296_v9  ;;  %v2330_v58 = vadd.f32 %v2329_v56, %v2328_v55 }
 0xbfa   :  { %v2300_v49 = vadd.f32 %v2299_v54, %v2298_v51  ;;  %v2331_v61 = vrot.slane %v2330_v58, 1 }
 0xbfc   :  { %2301 = vadd.xlane.f32.xlu1 %v2300_v49  ;;  %v2332_v50 = vadd.f32 %v2331_v61, %v2330_v58 }
 0xc89   :  { %v2302_v35 = vpop.xlane.xlu1 %2301 }
 0xc8a   :  { %v2303_v57 = vrot.slane %v2302_v35, 4 }
 0xc8c   :  { %v2304_v16 = vadd.f32 %v2303_v57, %v2302_v35 }
 0xc8e   :  { %v2305_v59 = vrot.slane %v2304_v16, 2 }
 0xc90   :  { %v2306_v15 = vadd.f32 %v2305_v59, %v2304_v16 }
 0xc92   :  { %v2307_v2 = vrot.slane %v2306_v15, 1 }
 0xc94   :  { %v2308_v31 = vadd.f32 %v2307_v2, %v2306_v15 }
 0xc96   :  { %3045 = vpush %v2308_v31 }
 0xc97   :  { %3047 = vpush %v2332_v50 }
 0xcc7   :  { %s3046_s30 = spop %3045 }
 0xcc8   :  { %v2310_v52 = vstv %s3046_s30  ;;  %s3048_s22 = spop %3047 }
 0xcc9   :  { %v2311_v40 = vmul.f32 0.0009765625, %v2310_v52  ;;  %v2334_v38 = vstv %s3048_s22 }
 0xcca   :  { %v2335_v20 = vmul.f32 0.0009765625, %v2334_v38 }
 0xccb   :  { %v2312_v28 = vadd.f32 1e-08, %v2311_v40 }
 0xccc   :  { %v2336_v42 = vsub.f32 %v4206_v41, %v2335_v20  ;;  %v2337_v37 = vsub.f32 %v4203_v3, %v2335_v20  ;;  %v2338_v32 = vsub.f32 %v2266_v62, %v2335_v20  ;;  %v2339_v5 = vsub.f32 %v2267_v44, %v2335_v20 }
 0xccd   :  { %3068 = vrsqrt.f32 %v2312_v28 }
 0xcce   :  { %v2340_v45 = vmul.f32 %v2336_v42, %v2336_v42  ;;  %v2341_v36 = vmul.f32 %v2337_v37, %v2337_v37  ;;  %v2342_v46 = vmul.f32 %v2338_v32, %v2338_v32  ;;  %v2343_v47 = vmul.f32 %v2339_v5, %v2339_v5 }
 0xcd0   :  { %v2344_v18 = vsel %vm51_vm0, %v2340_v45, 0.0  ;;  %v2345_v6 = vsel %vm51_vm0, %v2341_v36, 0.0  ;;  %v2347_v17 = vsel %vm51_vm0, %v2342_v46, 0.0  ;;  %v2349_v8 = vsel %vm51_vm0, %v2343_v47, 0.0 }
 0xcd1   :  { %v2346_v12 = vadd.f32 %v2345_v6, %v2344_v18 }
 0xcd3   :  { %v2348_v60 = vadd.f32 %v2347_v17, %v2346_v12 }
 0xcd5   :  { %v2350_v41 = vadd.f32 %v2349_v8, %v2348_v60 }
 0xcd7   :  { %v3069_v19 = vpop.eup %3068  ;;  %2351 = vadd.xlane.f32.xlu0 %v2350_v41 }
 0xcd8   :  { %v2314_v3 = vmul.f32 %v3069_v19, %v2286_v26  ;;  %v2315_v62 = vmul.f32 %v3069_v19, %v2287_v14  ;;  %v2316_v44 = vmul.f32 %v3069_v19, %v2288_v33  ;;  %v2317_v24 = vmul.f32 %v3069_v19, %v2289_v11 }
 0xcda   :  { %2368 = vst.msk [vmem:[%s4269_s9] sm:$0xff] %vm51_vm0, %v2314_v3  ;;  %2369 = vst.msk [vmem:[%s4269_s9 + $0x8] sm:$0xff] %vm51_vm0, %v2315_v62 }
 0xcdb   :  { %2370 = vst.msk [vmem:[%s4269_s9 + $0x10] sm:$0xff] %vm51_vm0, %v2316_v44  ;;  %2371 = vst.msk [vmem:[%s4269_s9 + $0x18] sm:$0xff] %vm51_vm0, %v2317_v24 }
 0xd64   :  { %v2352_v30 = vpop.xlane.xlu0 %2351 }
 0xd65   :  { %v2353_v39 = vrot.slane %v2352_v30, 4 }
 0xd67   :  { %v2354_v22 = vadd.f32 %v2353_v39, %v2352_v30 }
 0xd69   :  { %v2355_v63 = vrot.slane %v2354_v22, 2 }
 0xd6b   :  { %v2356_v27 = vadd.f32 %v2355_v63, %v2354_v22 }
 0xd6d   :  { %v2357_v13 = vrot.slane %v2356_v27, 1 }
 0xd6f   :  { %v2358_v10 = vadd.f32 %v2357_v13, %v2356_v27 }
 0xd71   :  { %3049 = vpush %v2358_v10 }
 0xda2   :  { %s3050_s29 = spop %3049 }
 0xda3   :  { %v2360_v29 = vstv %s3050_s29 }
 0xda4   :  { %v2361_v1 = vmul.f32 0.0009765625, %v2360_v29 }
 0xda6   :  { %v2362_v4 = vadd.f32 1e-08, %v2361_v1 }
 0xda8   :  { %3070 = vrsqrt.f32 %v2362_v4 }
 0xdb2   :  { %v3071_v26 = vpop.eup %3070 }
 0xdb3   :  { %v2364_v14 = vmul.f32 %v3071_v26, %v2336_v42  ;;  %v2365_v33 = vmul.f32 %v3071_v26, %v2337_v37  ;;  %v2366_v11 = vmul.f32 %v3071_v26, %v2338_v32  ;;  %v2367_v34 = vmul.f32 %v3071_v26, %v2339_v5 }
 0xdb5   :  { %2372 = vst.msk [vmem:[%s4269_s9 + $0x20] sm:$0xff] %vm51_vm0, %v2364_v14  ;;  %2373 = vst.msk [vmem:[%s4269_s9 + $0x28] sm:$0xff] %vm51_vm0, %v2365_v33 }
 0xdb6   :  { %2374 = vst.msk [vmem:[%s4269_s9 + $0x30] sm:$0xff] %vm51_vm0, %v2366_v11  ;;  %2375 = vst.msk [vmem:[%s4269_s9 + $0x38] sm:$0xff] %vm51_vm0, %v2367_v34 }

// kernel: model_forward.5
= control target key start
LH: loop header
LB: loop body
LE: loop exit
PB: predicated region body
PF: predicated region fallthrough
CT: control target
= control target key end

     0   :  { %s1560_s21 = smov 0   ;;  %s1562_s22 = smov 0   ;;  %s1856_s0 = inlined_call_operand.vmem [shape: f32[8,32], index: 0, kind: input, shape index: {}]   ;;  %s1857_s1 = inlined_call_operand.vmem [shape: f32[32,160], index: 1, kind: input, shape index: {}]   ;;  %s1858_s2 = inlined_call_operand.vmem [shape: f32[1,160], index: 2, kind: input, shape index: {}]   ;;  %s1859_s3 = inlined_call_operand.vmem [shape: f32[128,128], index: 3, kind: input, shape index: {}]   ;;  %s1860_s4 = inlined_call_operand.vmem [shape: f32[1,128], index: 4, kind: input, shape index: {}]   ;;  %s1861_s5 = inlined_call_operand.vmem [shape: f32[32,192], index: 5, kind: input, shape index: {}]   ;;  %s1862_s6 = inlined_call_operand.vmem [shape: f32[1,192], index: 6, kind: input, shape index: {}]   ;;  %s1863_s7 = inlined_call_operand.vmem [shape: f32[128,16], index: 7, kind: input, shape index: {}]   ;;  %s1864_s8 = inlined_call_operand.vmem [shape: f32[16,128], index: 8, kind: input, shape index: {}]   ;;  %s1865_s9 = inlined_call_operand.vmem [shape: bf16[128,1024], index: 9, kind: input, shape index: {}]   ;;  %s1866_s10 = inlined_call_operand.vmem [shape: f32[8,160], index: 10, kind: output, shape index: {0}]   ;;  %s1867_s11 = inlined_call_operand.vmem [shape: f32[8,192], index: 11, kind: output, shape index: {1}]   ;;  %s1868_s12 = inlined_call_operand.vmem [shape: f32[8,1024], index: 12, kind: output, shape index: {2}]  }
   0x1   :  { %s1564_s23 = smov 0  }
   0x2 LB: > { %s1190_s24 = sadd.s32 4294967295, %s1489_s23   ;;  %s1577_s25 = sadd.s32 1, %s1489_s23   ;;  %s1489_s23 = sphi %s1564_s23, %s1871_s23   ;;  %s1485_s22 = sphi %s1562_s22, %s1870_s22   ;;  %s1481_s21 = sphi %s1560_s21, %s1869_s21  }
   0x3   : > { %s216_s26 = ssub.s32 %s1489_s23, %s1577_s25  ;;  %s219_s27 = sadd.s32 1, %s1485_s22 }
   0x4   : > { %p217_p0 = scmp.eq.s32.totalorder %s216_s26, 0  ;;  %p226_p1 = scmp.ne.s32.totalorder %s1485_s22, %s1481_s21 }
   0x5   : > { %p227_p2 = scmp.eq.s32.totalorder %s1489_s23, 0  ;;  %p1193_p4 = scmp.ge.s32.totalorder %s1489_s23, 4 }
   0x6   : > { %s1586_s28 = scalar_select %p217_p0, %s1485_s22, %s219_s27  }
   0x7   : > { %p228_p3 = por %p227_p2, %p226_p1  ;;  %347 = sbr.rel (%p1193_p4) target bundleno = 34 (0x22), region = 52 }
   0xe   : > { %350 = sbr.rel (!%p228_p3) target bundleno = 34 (0x22), region = 56  ;;  %s352_s29 = sand.u32 (%p228_p3), 1, %s1485_s22  }
   0xf   : > { %s1225_s30 = sshll.u32 (%p228_p3), %s1489_s23, 3  ;;  %s1194_s13 = sshll.u32 (%p228_p3), %s352_s29, 7 }
  0x10   : > { %s1594_s16 = scalar_lea.vmem (%p228_p3), %s1865_s9, %s1225_s30  ;;  %s354_s17 = scalar_lea.vmem (%p228_p3), [#allocation3], %s1194_s13 }
  0x11   : > { %v415_v0 = vld [vmem:[%s1594_s16] sm:$0xff] (%p228_p3) }
  0x12   : > { %v417_v1 = vld [vmem:[%s1594_s16 + $0x20] sm:$0xff] (%p228_p3)  ;;  %416 = vst [vmem:[%s354_s17] sm:$0xff] (%p228_p3), %v415_v0 }
  0x13   : > { %v419_v2 = vld [vmem:[%s1594_s16 + $0x40] sm:$0xff] (%p228_p3)  ;;  %418 = vst [vmem:[%s354_s17 + $0x8] sm:$0xff] (%p228_p3), %v417_v1 }
  0x14   : > { %420 = vst [vmem:[%s354_s17 + $0x10] sm:$0xff] (%p228_p3), %v419_v2  ;;  %v421_v3 = vld [vmem:[%s1594_s16 + $0x60] sm:$0xff] (%p228_p3) }
  0x15   : > { %v423_v4 = vld [vmem:[%s1594_s16 + $0x80] sm:$0xff]  ;;  %422 = vst [vmem:[%s354_s17 + $0x18] sm:$0xff] %v421_v3 }
  0x16   : > { %v425_v5 = vld [vmem:[%s1594_s16 + $0xa0] sm:$0xff]  ;;  %424 = vst [vmem:[%s354_s17 + $0x20] sm:$0xff] %v423_v4 }
  0x17   : > { %426 = vst [vmem:[%s354_s17 + $0x28] sm:$0xff] %v425_v5  ;;  %v427_v6 = vld [vmem:[%s1594_s16 + $0xc0] sm:$0xff] }
  0x18   : > { %v429_v7 = vld [vmem:[%s1594_s16 + $0xe0] sm:$0xff]  ;;  %428 = vst [vmem:[%s354_s17 + $0x30] sm:$0xff] %v427_v6 }
  0x19   : > { %v431_v8 = vld [vmem:[%s1594_s16 + $0x100] sm:$0xff]  ;;  %430 = vst [vmem:[%s354_s17 + $0x38] sm:$0xff] %v429_v7 }
  0x1a   : > { %432 = vst [vmem:[%s354_s17 + $0x40] sm:$0xff] %v431_v8  ;;  %v433_v9 = vld [vmem:[%s1594_s16 + $0x120] sm:$0xff] }
  0x1b   : > { %v435_v10 = vld [vmem:[%s1594_s16 + $0x140] sm:$0xff]  ;;  %434 = vst [vmem:[%s354_s17 + $0x48] sm:$0xff] %v433_v9 }
  0x1c   : > { %v437_v11 = vld [vmem:[%s1594_s16 + $0x160] sm:$0xff]  ;;  %436 = vst [vmem:[%s354_s17 + $0x50] sm:$0xff] %v435_v10 }
  0x1d   : > { %438 = vst [vmem:[%s354_s17 + $0x58] sm:$0xff] %v437_v11  ;;  %v439_v12 = vld [vmem:[%s1594_s16 + $0x180] sm:$0xff] }
  0x1e   : > { %v441_v13 = vld [vmem:[%s1594_s16 + $0x1a0] sm:$0xff]  ;;  %440 = vst [vmem:[%s354_s17 + $0x60] sm:$0xff] %v439_v12 }
  0x1f   : > { %v443_v14 = vld [vmem:[%s1594_s16 + $0x1c0] sm:$0xff]  ;;  %442 = vst [vmem:[%s354_s17 + $0x68] sm:$0xff] %v441_v13 }
  0x20   : > { %444 = vst [vmem:[%s354_s17 + $0x70] sm:$0xff] %v443_v14  ;;  %v445_v15 = vld [vmem:[%s1594_s16 + $0x1e0] sm:$0xff] }
  0x21   : > { %446 = vst [vmem:[%s354_s17 + $0x78] sm:$0xff] %v445_v15 }
  0x22 PF: > { %p1197_p5 = scmp.ge.s32.totalorder %s1489_s23, 1  ;;  %p451_p6 = scmp.lt.s32.totalorder %s1489_s23, 5 }
  0x24   : > { %p452_p7 = pnand %p1197_p5, %p451_p6 }
  0x25   : > { %s458_s18 = sand.u32 (!%p452_p7), 1, %s1481_s21   ;;  %s1199_s19 = sshll.u32 (!%p452_p7), %s1190_s24, 1 }
  0x26   : > { %455 = sbr.rel (%p452_p7) target bundleno = 1331 (0x533), region = 94  ;;  %s1198_s20 = sshll.u32 (!%p452_p7), %s458_s18, 7 }
  0x27   : > { %p501_p8 = scmp.lt.s32.totalorder (!%p452_p7), %s1199_s19, 7  ;;  %s1622_s13 = scalar_lea.vmem (!%p452_p7), [#allocation3], %s1198_s20 }
  0x28   : > { %p1201_p9 = scmp.ne.s32.totalorder (!%p452_p7), %s1190_s24, 0 }
  0x2d   : > { %s1873_s19 = smov (!%p501_p8, %s1199_s19), 7  ;;  %510 = sbr.rel (%p1201_p9) target bundleno = 1083 (0x43b), region = 102 }
  0x2e   : > { %s1200_s26 = sshll.u32 %s1873_s19, 3  ;;  %v513_v16 = vld [vmem:[%s1857_s1 + $0x8] sm:$0xff] (!%p1201_p9)  ;;  %v515_v17 = vld [vmem:[%s1857_s1 + $0x18] sm:$0xff] (!%p1201_p9)  ;;  %v512_v18 = vld [vmem:[%s1857_s1] sm:$0xff] (!%p1201_p9)  ;;  %v1491_v23 = vmov (!%p1201_p9), 0.0   ;;  %vm532_vm0 = vcmask (!%p1201_p9), 261120   ;;  %v522_v3 = vlaneseq (!%p1201_p9) }
  0x2f   : > { %s1620_s30 = scalar_lea.vmem %s1868_s12, %s1200_s26  ;;  %v1340_v19 = vpack.c.bf16 (!%p1201_p9), %v515_v17, %v513_v16  ;;  %v514_v20 = vld [vmem:[%s1857_s1 + $0x10] sm:$0xff] (!%p1201_p9)  ;;  %v517_v21 = vld [vmem:[%s1857_s1 + $0x28] sm:$0xff] (!%p1201_p9)  ;;  %v519_v22 = vld [vmem:[%s1857_s1 + $0x38] sm:$0xff] (!%p1201_p9)  ;;  %600 = vmatprep.mubr.f32.mxu1 (!%p1201_p9), %v1491_v23  ;;  %789 = vmatprep.mubr.f32.mxu0 (!%p1201_p9), %v1491_v23  ;;  %v1492_v37 = vmov (!%p1201_p9), 0.0|0.0   ;;  %vm1493_vm1 = vmmov (!%p1201_p9), 0   ;;  %vm803_vm2 = vcmask (!%p1201_p9), 523264  }
  0x30   : > { %v1342_v24 = vpack.c.bf16 (!%p1201_p9), %v514_v20, %v512_v18  ;;  %v1344_v25 = vpack.c.bf16 (!%p1201_p9), %v519_v22, %v517_v21  ;;  %v516_v26 = vld [vmem:[%s1857_s1 + $0x20] sm:$0xff] (!%p1201_p9)  ;;  %v518_v27 = vld [vmem:[%s1857_s1 + $0x30] sm:$0xff] (!%p1201_p9)  ;;  %v610_v30 = vld [vmem:[%s1859_s3 + $0x8] sm:$0xff] (!%p1201_p9)  ;;  %v523_v4 = vshrl.u32 (!%p1201_p9), %v522_v3, 7  ;;  %vm898_vm3 = vcmask (!%p1201_p9), 130048  }
  0x31   : > { %1341 = vmatprep.subr.bf16.mxu1 (!%p1201_p9), %v1340_v19  ;;  %v1346_v28 = vpack.c.bf16 (!%p1201_p9), %v518_v27, %v516_v26  ;;  %v609_v29 = vld [vmem:[%s1859_s3] sm:$0xff] (!%p1201_p9)  ;;  %v703_v32 = vld [vmem:[%s1861_s5 + $0x8] sm:$0xff] (!%p1201_p9)  ;;  %v705_v34 = vld [vmem:[%s1861_s5 + $0x18] sm:$0xff] (!%p1201_p9) }
  0x32   : > { %1343 = vmatpush1.bf16.msra.mxu1 (!%p1201_p9), %v1342_v24  ;;  %v511_v31 = vld [vmem:[%s1856_s0] sm:$0xff] (!%p1201_p9)  ;;  %v1349_v33 = vpack.c.bf16 (!%p1201_p9), %v610_v30, %v609_v29  ;;  %v704_v36 = vld [vmem:[%s1861_s5 + $0x10] sm:$0xff] (!%p1201_p9)  ;;  %v612_v39 = vld [vmem:[%s1859_s3 + $0x18] sm:$0xff] (!%p1201_p9)  ;;  %v1372_v40 = vpack.c.bf16 (!%p1201_p9), %v705_v34, %v703_v32  ;;  %v524_v5 = vsub.s32 (!%p1201_p9), 0, %v523_v4  ;;  %v528_v7 = vsub.s32 (!%p1201_p9), 1, %v523_v4 }
  0x33   : > { %1345 = vmatprep.subr.bf16.mxu1 (!%p1201_p9), %v1344_v25  ;;  %v702_v35 = vld [vmem:[%s1861_s5] sm:$0xff] (!%p1201_p9)  ;;  %v611_v38 = vld [vmem:[%s1859_s3 + $0x10] sm:$0xff] (!%p1201_p9)  ;;  %v614_v44 = vld [vmem:[%s1859_s3 + $0x28] sm:$0xff] (!%p1201_p9) }
  0x34   : > { %v1374_v41 = vpack.c.bf16 %v704_v36, %v702_v35  ;;  %1373 = vmatprep.subr.bf16.mxu0 %v1372_v40  ;;  %v1352_v42 = vpack.c.bf16 %v612_v39, %v611_v38  ;;  %v613_v43 = vld [vmem:[%s1859_s3 + $0x20] sm:$0xff]  ;;  %v615_v46 = vld [vmem:[%s1859_s3 + $0x30] sm:$0xff]  ;;  %v616_v47 = vld [vmem:[%s1859_s3 + $0x38] sm:$0xff] }
  0x35   : > { %v1355_v45 = vpack.c.bf16 %v614_v44, %v613_v43  ;;  %v1358_v48 = vpack.c.bf16 %v616_v47, %v615_v46  ;;  %v617_v49 = vld [vmem:[%s1859_s3 + $0x40] sm:$0xff]  ;;  %v618_v50 = vld [vmem:[%s1859_s3 + $0x48] sm:$0xff]  ;;  %v619_v52 = vld [vmem:[%s1859_s3 + $0x50] sm:$0xff] }
  0x36   : > { %1347 = vmatpush1.bf16.msra.mxu1 %v1346_v28  ;;  %1375 = vmatpush1.bf16.msra.mxu0 %v1374_v41  ;;  %v1361_v51 = vpack.c.bf16 %v618_v50, %v617_v49  ;;  %v620_v53 = vld [vmem:[%s1859_s3 + $0x58] sm:$0xff]  ;;  %v621_v55 = vld [vmem:[%s1859_s3 + $0x60] sm:$0xff]  ;;  %v622_v56 = vld [vmem:[%s1859_s3 + $0x68] sm:$0xff] }
  0x37   : > { %1348 = vmatprep.subr.bf16.mxu1 %v1492_v37  ;;  %v1364_v54 = vpack.c.bf16 %v620_v53, %v619_v52  ;;  %v1367_v57 = vpack.c.bf16 %v622_v56, %v621_v55  ;;  %v623_v58 = vld [vmem:[%s1859_s3 + $0x70] sm:$0xff]  ;;  %v624_v59 = vld [vmem:[%s1859_s3 + $0x78] sm:$0xff]  ;;  %v707_v60 = vld [vmem:[%s1861_s5 + $0x28] sm:$0xff] }
  0x38   : > { %v1370_v61 = vpack.c.bf16 %v624_v59, %v623_v58  ;;  %v709_v62 = vld [vmem:[%s1861_s5 + $0x38] sm:$0xff]  ;;  %v706_v63 = vld [vmem:[%s1861_s5 + $0x20] sm:$0xff]  ;;  %v708_v0 = vld [vmem:[%s1861_s5 + $0x30] sm:$0xff] }
  0x39   : > { %1202 = vmatmul.mubr.msk.f32.vlgmr.msra.gmra.mrb[0].mxu1 %vm532_vm0, %v511_v31  ;;  %v1376_v1 = vpack.c.bf16 %v709_v62, %v707_v60  ;;  %v1378_v2 = vpack.c.bf16 %v708_v0, %v706_v63  ;;  %v520_v6 = vld [vmem:[%s1858_s2] sm:$0x3]  ;;  %v811_v15 = vld [vmem:[%s1863_s7 + $0x8] sm:$0xff]  ;;  %v812_v16 = vld [vmem:[%s1863_s7 + $0x10] sm:$0xff] }
  0x3a   : > { %1350 = vmatpush3.bf16.msra.mxu1 %v1349_v33  ;;  %1295 = vmatprep.mubr.msk.f32.mxu1 %vm1493_vm1, %v1491_v23  ;;  %v525_v8 = vrot.slane %v520_v6, %v524_v5  ;;  %v529_v9 = vrot.slane %v520_v6, %v528_v7  ;;  %v810_v14 = vld [vmem:[%s1863_s7] sm:$0xff]  ;;  %v813_v18 = vld [vmem:[%s1863_s7 + $0x18] sm:$0xff]  ;;  %v815_v21 = vld [vmem:[%s1863_s7 + $0x28] sm:$0xff] }
  0x3b   : > { %1351 = vmatprep.subr.bf16.mxu1 %v1492_v37  ;;  %1377 = vmatprep.subr.bf16.mxu0 %v1376_v1  ;;  %v1381_v17 = vpack.c.bf16 %v811_v15, %v810_v14  ;;  %v1384_v19 = vpack.c.bf16 %v813_v18, %v812_v16  ;;  %v814_v20 = vld [vmem:[%s1863_s7 + $0x20] sm:$0xff]  ;;  %v817_v24 = vld [vmem:[%s1863_s7 + $0x38] sm:$0xff]  ;;  %v819_v40 = vld [vmem:[%s1863_s7 + $0x48] sm:$0xff] }
  0x3c   : > { %1379 = vmatpush1.bf16.msra.mxu0 %v1378_v2  ;;  %v1387_v22 = vpack.c.bf16 %v815_v21, %v814_v20  ;;  %v710_v26 = vld [vmem:[%s1862_s6] sm:$0x3]  ;;  %v820_v44 = vld [vmem:[%s1863_s7 + $0x50] sm:$0xff]  ;;  %v897_v55 = vld [vmem:[%s1864_s8 + $0x8] sm:$0xff] }
  0x3d   : > { %1380 = vmatprep.subr.bf16.mxu0 %v1492_v37  ;;  %v1203_v27 = vld [vmem:[%s1860_s4] ss:$0 sm:$0xff]  ;;  %v715_v28 = vrot.slane %v710_v26, %v524_v5  ;;  %v719_v29 = vrot.slane %v710_v26, %v528_v7  ;;  %v824_v50 = vld [vmem:[%s1863_s7 + $0x70] sm:$0xff] }
  0x3e   : > { %1353 = vmatpush3.bf16.msra.mxu1 %v1352_v42  ;;  %v818_v39 = vld [vmem:[%s1863_s7 + $0x40] sm:$0xff] }
  0x3f   : > { %1354 = vmatprep.subr.bf16.mxu1 %v1492_v37  ;;  %v1393_v41 = vpack.c.bf16 %v819_v40, %v818_v39  ;;  %v822_v47 = vld [vmem:[%s1863_s7 + $0x60] sm:$0xff] }
  0x42   : > { %1356 = vmatpush3.bf16.msra.mxu1 %v1355_v45  ;;  %v821_v45 = vld [vmem:[%s1863_s7 + $0x58] sm:$0xff] }
  0x43   : > { %1357 = vmatprep.subr.bf16.mxu1 %v1492_v37  ;;  %v1396_v46 = vpack.c.bf16 %v821_v45, %v820_v44 }
  0x46   : > { %1359 = vmatpush3.bf16.msra.mxu1 %v1358_v48  ;;  %v823_v48 = vld [vmem:[%s1863_s7 + $0x68] sm:$0xff] }
  0x47   : > { %1360 = vmatprep.subr.bf16.mxu1 %v1492_v37  ;;  %v1399_v49 = vpack.c.bf16 %v823_v48, %v822_v47 }
  0x4a   : > { %1362 = vmatpush3.bf16.msra.mxu1 %v1361_v51  ;;  %v825_v51 = vld [vmem:[%s1863_s7 + $0x78] sm:$0xff] }
  0x4b   : > { %1363 = vmatprep.subr.bf16.mxu1 %v1492_v37  ;;  %v1402_v52 = vpack.c.bf16 %v825_v51, %v824_v50 }
  0x4e   : > { %1365 = vmatpush3.bf16.msra.mxu1 %v1364_v54  ;;  %v896_v54 = vld [vmem:[%s1864_s8] sm:$0xff] }
  0x4f   : > { %1366 = vmatprep.subr.bf16.mxu1 %v1492_v37  ;;  %v1405_v56 = vpack.c.bf16 %v897_v55, %v896_v54 }
  0x52   : > { %1368 = vmatpush3.bf16.msra.mxu1 %v1367_v57 }
  0x53   : > { %1369 = vmatprep.subr.bf16.mxu1 %v1492_v37 }
  0x56   : > { %1371 = vmatpush3.bf16.msra.mxu1 %v1370_v61 }
  0x57   : > { %1404 = vmatprep.subr.bf16.mxu1 %v1492_v37 }
 0x10c   : > { %v602_v10 = vpop.f32.mrb[0].mxu1 }
 0x10d   : > { %v603_v11 = vadd.f32 %v602_v10, %v525_v8  ;;  %v604_v12 = vpop.f32.mrb[1].mxu1 }
 0x10e   : > { %v605_v13 = vadd.f32 %v604_v12, %v529_v9 }
 0x10f   : > { %607 = vst [vmem:[%s1866_s10] sm:$0xff] %v603_v11  ;;  %1296 = vmatmul.mubr.f32.vlgmr.msra.gmra.mrb[2].mxu1 %v603_v11 }
 0x110   : > { %608 = vst.msk [vmem:[%s1866_s10 + $0x8] sm:$0xff] %vm532_vm0, %v605_v13  ;;  %1204 = vmatmul.mubr.msk.f32.vlgmr.msra.gmra.mrb[0].mxu0 %vm532_vm0, %v605_v13  ;;  %1337 = vmatprep.mubr.msk.f32.mxu1 %vm1493_vm1, %v1491_v23 }
 0x111   : > { %1330 = vmatprep.mubr.msk.f32.mxu0 %vm1493_vm1, %v1491_v23  ;;  %1382 = vmatpush3.bf16.msra.mxu0 %v1381_v17  ;;  %v816_v23 = vld [vmem:[%s1863_s7 + $0x30] sm:$0xff] }
 0x112   : > { %1383 = vmatprep.subr.bf16.mxu0 %v1492_v37  ;;  %v1390_v25 = vpack.c.bf16 %v817_v24, %v816_v23  ;;  %1406 = vmatpush3.bf16.msra.mxu1 %v1405_v56 }
 0x115   : > { %1385 = vmatpush3.bf16.msra.mxu0 %v1384_v19 }
 0x116   : > { %1386 = vmatprep.subr.bf16.mxu0 %v1492_v37 }
 0x119   : > { %1388 = vmatpush3.bf16.msra.mxu0 %v1387_v22 }
 0x11a   : > { %1389 = vmatprep.subr.bf16.mxu0 %v1492_v37 }
 0x11d   : > { %1391 = vmatpush3.bf16.msra.mxu0 %v1390_v25 }
 0x11e   : > { %1392 = vmatprep.subr.bf16.mxu0 %v1492_v37 }
 0x121   : > { %1394 = vmatpush3.bf16.msra.mxu0 %v1393_v41 }
 0x122   : > { %1395 = vmatprep.subr.bf16.mxu0 %v1492_v37 }
 0x125   : > { %1397 = vmatpush3.bf16.msra.mxu0 %v1396_v46 }
 0x126   : > { %1398 = vmatprep.subr.bf16.mxu0 %v1492_v37 }
 0x129   : > { %1400 = vmatpush3.bf16.msra.mxu0 %v1399_v49 }
 0x12a   : > { %1401 = vmatprep.subr.bf16.mxu0 %v1492_v37 }
 0x12d   : > { %1403 = vmatpush3.bf16.msra.mxu0 %v1402_v52 }
 0x1e2   : > { %v698_v30 = vpop.f32.mrb[2].mxu1 }
 0x1e3   : > { %v699_v31 = vadd.f32 %v1203_v27, %v698_v30  ;;  %v1297_v32 = vpop.f32.mrb[3].mxu1  ;;  %v791_v33 = vpop.f32.mrb[0].mxu0 }
 0x1e4   : > { %v792_v34 = vadd.f32 %v791_v33, %v715_v28  ;;  %v793_v35 = vpop.f32.mrb[1].mxu0 }
 0x1e5   : > { %802 = vst [vmem:[%s1867_s11] sm:$0xff] %v699_v31  ;;  %v794_v36 = vadd.f32 %v793_v35, %v719_v29 }
 0x1e6   : > { %805 = vmax.xlane.f32.xlu0 %v792_v34 }
 0x1e7   : > { %v1205_v38 = vmul.f32 -1.442695, %v794_v36 }
 0x1e9   : > { %1435 = vpow2.f32 %v1205_v38 }
 0x1f3   : > { %v1436_v42 = vpop.eup %1435 }
 0x1f4   : > { %v799_v43 = vadd.f32 1.0, %v1436_v42 }
 0x1f6   : > { %1437 = vrcp.f32 %v799_v43 }
 0x200   : > { %v1438_v53 = vpop.eup %1437 }
 0x201   : > { %804 = vst.msk [vmem:[%s1867_s11 + $0x8] sm:$0xff] %vm803_vm2, %v1438_v53 }
 0x273   : > { %v806_v57 = vpop.xlane.xlu0 %805 }
 0x274   : > { %v807_v58 = vsub.f32 %v792_v34, %v806_v57 }
 0x276   : > { %v808_v37 = vmul.f32 1.442695, %v807_v58 }
 0x278   : > { %1439 = vpow2.f32 %v808_v37 }
 0x282   : > { %v1440_v59 = vpop.eup %1439 }
 0x283   : > { %1331 = vmatmul.mubr.f32.vlgmr.msra.gmra.mrb[2].mxu0 %v1440_v59 }
 0x356   : > { %v892_v60 = vpop.f32.mrb[2].mxu0 }
 0x357   : > { %v1332_v61 = vpop.f32.mrb[3].mxu0  ;;  %1338 = vmatmul.mubr.msk.f32.vlgmr.msra.gmra.mrb[4].mxu1 %vm898_vm3, %v892_v60 }
 0x42a   : > { %v968_v62 = vpop.f32.mrb[4].mxu1 }
 0x42b   : > { %1441 = vrcp.f32 %v968_v62  ;;  %v1339_v63 = vpop.f32.mrb[5].mxu1 }
 0x435   : > { %v1442_v0 = vpop.eup %1441 }
 0x436   : > { %v973_v1 = vmul.f32 %v1442_v0, %v1440_v59 }
 0x438   : > { %v974_v2 = vpack.c.bf16 %v973_v1, %v973_v1 }
 0x43a   : > { %975 = vst [vmem:[#allocation2] sm:$0xf] %v974_v2 }
 0x43b PF: > { %v1443_v3 = vld [vmem:[%s1622_s13 + $0x4] ss:$8 sps:$4 sm:$0xff]   ;;  %v1445_v4 = vld [vmem:[%s1622_s13] ss:$8 sps:$4 sm:$0xff]   ;;  %v1494_v5 = vmov 0  }
 0x43c   : > { %1105 = vmatprep.mubr.bf16.mxu0 %v1494_v5  ;;  %1073 = vmatprep.subr.bf16.mxu0 %v1443_v3  ;;  %v1446_v6 = vld [vmem:[%s1622_s13 + $0x14] ss:$8 sps:$4 sm:$0xff]   ;;  %v1448_v7 = vld [vmem:[%s1622_s13 + $0x10] ss:$8 sps:$4 sm:$0xff]   ;;  %v1449_v8 = vld [vmem:[%s1622_s13 + $0x24] ss:$8 sps:$4 sm:$0xff]  }
 0x43d   : > { %1074 = vmatpush1.bf16.msra.mxu0 %v1445_v4  ;;  %v1451_v9 = vld [vmem:[%s1622_s13 + $0x20] ss:$8 sps:$4 sm:$0xff]   ;;  %v1452_v10 = vld [vmem:[%s1622_s13 + $0x34] ss:$8 sps:$4 sm:$0xff]   ;;  %v1454_v11 = vld [vmem:[%s1622_s13 + $0x30] ss:$8 sps:$4 sm:$0xff]  }
 0x43e   : > { %1075 = vmatprep.subr.bf16.mxu0 %v1446_v6  ;;  %v1455_v12 = vld [vmem:[%s1622_s13 + $0x44] ss:$8 sps:$4 sm:$0xff]   ;;  %v1457_v13 = vld [vmem:[%s1622_s13 + $0x40] ss:$8 sps:$4 sm:$0xff]   ;;  %v1458_v14 = vld [vmem:[%s1622_s13 + $0x54] ss:$8 sps:$4 sm:$0xff]  }
 0x43f   : > { %v1460_v15 = vld [vmem:[%s1622_s13 + $0x50] ss:$8 sps:$4 sm:$0xff]   ;;  %v1461_v16 = vld [vmem:[%s1622_s13 + $0x64] ss:$8 sps:$4 sm:$0xff]   ;;  %v1463_v17 = vld [vmem:[%s1622_s13 + $0x60] ss:$8 sps:$4 sm:$0xff]  }
 0x440   : > { %v1464_v18 = vld [vmem:[%s1622_s13 + $0x74] ss:$8 sps:$4 sm:$0xff]   ;;  %v1466_v19 = vld [vmem:[%s1622_s13 + $0x70] ss:$8 sps:$4 sm:$0xff]  }
 0x441   : > { %1076 = vmatpush1.bf16.msra.mxu0 %v1448_v7  ;;  %v976_v20 = vld [vmem:[#allocation2] sm:$0xf] }
 0x442   : > { %1077 = vmatprep.subr.bf16.mxu0 %v1449_v8 }
 0x445   : > { %1078 = vmatpush1.bf16.msra.mxu0 %v1451_v9 }
 0x446   : > { %1079 = vmatprep.subr.bf16.mxu0 %v1452_v10 }
 0x449   : > { %1080 = vmatpush1.bf16.msra.mxu0 %v1454_v11 }
 0x44a   : > { %1081 = vmatprep.subr.bf16.mxu0 %v1455_v12 }
 0x44d   : > { %1082 = vmatpush1.bf16.msra.mxu0 %v1457_v13 }
 0x44e   : > { %1083 = vmatprep.subr.bf16.mxu0 %v1458_v14 }
 0x451   : > { %1084 = vmatpush1.bf16.msra.mxu0 %v1460_v15 }
 0x452   : > { %1085 = vmatprep.subr.bf16.mxu0 %v1461_v16 }
 0x455   : > { %1086 = vmatpush1.bf16.msra.mxu0 %v1463_v17 }
 0x456   : > { %1087 = vmatprep.subr.bf16.mxu0 %v1464_v18 }
 0x459   : > { %1088 = vmatpush1.bf16.msra.mxu0 %v1466_v19 }
 0x45c   : > { %1106 = vmatmul.mubr.bf16.vlgmr.msra.gmra.mrb[0].mxu0 %v976_v20 }
 0x52f   : > { %v1107_v21 = vpop.f32.mrb[0].mxu0 }
 0x530   : > { %1114 = vst [vmem:[%s1620_s30] sm:$0xff] %v1107_v21  ;;  %v1109_v22 = vpop.f32.mrb[1].mxu0 }
 0x531   : > { %1115 = vst [vmem:[%s1620_s30 + $0x8] sm:$0xff] %v1109_v22  ;;  %v1111_v23 = vpop.f32.mrb[2].mxu0 }
 0x532   : > { %v1112_v24 = vpop.f32.mrb[3].mxu0 }
 0x533 PF: > { %p20_p10 = scmp.ge.s32.totalorder %s1577_s25, 6   ;;  %s1869_s21 = smov %s1485_s22 }
 0x534   : > { %s1870_s22 = smov %s1586_s28  ;;  %s1871_s23 = smov %s1577_s25 }
 0x535   :  { %22 = sbr.rel (!%p20_p10) target bundleno = 2 (0x2), region = 153 }

// kernel: reverse.3
= control target key start
LH: loop header
LB: loop body
LE: loop exit
PB: predicated region body
PF: predicated region fallthrough
CT: control target
= control target key end

     0   :  { %v2_v0 = vlaneseq  ;;  %s318_s0 = inlined_call_operand.vmem [shape: f32[8,1,1024], index: 0, kind: input, shape index: {}]   ;;  %s319_s1 = inlined_call_operand.vmem [shape: f32[8,1,1024], index: 1, kind: output, shape index: {}]  }
   0x2   :  { %v3_v1 = vsub.s32 127, %v2_v0 }
   0x4   :  { %4 = vset.pattern.permute.xlu0 %v3_v1 }
   0x5   :  { %s281_s6 = smov 0   ;;  %s283_s7 = smov 0  }
   0x6   :  { %s285_s8 = smov 0  }
   0x7 LB: > { %s211_s9 = sadd.s32 4294967295, %s269_s8   ;;  %s22_s10 = sadd.s32 1, %s265_s7  ;;  %s269_s8 = sphi %s285_s8, %s10_s8   ;;  %s265_s7 = sphi %s283_s7, %s321_s7   ;;  %s261_s6 = sphi %s281_s6, %s320_s6  }
   0x8   : > { %p23_p0 = scmp.ge.s32.totalorder %s22_s10, 8  ;;  %p213_p1 = scmp.ge.s32.totalorder %s269_s8, 8 }
   0x9   : > { %s45_s11 = sand.u32 (!%p213_p1), 1, %s269_s8   ;;  %s48_s12 = ssub.s32 (!%p213_p1), 7, %s265_s7 }
   0xa   : > { %s323_s10 = smov (%p23_p0, %s22_s10), 0  ;;  %43 = sbr.rel (%p213_p1) target bundleno = 17 (0x11), region = 16 }
   0xb   : > { %s214_s13 = sshll.u32 (!%p213_p1), %s45_s11, 3  ;;  %s215_s14 = sshll.u32 (!%p213_p1), %s48_s12, 3 }
   0xc   : > { %s54_s17 = scalar_lea.vmem (!%p213_p1), %s318_s0, %s215_s14  ;;  %s47_s18 = scalar_lea.vmem (!%p213_p1), [#allocation0], %s214_s13 }
   0xd   : > { %v82_v2 = vld [vmem:[%s54_s17] sm:$0xff] (!%p213_p1) }
   0xe   : > { %83 = vst [vmem:[%s47_s18] sm:$0xff] (!%p213_p1), %v82_v2 }
  0x11 PF: > { %p216_p2 = scmp.ge.s32.totalorder %s269_s8, 1  ;;  %p88_p3 = scmp.lt.s32.totalorder %s269_s8, 9 }
  0x13   : > { %p89_p4 = pnand %p216_p2, %p88_p3 }
  0x14   : > { %s95_s19 = sand.u32 (!%p89_p4), 1, %s211_s9   ;;  %s220_s22 = sshll.u32 (!%p89_p4), %s261_s6, 3 }
  0x15   : > { %92 = sbr.rel (%p89_p4) target bundleno = 153 (0x99), region = 54  ;;  %s217_s20 = sshll.u32 (!%p89_p4), %s95_s19, 3 }
  0x16   : > { %s97_s21 = scalar_lea.vmem (!%p89_p4), [#allocation0], %s217_s20  ;;  %s120_s25 = scalar_lea.vmem (!%p89_p4), %s319_s1, %s220_s22 }
  0x17   : > { %v107_v3 = vld [vmem:[%s97_s21] sm:$0xff] (!%p89_p4) }
  0x18   : > { %108 = vperm.xlu0 (!%p89_p4), %4, %v107_v3  }
  0x97   : > { %v109_v4 = vpop.permute.xlu0 %108 }
  0x98   : > { %149 = vst [vmem:[%s120_s25] sm:$0xff] %v109_v4 }
  0x99 PF: > { %s10_s8 = sadd.s32 1, %s269_s8   ;;  %s320_s6 = smov %s265_s7 }
  0x9a   : > { %p7_p5 = scmp.ge.s32.totalorder %s10_s8, 10   ;;  %s321_s7 = smov %s323_s10 }
  0x9c   :  { %9 = sbr.rel (!%p7_p5) target bundleno = 7 (0x7), region = 118 }

// kernel: custom-call.2
= control target key start
LH: loop header
LB: loop body
LE: loop exit
PB: predicated region body
PF: predicated region fallthrough
CT: control target
= control target key end

     0   :  { %s6_s0 = inlined_call_operand.vmem [shape: f32[8,1024], index: 0, kind: output, shape index: {}]  }

</bundles_post_ra>
